<compile_context>
chip_gen: v5e
topology: v5e:2x2
jax: 0.10.0
libtpu: 0.0.40
codegen_flags: <defaults>
</compile_context>

<pallas_src>
import jax
import jax.numpy as jnp
from jax.experimental import pallas as pl
from jax.experimental.pallas import tpu as pltpu

B, T, N = 32, 10, 16          # batch, seq len, graph nodes (fixed by reshape(32,10,-1))
F = 8                         # GCN output feature dim
H = 32                        # LSTM hidden size
D = N * F                     # LSTM input size = 128


def net_kernel(x_ref, g_ref, gcnb_ref,
               wih_ref, whh_ref, lstmb_ref,
               w2_ref, b2_ref,
               out_ref):
    Bp = out_ref.shape[0]     # batch rows handled by this grid block

    def project(t):
        """GCN(1->F) + ReLU + LSTM input projection for timestep chunk t.

        Chunked (instead of one (T*Bp,128)@(128,128) prologue) so chunk t+1's
        MXU work overlaps recurrence step t.  Dropout(p=0.5) is identity in eval.
        """
        xt = x_ref[pl.ds(t * Bp, Bp), :]                                  # (Bp, N) bf16
        z = jnp.dot(xt, g_ref[...], preferred_element_type=jnp.float32) + gcnb_ref[...]
        z = jnp.maximum(z, 0.0).astype(wih_ref.dtype)                     # ReLU -> bf16
        # gates_x = z @ W_ih^T + (b_ih + b_hh); g-gate columns pre-scaled by 2 offline.
        return (jnp.dot(z, wih_ref[...], preferred_element_type=jnp.float32)
                + lstmb_ref[...])                                         # (Bp, 4H) f32

    # hidden is init_hidden() zeros -> carry initialized in-kernel (no h0/c0 DMA).
    h = jnp.zeros((Bp, H), jnp.float32)
    c = jnp.zeros((Bp, H), jnp.float32)

    # ---- LSTM(D->H), single layer, gate order i,f,g,o; fully unrolled ----
    gates_x = project(0)                      # only chunk 0 is on the critical path
    for t in range(T):
        # Issue next chunk's GCN+projection; independent of this step's recurrence,
        # so the scheduler hides it under the sigmoid/tanh/VPU chain below.
        gates_x_next = project(t + 1) if t + 1 < T else None

        gates = gates_x + jnp.dot(h, whh_ref[...], preferred_element_type=jnp.float32)
        act = jax.nn.sigmoid(gates)           # one lane-dense (Bp, 4H) sigmoid for all gates
        i_g = act[:, 0 * H:1 * H]
        f_g = act[:, 1 * H:2 * H]
        g_g = 2.0 * act[:, 2 * H:3 * H] - 1.0  # tanh(x) = 2*sigmoid(2x)-1 (2x folded offline)
        o_g = act[:, 3 * H:4 * H]
        c = f_g * c + i_g * g_g
        h = o_g * jnp.tanh(c)
        gates_x = gates_x_next

    # ReLU on LSTM output, dropout = identity (eval), keep last timestep only
    h_relu = jnp.maximum(h, 0.0)                                          # (Bp, H)

    # ---- Linear(32 -> 1) + sigmoid ----
    logits = jnp.sum(h_relu * w2_ref[...], axis=-1, keepdims=True) + b2_ref[...]
    out_ref[...] = jax.nn.sigmoid(logits)                                 # (Bp, 1)


def init_params(key):
    """Deterministic parameter init mirroring the module's __init__."""
    k1, k2, k3, k4, k5 = jax.random.split(key, 5)
    # GCNConv lin.weight: (F, 1) xavier_normal; bias: zeros (module zeros it)
    w_gcn = jax.random.normal(k1, (F,), jnp.float32) * jnp.sqrt(2.0 / (1 + F))
    b_gcn = jnp.zeros((F,), jnp.float32)
    expand = jnp.kron(jnp.eye(N, dtype=jnp.float32), w_gcn.reshape(1, F))   # (N, D)
    gcn_bias = jnp.tile(b_gcn, N).reshape(1, D)                              # (1, D)
    # LSTM: weight_ih (4H, D), weight_hh (4H, H) xavier_normal; biases zeros (module zeros them)
    w_ih = jax.random.normal(k2, (4 * H, D), jnp.float32) * jnp.sqrt(2.0 / (4 * H + D))
    w_hh = jax.random.normal(k3, (4 * H, H), jnp.float32) * jnp.sqrt(2.0 / (4 * H + H))
    lstm_bias = jnp.zeros((1, 4 * H), jnp.float32)                           # b_ih + b_hh
    # Linear2: weight (1, H) xavier_uniform; bias default U(-1/sqrt(H), 1/sqrt(H))
    bound = float(jnp.sqrt(6.0 / (1 + H)))
    w2 = jax.random.uniform(k4, (1, H), jnp.float32, -bound, bound)
    b2 = jax.random.uniform(k5, (1, 1), jnp.float32,
                            -1.0 / float(jnp.sqrt(H)), 1.0 / float(jnp.sqrt(H)))
    return dict(expand=expand, gcn_bias=gcn_bias,
                wih_T=jnp.asarray(w_ih.T), whh_T=jnp.asarray(w_hh.T),
                lstm_bias=lstm_bias, w2=w2, b2=b2)


def normalized_adjacency(edge_index):
    """GCNConv-style D^{-1/2}(A+I)D^{-1/2} as a dense (N, N) matrix (host-side glue)."""
    adj = jnp.zeros((N, N), jnp.float32)
    adj = adj.at[edge_index[0], edge_index[1]].set(1.0)
    adj = adj + jnp.eye(N, dtype=jnp.float32)            # add self loops
    deg = adj.sum(axis=1)
    dinv = 1.0 / jnp.sqrt(deg)
    return adj * dinv[:, None] * dinv[None, :]


def _scale_g_gate(mat):
    """Fold the 2x of tanh(x)=2*sigmoid(2x)-1 into the g-gate columns (last axis).

    CONTRACT: the kernel expects W_ih, W_hh AND the fused bias with the g-gate
    columns pre-scaled by 2; raw checkpoint weights MUST go through this helper.
    """
    return mat.at[..., 2 * H:3 * H].multiply(2.0)


def _num_batch_blocks():
    """Split the batch across TensorCores only on v7x (2 TCs/chip)."""
    try:
        kind = jax.devices()[0].device_kind.lower()
        if ("v7" in kind) or ("7x" in kind):
            return 2
    except Exception:
        pass
    return 1


def net_forward(x, edge_index, params, hidden=None):
    # `hidden` is the module's init_hidden() (all zeros); the kernel initializes the
    # LSTM carry to zeros internally, so it is not DMA'd in.
    # TODO(synk): nonzero initial hidden state and training-mode dropout are not wired in.
    del hidden

    a_hat = normalized_adjacency(edge_index)
    # Fuse the two GCN matmuls offline:  x @ A_hat^T @ expand  ==  x @ G   (bf16 operand)
    G = jnp.dot(a_hat.T, params["expand"]).astype(jnp.bfloat16)        # (N, D)

    # Pack LSTM weights: g-gate columns scaled by 2 (tanh trick). W_ih in bf16 for the
    # big projection; W_hh stays f32 on the recurrence chain.
    wih_T = _scale_g_gate(params["wih_T"]).astype(jnp.bfloat16)        # (D, 4H)
    whh_T = _scale_g_gate(params["whh_T"])                             # (H, 4H)
    lstmb = _scale_g_gate(params["lstm_bias"])                         # (1, 4H)

    nb = _num_batch_blocks()
    if (B % nb) or ((B // nb) % 8):
        nb = 1
    Bp = B // nb

    # (B, N, T) -> module's unsqueeze/transpose/reshape semantics -> rows ordered
    # (batch-block, t, b-within-block); block p is the contiguous batch slice
    # [p*Bp, (p+1)*Bp), so the output rows land in original batch order.
    x_blk = (jnp.transpose(x, (2, 0, 1)).astype(jnp.bfloat16)          # (T, B, N)
             .reshape(T, nb, Bp, N)
             .transpose(1, 0, 2, 3)
             .reshape(nb * T * Bp, N))

    weight_arrays = [G, params["gcn_bias"], wih_T, whh_T, lstmb,
                     params["w2"], params["b2"]]
    # Weights: full-array blocks, constant index_map -> DMA'd once, stay resident.
    weight_specs = [pl.BlockSpec(a.shape, lambda p: (0, 0)) for a in weight_arrays]

    out = pl.pallas_call(
        net_kernel,
        out_shape=jax.ShapeDtypeStruct((B, 1), jnp.float32),
        grid_spec=pltpu.PrefetchScalarGridSpec(
            num_scalar_prefetch=0,
            grid=(nb,),
            in_specs=[pl.BlockSpec((T * Bp, N), lambda p: (p, 0))] + weight_specs,
            out_specs=pl.BlockSpec((Bp, 1), lambda p: (p, 0)),
        ),
        compiler_params=pltpu.CompilerParams(dimension_semantics=("parallel",)),
    )(x_blk, *weight_arrays)
    return out


if __name__ == "__main__":
    key = jax.random.PRNGKey(0)
    kx, kp = jax.random.split(key)

    # data.x : (B, N, T); deterministic ring graph over the 16 nodes
    x = jax.random.normal(kx, (B, N, T), jnp.float32)
    src = jnp.arange(N, dtype=jnp.int32)
    dst = (src + 1) % N
    edge_index = jnp.stack([jnp.concatenate([src, dst]),
                            jnp.concatenate([dst, src])])    # (2, 2N)

    params = init_params(kp)
    hidden = (jnp.zeros((1, B, H), jnp.float32),             # init_hidden(batch_size)
              jnp.zeros((1, B, H), jnp.float32))

    out = net_forward(x, edge_index, params, hidden)
    out = jax.block_until_ready(out)
    assert out.shape == (B, 1) and bool(jnp.all((out >= 0) & (out <= 1)))
    print("KERNEL_OK")
</pallas_src>

<mosaic_0001>
module attributes {stable_mosaic.version = 11 : i64} {
  func.func @net_kernel(%arg0: i32, %arg1: memref<320x16xbf16, #tpu.memory_space<vmem>>, %arg2: memref<16x128xbf16, #tpu.memory_space<vmem>>, %arg3: memref<1x128xf32, #tpu.memory_space<vmem>>, %arg4: memref<128x128xbf16, #tpu.memory_space<vmem>>, %arg5: memref<32x128xf32, #tpu.memory_space<vmem>>, %arg6: memref<1x128xf32, #tpu.memory_space<vmem>>, %arg7: memref<1x32xf32, #tpu.memory_space<vmem>>, %arg8: memref<1x1xf32, #tpu.memory_space<vmem>>, %arg9: memref<32x1xf32, #tpu.memory_space<vmem>>) attributes {dimension_semantics = [#tpu.dimension_semantics<parallel>], iteration_bounds = array<i64: 1>, scalar_prefetch = 0 : i64, scratch_operands = 0 : i64, tpu.core_type = #tpu.core_type<tc>, window_params = [{transform_indices = @transform_0, window_bounds = array<i64: 320, 16>}, {pipeline_mode = #tpu.pipeline_mode<synchronous>, transform_indices = @transform_1, window_bounds = array<i64: 16, 128>}, {pipeline_mode = #tpu.pipeline_mode<synchronous>, transform_indices = @transform_2, window_bounds = array<i64: 1, 128>}, {pipeline_mode = #tpu.pipeline_mode<synchronous>, transform_indices = @transform_3, window_bounds = array<i64: 128, 128>}, {pipeline_mode = #tpu.pipeline_mode<synchronous>, transform_indices = @transform_4, window_bounds = array<i64: 32, 128>}, {pipeline_mode = #tpu.pipeline_mode<synchronous>, transform_indices = @transform_5, window_bounds = array<i64: 1, 128>}, {pipeline_mode = #tpu.pipeline_mode<synchronous>, transform_indices = @transform_6, window_bounds = array<i64: 1, 32>}, {pipeline_mode = #tpu.pipeline_mode<synchronous>, transform_indices = @transform_7, window_bounds = array<i64: 1, 1>}, {transform_indices = @transform_8, window_bounds = array<i64: 32, 1>}]} {
    %cst = arith.constant 0.000000e+00 : f32
    %0 = vector.broadcast %cst : f32 to vector<32x32xf32>
    %cst_0 = arith.constant 0.000000e+00 : f32
    %1 = vector.broadcast %cst_0 : f32 to vector<32x32xf32>
    %c0 = arith.constant 0 : index
    %c0_1 = arith.constant 0 : index
    %2 = vector.load %arg1[%c0, %c0_1] : memref<320x16xbf16, #tpu.memory_space<vmem>>, vector<32x16xbf16>
    %c0_2 = arith.constant 0 : index
    %c0_3 = arith.constant 0 : index
    %3 = vector.load %arg2[%c0_2, %c0_3] : memref<16x128xbf16, #tpu.memory_space<vmem>>, vector<16x128xbf16>
    %cst_4 = arith.constant dense<0.000000e+00> : vector<32x128xf32>
    %4 = tpu.matmul %2, %3, %cst_4 {dimension_numbers = #tpu.dot_dimension_numbers<[1], [0], [0], [1], [0, 0, 1, 1], [], []>} : vector<32x16xbf16>, vector<16x128xbf16>, vector<32x128xf32> -> vector<32x128xf32>
    %c0_5 = arith.constant 0 : index
    %c0_6 = arith.constant 0 : index
    %5 = vector.load %arg3[%c0_5, %c0_6] : memref<1x128xf32, #tpu.memory_space<vmem>>, vector<1x128xf32>
    %6 = vector.broadcast %5 : vector<1x128xf32> to vector<32x128xf32>
    %7 = arith.addf %4, %6 : vector<32x128xf32>
    %cst_7 = arith.constant 0.000000e+00 : f32
    %8 = vector.broadcast %cst_7 : f32 to vector<32x128xf32>
    %9 = arith.maximumf %7, %8 : vector<32x128xf32>
    %10 = arith.truncf %9 : vector<32x128xf32> to vector<32x128xbf16>
    %c0_8 = arith.constant 0 : index
    %c0_9 = arith.constant 0 : index
    %11 = vector.load %arg4[%c0_8, %c0_9] : memref<128x128xbf16, #tpu.memory_space<vmem>>, vector<128x128xbf16>
    %cst_10 = arith.constant dense<0.000000e+00> : vector<32x128xf32>
    %12 = tpu.matmul %10, %11, %cst_10 {dimension_numbers = #tpu.dot_dimension_numbers<[1], [0], [0], [1], [0, 0, 1, 1], [], []>} : vector<32x128xbf16>, vector<128x128xbf16>, vector<32x128xf32> -> vector<32x128xf32>
    %c0_11 = arith.constant 0 : index
    %c0_12 = arith.constant 0 : index
    %13 = vector.load %arg6[%c0_11, %c0_12] : memref<1x128xf32, #tpu.memory_space<vmem>>, vector<1x128xf32>
    %14 = vector.broadcast %13 : vector<1x128xf32> to vector<32x128xf32>
    %15 = arith.addf %12, %14 : vector<32x128xf32>
    %c32 = arith.constant 32 : index
    %c0_13 = arith.constant 0 : index
    %16 = vector.load %arg1[%c32, %c0_13] : memref<320x16xbf16, #tpu.memory_space<vmem>>, vector<32x16xbf16>
    %c0_14 = arith.constant 0 : index
    %c0_15 = arith.constant 0 : index
    %17 = vector.load %arg2[%c0_14, %c0_15] : memref<16x128xbf16, #tpu.memory_space<vmem>>, vector<16x128xbf16>
    %cst_16 = arith.constant dense<0.000000e+00> : vector<32x128xf32>
    %18 = tpu.matmul %16, %17, %cst_16 {dimension_numbers = #tpu.dot_dimension_numbers<[1], [0], [0], [1], [0, 0, 1, 1], [], []>} : vector<32x16xbf16>, vector<16x128xbf16>, vector<32x128xf32> -> vector<32x128xf32>
    %c0_17 = arith.constant 0 : index
    %c0_18 = arith.constant 0 : index
    %19 = vector.load %arg3[%c0_17, %c0_18] : memref<1x128xf32, #tpu.memory_space<vmem>>, vector<1x128xf32>
    %20 = vector.broadcast %19 : vector<1x128xf32> to vector<32x128xf32>
    %21 = arith.addf %18, %20 : vector<32x128xf32>
    %cst_19 = arith.constant 0.000000e+00 : f32
    %22 = vector.broadcast %cst_19 : f32 to vector<32x128xf32>
    %23 = arith.maximumf %21, %22 : vector<32x128xf32>
    %24 = arith.truncf %23 : vector<32x128xf32> to vector<32x128xbf16>
    %c0_20 = arith.constant 0 : index
    %c0_21 = arith.constant 0 : index
    %25 = vector.load %arg4[%c0_20, %c0_21] : memref<128x128xbf16, #tpu.memory_space<vmem>>, vector<128x128xbf16>
    %cst_22 = arith.constant dense<0.000000e+00> : vector<32x128xf32>
    %26 = tpu.matmul %24, %25, %cst_22 {dimension_numbers = #tpu.dot_dimension_numbers<[1], [0], [0], [1], [0, 0, 1, 1], [], []>} : vector<32x128xbf16>, vector<128x128xbf16>, vector<32x128xf32> -> vector<32x128xf32>
    %c0_23 = arith.constant 0 : index
    %c0_24 = arith.constant 0 : index
    %27 = vector.load %arg6[%c0_23, %c0_24] : memref<1x128xf32, #tpu.memory_space<vmem>>, vector<1x128xf32>
    %28 = vector.broadcast %27 : vector<1x128xf32> to vector<32x128xf32>
    %29 = arith.addf %26, %28 : vector<32x128xf32>
    %c0_25 = arith.constant 0 : index
    %c0_26 = arith.constant 0 : index
    %30 = vector.load %arg5[%c0_25, %c0_26] : memref<32x128xf32, #tpu.memory_space<vmem>>, vector<32x128xf32>
    %cst_27 = arith.constant dense<0.000000e+00> : vector<32x128xf32>
    %31 = tpu.matmul %0, %30, %cst_27 {dimension_numbers = #tpu.dot_dimension_numbers<[1], [0], [0], [1], [0, 0, 1, 1], [], []>} : vector<32x32xf32>, vector<32x128xf32>, vector<32x128xf32> -> vector<32x128xf32>
    %32 = arith.addf %15, %31 : vector<32x128xf32>
    %33 = arith.negf %32 : vector<32x128xf32>
    %34 = math.exp %33 : vector<32x128xf32>
    %cst_28 = arith.constant 1.000000e+00 : f32
    %35 = vector.broadcast %cst_28 : f32 to vector<32x128xf32>
    %36 = arith.addf %35, %34 : vector<32x128xf32>
    %37 = arith.divf %35, %36 : vector<32x128xf32>
    %38 = vector.extract_strided_slice %37 {offsets = [0, 0], sizes = [32, 32], strides = [1, 1]} : vector<32x128xf32> to vector<32x32xf32>
    %39 = vector.extract_strided_slice %37 {offsets = [0, 32], sizes = [32, 32], strides = [1, 1]} : vector<32x128xf32> to vector<32x32xf32>
    %40 = vector.extract_strided_slice %37 {offsets = [0, 64], sizes = [32, 32], strides = [1, 1]} : vector<32x128xf32> to vector<32x32xf32>
    %cst_29 = arith.constant 2.000000e+00 : f32
    %41 = vector.broadcast %cst_29 : f32 to vector<32x32xf32>
    %42 = arith.mulf %41, %40 : vector<32x32xf32>
    %cst_30 = arith.constant 1.000000e+00 : f32
    %43 = vector.broadcast %cst_30 : f32 to vector<32x32xf32>
    %44 = arith.subf %42, %43 : vector<32x32xf32>
    %45 = vector.extract_strided_slice %37 {offsets = [0, 96], sizes = [32, 32], strides = [1, 1]} : vector<32x128xf32> to vector<32x32xf32>
    %46 = arith.mulf %39, %1 : vector<32x32xf32>
    %47 = arith.mulf %38, %44 : vector<32x32xf32>
    %48 = arith.addf %46, %47 : vector<32x32xf32>
    %49 = math.tanh %48 : vector<32x32xf32>
    %50 = arith.mulf %45, %49 : vector<32x32xf32>
    %c64 = arith.constant 64 : index
    %c0_31 = arith.constant 0 : index
    %51 = vector.load %arg1[%c64, %c0_31] : memref<320x16xbf16, #tpu.memory_space<vmem>>, vector<32x16xbf16>
    %c0_32 = arith.constant 0 : index
    %c0_33 = arith.constant 0 : index
    %52 = vector.load %arg2[%c0_32, %c0_33] : memref<16x128xbf16, #tpu.memory_space<vmem>>, vector<16x128xbf16>
    %cst_34 = arith.constant dense<0.000000e+00> : vector<32x128xf32>
    %53 = tpu.matmul %51, %52, %cst_34 {dimension_numbers = #tpu.dot_dimension_numbers<[1], [0], [0], [1], [0, 0, 1, 1], [], []>} : vector<32x16xbf16>, vector<16x128xbf16>, vector<32x128xf32> -> vector<32x128xf32>
    %c0_35 = arith.constant 0 : index
    %c0_36 = arith.constant 0 : index
    %54 = vector.load %arg3[%c0_35, %c0_36] : memref<1x128xf32, #tpu.memory_space<vmem>>, vector<1x128xf32>
    %55 = vector.broadcast %54 : vector<1x128xf32> to vector<32x128xf32>
    %56 = arith.addf %53, %55 : vector<32x128xf32>
    %cst_37 = arith.constant 0.000000e+00 : f32
    %57 = vector.broadcast %cst_37 : f32 to vector<32x128xf32>
    %58 = arith.maximumf %56, %57 : vector<32x128xf32>
    %59 = arith.truncf %58 : vector<32x128xf32> to vector<32x128xbf16>
    %c0_38 = arith.constant 0 : index
    %c0_39 = arith.constant 0 : index
    %60 = vector.load %arg4[%c0_38, %c0_39] : memref<128x128xbf16, #tpu.memory_space<vmem>>, vector<128x128xbf16>
    %cst_40 = arith.constant dense<0.000000e+00> : vector<32x128xf32>
    %61 = tpu.matmul %59, %60, %cst_40 {dimension_numbers = #tpu.dot_dimension_numbers<[1], [0], [0], [1], [0, 0, 1, 1], [], []>} : vector<32x128xbf16>, vector<128x128xbf16>, vector<32x128xf32> -> vector<32x128xf32>
    %c0_41 = arith.constant 0 : index
    %c0_42 = arith.constant 0 : index
    %62 = vector.load %arg6[%c0_41, %c0_42] : memref<1x128xf32, #tpu.memory_space<vmem>>, vector<1x128xf32>
    %63 = vector.broadcast %62 : vector<1x128xf32> to vector<32x128xf32>
    %64 = arith.addf %61, %63 : vector<32x128xf32>
    %c0_43 = arith.constant 0 : index
    %c0_44 = arith.constant 0 : index
    %65 = vector.load %arg5[%c0_43, %c0_44] : memref<32x128xf32, #tpu.memory_space<vmem>>, vector<32x128xf32>
    %cst_45 = arith.constant dense<0.000000e+00> : vector<32x128xf32>
    %66 = tpu.matmul %50, %65, %cst_45 {dimension_numbers = #tpu.dot_dimension_numbers<[1], [0], [0], [1], [0, 0, 1, 1], [], []>} : vector<32x32xf32>, vector<32x128xf32>, vector<32x128xf32> -> vector<32x128xf32>
    %67 = arith.addf %29, %66 : vector<32x128xf32>
    %68 = arith.negf %67 : vector<32x128xf32>
    %69 = math.exp %68 : vector<32x128xf32>
    %cst_46 = arith.constant 1.000000e+00 : f32
    %70 = vector.broadcast %cst_46 : f32 to vector<32x128xf32>
    %71 = arith.addf %70, %69 : vector<32x128xf32>
    %72 = arith.divf %70, %71 : vector<32x128xf32>
    %73 = vector.extract_strided_slice %72 {offsets = [0, 0], sizes = [32, 32], strides = [1, 1]} : vector<32x128xf32> to vector<32x32xf32>
    %74 = vector.extract_strided_slice %72 {offsets = [0, 32], sizes = [32, 32], strides = [1, 1]} : vector<32x128xf32> to vector<32x32xf32>
    %75 = vector.extract_strided_slice %72 {offsets = [0, 64], sizes = [32, 32], strides = [1, 1]} : vector<32x128xf32> to vector<32x32xf32>
    %cst_47 = arith.constant 2.000000e+00 : f32
    %76 = vector.broadcast %cst_47 : f32 to vector<32x32xf32>
    %77 = arith.mulf %76, %75 : vector<32x32xf32>
    %cst_48 = arith.constant 1.000000e+00 : f32
    %78 = vector.broadcast %cst_48 : f32 to vector<32x32xf32>
    %79 = arith.subf %77, %78 : vector<32x32xf32>
    %80 = vector.extract_strided_slice %72 {offsets = [0, 96], sizes = [32, 32], strides = [1, 1]} : vector<32x128xf32> to vector<32x32xf32>
    %81 = arith.mulf %74, %48 : vector<32x32xf32>
    %82 = arith.mulf %73, %79 : vector<32x32xf32>
    %83 = arith.addf %81, %82 : vector<32x32xf32>
    %84 = math.tanh %83 : vector<32x32xf32>
    %85 = arith.mulf %80, %84 : vector<32x32xf32>
    %c96 = arith.constant 96 : index
    %c0_49 = arith.constant 0 : index
    %86 = vector.load %arg1[%c96, %c0_49] : memref<320x16xbf16, #tpu.memory_space<vmem>>, vector<32x16xbf16>
    %c0_50 = arith.constant 0 : index
    %c0_51 = arith.constant 0 : index
    %87 = vector.load %arg2[%c0_50, %c0_51] : memref<16x128xbf16, #tpu.memory_space<vmem>>, vector<16x128xbf16>
    %cst_52 = arith.constant dense<0.000000e+00> : vector<32x128xf32>
    %88 = tpu.matmul %86, %87, %cst_52 {dimension_numbers = #tpu.dot_dimension_numbers<[1], [0], [0], [1], [0, 0, 1, 1], [], []>} : vector<32x16xbf16>, vector<16x128xbf16>, vector<32x128xf32> -> vector<32x128xf32>
    %c0_53 = arith.constant 0 : index
    %c0_54 = arith.constant 0 : index
    %89 = vector.load %arg3[%c0_53, %c0_54] : memref<1x128xf32, #tpu.memory_space<vmem>>, vector<1x128xf32>
    %90 = vector.broadcast %89 : vector<1x128xf32> to vector<32x128xf32>
    %91 = arith.addf %88, %90 : vector<32x128xf32>
    %cst_55 = arith.constant 0.000000e+00 : f32
    %92 = vector.broadcast %cst_55 : f32 to vector<32x128xf32>
    %93 = arith.maximumf %91, %92 : vector<32x128xf32>
    %94 = arith.truncf %93 : vector<32x128xf32> to vector<32x128xbf16>
    %c0_56 = arith.constant 0 : index
    %c0_57 = arith.constant 0 : index
    %95 = vector.load %arg4[%c0_56, %c0_57] : memref<128x128xbf16, #tpu.memory_space<vmem>>, vector<128x128xbf16>
    %cst_58 = arith.constant dense<0.000000e+00> : vector<32x128xf32>
    %96 = tpu.matmul %94, %95, %cst_58 {dimension_numbers = #tpu.dot_dimension_numbers<[1], [0], [0], [1], [0, 0, 1, 1], [], []>} : vector<32x128xbf16>, vector<128x128xbf16>, vector<32x128xf32> -> vector<32x128xf32>
    %c0_59 = arith.constant 0 : index
    %c0_60 = arith.constant 0 : index
    %97 = vector.load %arg6[%c0_59, %c0_60] : memref<1x128xf32, #tpu.memory_space<vmem>>, vector<1x128xf32>
    %98 = vector.broadcast %97 : vector<1x128xf32> to vector<32x128xf32>
    %99 = arith.addf %96, %98 : vector<32x128xf32>
    %c0_61 = arith.constant 0 : index
    %c0_62 = arith.constant 0 : index
    %100 = vector.load %arg5[%c0_61, %c0_62] : memref<32x128xf32, #tpu.memory_space<vmem>>, vector<32x128xf32>
    %cst_63 = arith.constant dense<0.000000e+00> : vector<32x128xf32>
    %101 = tpu.matmul %85, %100, %cst_63 {dimension_numbers = #tpu.dot_dimension_numbers<[1], [0], [0], [1], [0, 0, 1, 1], [], []>} : vector<32x32xf32>, vector<32x128xf32>, vector<32x128xf32> -> vector<32x128xf32>
    %102 = arith.addf %64, %101 : vector<32x128xf32>
    %103 = arith.negf %102 : vector<32x128xf32>
    %104 = math.exp %103 : vector<32x128xf32>
    %cst_64 = arith.constant 1.000000e+00 : f32
    %105 = vector.broadcast %cst_64 : f32 to vector<32x128xf32>
    %106 = arith.addf %105, %104 : vector<32x128xf32>
    %107 = arith.divf %105, %106 : vector<32x128xf32>
    %108 = vector.extract_strided_slice %107 {offsets = [0, 0], sizes = [32, 32], strides = [1, 1]} : vector<32x128xf32> to vector<32x32xf32>
    %109 = vector.extract_strided_slice %107 {offsets = [0, 32], sizes = [32, 32], strides = [1, 1]} : vector<32x128xf32> to vector<32x32xf32>
    %110 = vector.extract_strided_slice %107 {offsets = [0, 64], sizes = [32, 32], strides = [1, 1]} : vector<32x128xf32> to vector<32x32xf32>
    %cst_65 = arith.constant 2.000000e+00 : f32
    %111 = vector.broadcast %cst_65 : f32 to vector<32x32xf32>
    %112 = arith.mulf %111, %110 : vector<32x32xf32>
    %cst_66 = arith.constant 1.000000e+00 : f32
    %113 = vector.broadcast %cst_66 : f32 to vector<32x32xf32>
    %114 = arith.subf %112, %113 : vector<32x32xf32>
    %115 = vector.extract_strided_slice %107 {offsets = [0, 96], sizes = [32, 32], strides = [1, 1]} : vector<32x128xf32> to vector<32x32xf32>
    %116 = arith.mulf %109, %83 : vector<32x32xf32>
    %117 = arith.mulf %108, %114 : vector<32x32xf32>
    %118 = arith.addf %116, %117 : vector<32x32xf32>
    %119 = math.tanh %118 : vector<32x32xf32>
    %120 = arith.mulf %115, %119 : vector<32x32xf32>
    %c128 = arith.constant 128 : index
    %c0_67 = arith.constant 0 : index
    %121 = vector.load %arg1[%c128, %c0_67] : memref<320x16xbf16, #tpu.memory_space<vmem>>, vector<32x16xbf16>
    %c0_68 = arith.constant 0 : index
    %c0_69 = arith.constant 0 : index
    %122 = vector.load %arg2[%c0_68, %c0_69] : memref<16x128xbf16, #tpu.memory_space<vmem>>, vector<16x128xbf16>
    %cst_70 = arith.constant dense<0.000000e+00> : vector<32x128xf32>
    %123 = tpu.matmul %121, %122, %cst_70 {dimension_numbers = #tpu.dot_dimension_numbers<[1], [0], [0], [1], [0, 0, 1, 1], [], []>} : vector<32x16xbf16>, vector<16x128xbf16>, vector<32x128xf32> -> vector<32x128xf32>
    %c0_71 = arith.constant 0 : index
    %c0_72 = arith.constant 0 : index
    %124 = vector.load %arg3[%c0_71, %c0_72] : memref<1x128xf32, #tpu.memory_space<vmem>>, vector<1x128xf32>
    %125 = vector.broadcast %124 : vector<1x128xf32> to vector<32x128xf32>
    %126 = arith.addf %123, %125 : vector<32x128xf32>
    %cst_73 = arith.constant 0.000000e+00 : f32
    %127 = vector.broadcast %cst_73 : f32 to vector<32x128xf32>
    %128 = arith.maximumf %126, %127 : vector<32x128xf32>
    %129 = arith.truncf %128 : vector<32x128xf32> to vector<32x128xbf16>
    %c0_74 = arith.constant 0 : index
    %c0_75 = arith.constant 0 : index
    %130 = vector.load %arg4[%c0_74, %c0_75] : memref<128x128xbf16, #tpu.memory_space<vmem>>, vector<128x128xbf16>
    %cst_76 = arith.constant dense<0.000000e+00> : vector<32x128xf32>
    %131 = tpu.matmul %129, %130, %cst_76 {dimension_numbers = #tpu.dot_dimension_numbers<[1], [0], [0], [1], [0, 0, 1, 1], [], []>} : vector<32x128xbf16>, vector<128x128xbf16>, vector<32x128xf32> -> vector<32x128xf32>
    %c0_77 = arith.constant 0 : index
    %c0_78 = arith.constant 0 : index
    %132 = vector.load %arg6[%c0_77, %c0_78] : memref<1x128xf32, #tpu.memory_space<vmem>>, vector<1x128xf32>
    %133 = vector.broadcast %132 : vector<1x128xf32> to vector<32x128xf32>
    %134 = arith.addf %131, %133 : vector<32x128xf32>
    %c0_79 = arith.constant 0 : index
    %c0_80 = arith.constant 0 : index
    %135 = vector.load %arg5[%c0_79, %c0_80] : memref<32x128xf32, #tpu.memory_space<vmem>>, vector<32x128xf32>
    %cst_81 = arith.constant dense<0.000000e+00> : vector<32x128xf32>
    %136 = tpu.matmul %120, %135, %cst_81 {dimension_numbers = #tpu.dot_dimension_numbers<[1], [0], [0], [1], [0, 0, 1, 1], [], []>} : vector<32x32xf32>, vector<32x128xf32>, vector<32x128xf32> -> vector<32x128xf32>
    %137 = arith.addf %99, %136 : vector<32x128xf32>
    %138 = arith.negf %137 : vector<32x128xf32>
    %139 = math.exp %138 : vector<32x128xf32>
    %cst_82 = arith.constant 1.000000e+00 : f32
    %140 = vector.broadcast %cst_82 : f32 to vector<32x128xf32>
    %141 = arith.addf %140, %139 : vector<32x128xf32>
    %142 = arith.divf %140, %141 : vector<32x128xf32>
    %143 = vector.extract_strided_slice %142 {offsets = [0, 0], sizes = [32, 32], strides = [1, 1]} : vector<32x128xf32> to vector<32x32xf32>
    %144 = vector.extract_strided_slice %142 {offsets = [0, 32], sizes = [32, 32], strides = [1, 1]} : vector<32x128xf32> to vector<32x32xf32>
    %145 = vector.extract_strided_slice %142 {offsets = [0, 64], sizes = [32, 32], strides = [1, 1]} : vector<32x128xf32> to vector<32x32xf32>
    %cst_83 = arith.constant 2.000000e+00 : f32
    %146 = vector.broadcast %cst_83 : f32 to vector<32x32xf32>
    %147 = arith.mulf %146, %145 : vector<32x32xf32>
    %cst_84 = arith.constant 1.000000e+00 : f32
    %148 = vector.broadcast %cst_84 : f32 to vector<32x32xf32>
    %149 = arith.subf %147, %148 : vector<32x32xf32>
    %150 = vector.extract_strided_slice %142 {offsets = [0, 96], sizes = [32, 32], strides = [1, 1]} : vector<32x128xf32> to vector<32x32xf32>
    %151 = arith.mulf %144, %118 : vector<32x32xf32>
    %152 = arith.mulf %143, %149 : vector<32x32xf32>
    %153 = arith.addf %151, %152 : vector<32x32xf32>
    %154 = math.tanh %153 : vector<32x32xf32>
    %155 = arith.mulf %150, %154 : vector<32x32xf32>
    %c160 = arith.constant 160 : index
    %c0_85 = arith.constant 0 : index
    %156 = vector.load %arg1[%c160, %c0_85] : memref<320x16xbf16, #tpu.memory_space<vmem>>, vector<32x16xbf16>
    %c0_86 = arith.constant 0 : index
    %c0_87 = arith.constant 0 : index
    %157 = vector.load %arg2[%c0_86, %c0_87] : memref<16x128xbf16, #tpu.memory_space<vmem>>, vector<16x128xbf16>
    %cst_88 = arith.constant dense<0.000000e+00> : vector<32x128xf32>
    %158 = tpu.matmul %156, %157, %cst_88 {dimension_numbers = #tpu.dot_dimension_numbers<[1], [0], [0], [1], [0, 0, 1, 1], [], []>} : vector<32x16xbf16>, vector<16x128xbf16>, vector<32x128xf32> -> vector<32x128xf32>
    %c0_89 = arith.constant 0 : index
    %c0_90 = arith.constant 0 : index
    %159 = vector.load %arg3[%c0_89, %c0_90] : memref<1x128xf32, #tpu.memory_space<vmem>>, vector<1x128xf32>
    %160 = vector.broadcast %159 : vector<1x128xf32> to vector<32x128xf32>
    %161 = arith.addf %158, %160 : vector<32x128xf32>
    %cst_91 = arith.constant 0.000000e+00 : f32
    %162 = vector.broadcast %cst_91 : f32 to vector<32x128xf32>
    %163 = arith.maximumf %161, %162 : vector<32x128xf32>
    %164 = arith.truncf %163 : vector<32x128xf32> to vector<32x128xbf16>
    %c0_92 = arith.constant 0 : index
    %c0_93 = arith.constant 0 : index
    %165 = vector.load %arg4[%c0_92, %c0_93] : memref<128x128xbf16, #tpu.memory_space<vmem>>, vector<128x128xbf16>
    %cst_94 = arith.constant dense<0.000000e+00> : vector<32x128xf32>
    %166 = tpu.matmul %164, %165, %cst_94 {dimension_numbers = #tpu.dot_dimension_numbers<[1], [0], [0], [1], [0, 0, 1, 1], [], []>} : vector<32x128xbf16>, vector<128x128xbf16>, vector<32x128xf32> -> vector<32x128xf32>
    %c0_95 = arith.constant 0 : index
    %c0_96 = arith.constant 0 : index
    %167 = vector.load %arg6[%c0_95, %c0_96] : memref<1x128xf32, #tpu.memory_space<vmem>>, vector<1x128xf32>
    %168 = vector.broadcast %167 : vector<1x128xf32> to vector<32x128xf32>
    %169 = arith.addf %166, %168 : vector<32x128xf32>
    %c0_97 = arith.constant 0 : index
    %c0_98 = arith.constant 0 : index
    %170 = vector.load %arg5[%c0_97, %c0_98] : memref<32x128xf32, #tpu.memory_space<vmem>>, vector<32x128xf32>
    %cst_99 = arith.constant dense<0.000000e+00> : vector<32x128xf32>
    %171 = tpu.matmul %155, %170, %cst_99 {dimension_numbers = #tpu.dot_dimension_numbers<[1], [0], [0], [1], [0, 0, 1, 1], [], []>} : vector<32x32xf32>, vector<32x128xf32>, vector<32x128xf32> -> vector<32x128xf32>
    %172 = arith.addf %134, %171 : vector<32x128xf32>
    %173 = arith.negf %172 : vector<32x128xf32>
    %174 = math.exp %173 : vector<32x128xf32>
    %cst_100 = arith.constant 1.000000e+00 : f32
    %175 = vector.broadcast %cst_100 : f32 to vector<32x128xf32>
    %176 = arith.addf %175, %174 : vector<32x128xf32>
    %177 = arith.divf %175, %176 : vector<32x128xf32>
    %178 = vector.extract_strided_slice %177 {offsets = [0, 0], sizes = [32, 32], strides = [1, 1]} : vector<32x128xf32> to vector<32x32xf32>
    %179 = vector.extract_strided_slice %177 {offsets = [0, 32], sizes = [32, 32], strides = [1, 1]} : vector<32x128xf32> to vector<32x32xf32>
    %180 = vector.extract_strided_slice %177 {offsets = [0, 64], sizes = [32, 32], strides = [1, 1]} : vector<32x128xf32> to vector<32x32xf32>
    %cst_101 = arith.constant 2.000000e+00 : f32
    %181 = vector.broadcast %cst_101 : f32 to vector<32x32xf32>
    %182 = arith.mulf %181, %180 : vector<32x32xf32>
    %cst_102 = arith.constant 1.000000e+00 : f32
    %183 = vector.broadcast %cst_102 : f32 to vector<32x32xf32>
    %184 = arith.subf %182, %183 : vector<32x32xf32>
    %185 = vector.extract_strided_slice %177 {offsets = [0, 96], sizes = [32, 32], strides = [1, 1]} : vector<32x128xf32> to vector<32x32xf32>
    %186 = arith.mulf %179, %153 : vector<32x32xf32>
    %187 = arith.mulf %178, %184 : vector<32x32xf32>
    %188 = arith.addf %186, %187 : vector<32x32xf32>
    %189 = math.tanh %188 : vector<32x32xf32>
    %190 = arith.mulf %185, %189 : vector<32x32xf32>
    %c192 = arith.constant 192 : index
    %c0_103 = arith.constant 0 : index
    %191 = vector.load %arg1[%c192, %c0_103] : memref<320x16xbf16, #tpu.memory_space<vmem>>, vector<32x16xbf16>
    %c0_104 = arith.constant 0 : index
    %c0_105 = arith.constant 0 : index
    %192 = vector.load %arg2[%c0_104, %c0_105] : memref<16x128xbf16, #tpu.memory_space<vmem>>, vector<16x128xbf16>
    %cst_106 = arith.constant dense<0.000000e+00> : vector<32x128xf32>
    %193 = tpu.matmul %191, %192, %cst_106 {dimension_numbers = #tpu.dot_dimension_numbers<[1], [0], [0], [1], [0, 0, 1, 1], [], []>} : vector<32x16xbf16>, vector<16x128xbf16>, vector<32x128xf32> -> vector<32x128xf32>
    %c0_107 = arith.constant 0 : index
    %c0_108 = arith.constant 0 : index
    %194 = vector.load %arg3[%c0_107, %c0_108] : memref<1x128xf32, #tpu.memory_space<vmem>>, vector<1x128xf32>
    %195 = vector.broadcast %194 : vector<1x128xf32> to vector<32x128xf32>
    %196 = arith.addf %193, %195 : vector<32x128xf32>
    %cst_109 = arith.constant 0.000000e+00 : f32
    %197 = vector.broadcast %cst_109 : f32 to vector<32x128xf32>
    %198 = arith.maximumf %196, %197 : vector<32x128xf32>
    %199 = arith.truncf %198 : vector<32x128xf32> to vector<32x128xbf16>
    %c0_110 = arith.constant 0 : index
    %c0_111 = arith.constant 0 : index
    %200 = vector.load %arg4[%c0_110, %c0_111] : memref<128x128xbf16, #tpu.memory_space<vmem>>, vector<128x128xbf16>
    %cst_112 = arith.constant dense<0.000000e+00> : vector<32x128xf32>
    %201 = tpu.matmul %199, %200, %cst_112 {dimension_numbers = #tpu.dot_dimension_numbers<[1], [0], [0], [1], [0, 0, 1, 1], [], []>} : vector<32x128xbf16>, vector<128x128xbf16>, vector<32x128xf32> -> vector<32x128xf32>
    %c0_113 = arith.constant 0 : index
    %c0_114 = arith.constant 0 : index
    %202 = vector.load %arg6[%c0_113, %c0_114] : memref<1x128xf32, #tpu.memory_space<vmem>>, vector<1x128xf32>
    %203 = vector.broadcast %202 : vector<1x128xf32> to vector<32x128xf32>
    %204 = arith.addf %201, %203 : vector<32x128xf32>
    %c0_115 = arith.constant 0 : index
    %c0_116 = arith.constant 0 : index
    %205 = vector.load %arg5[%c0_115, %c0_116] : memref<32x128xf32, #tpu.memory_space<vmem>>, vector<32x128xf32>
    %cst_117 = arith.constant dense<0.000000e+00> : vector<32x128xf32>
    %206 = tpu.matmul %190, %205, %cst_117 {dimension_numbers = #tpu.dot_dimension_numbers<[1], [0], [0], [1], [0, 0, 1, 1], [], []>} : vector<32x32xf32>, vector<32x128xf32>, vector<32x128xf32> -> vector<32x128xf32>
    %207 = arith.addf %169, %206 : vector<32x128xf32>
    %208 = arith.negf %207 : vector<32x128xf32>
    %209 = math.exp %208 : vector<32x128xf32>
    %cst_118 = arith.constant 1.000000e+00 : f32
    %210 = vector.broadcast %cst_118 : f32 to vector<32x128xf32>
    %211 = arith.addf %210, %209 : vector<32x128xf32>
    %212 = arith.divf %210, %211 : vector<32x128xf32>
    %213 = vector.extract_strided_slice %212 {offsets = [0, 0], sizes = [32, 32], strides = [1, 1]} : vector<32x128xf32> to vector<32x32xf32>
    %214 = vector.extract_strided_slice %212 {offsets = [0, 32], sizes = [32, 32], strides = [1, 1]} : vector<32x128xf32> to vector<32x32xf32>
    %215 = vector.extract_strided_slice %212 {offsets = [0, 64], sizes = [32, 32], strides = [1, 1]} : vector<32x128xf32> to vector<32x32xf32>
    %cst_119 = arith.constant 2.000000e+00 : f32
    %216 = vector.broadcast %cst_119 : f32 to vector<32x32xf32>
    %217 = arith.mulf %216, %215 : vector<32x32xf32>
    %cst_120 = arith.constant 1.000000e+00 : f32
    %218 = vector.broadcast %cst_120 : f32 to vector<32x32xf32>
    %219 = arith.subf %217, %218 : vector<32x32xf32>
    %220 = vector.extract_strided_slice %212 {offsets = [0, 96], sizes = [32, 32], strides = [1, 1]} : vector<32x128xf32> to vector<32x32xf32>
    %221 = arith.mulf %214, %188 : vector<32x32xf32>
    %222 = arith.mulf %213, %219 : vector<32x32xf32>
    %223 = arith.addf %221, %222 : vector<32x32xf32>
    %224 = math.tanh %223 : vector<32x32xf32>
    %225 = arith.mulf %220, %224 : vector<32x32xf32>
    %c224 = arith.constant 224 : index
    %c0_121 = arith.constant 0 : index
    %226 = vector.load %arg1[%c224, %c0_121] : memref<320x16xbf16, #tpu.memory_space<vmem>>, vector<32x16xbf16>
    %c0_122 = arith.constant 0 : index
    %c0_123 = arith.constant 0 : index
    %227 = vector.load %arg2[%c0_122, %c0_123] : memref<16x128xbf16, #tpu.memory_space<vmem>>, vector<16x128xbf16>
    %cst_124 = arith.constant dense<0.000000e+00> : vector<32x128xf32>
    %228 = tpu.matmul %226, %227, %cst_124 {dimension_numbers = #tpu.dot_dimension_numbers<[1], [0], [0], [1], [0, 0, 1, 1], [], []>} : vector<32x16xbf16>, vector<16x128xbf16>, vector<32x128xf32> -> vector<32x128xf32>
    %c0_125 = arith.constant 0 : index
    %c0_126 = arith.constant 0 : index
    %229 = vector.load %arg3[%c0_125, %c0_126] : memref<1x128xf32, #tpu.memory_space<vmem>>, vector<1x128xf32>
    %230 = vector.broadcast %229 : vector<1x128xf32> to vector<32x128xf32>
    %231 = arith.addf %228, %230 : vector<32x128xf32>
    %cst_127 = arith.constant 0.000000e+00 : f32
    %232 = vector.broadcast %cst_127 : f32 to vector<32x128xf32>
    %233 = arith.maximumf %231, %232 : vector<32x128xf32>
    %234 = arith.truncf %233 : vector<32x128xf32> to vector<32x128xbf16>
    %c0_128 = arith.constant 0 : index
    %c0_129 = arith.constant 0 : index
    %235 = vector.load %arg4[%c0_128, %c0_129] : memref<128x128xbf16, #tpu.memory_space<vmem>>, vector<128x128xbf16>
    %cst_130 = arith.constant dense<0.000000e+00> : vector<32x128xf32>
    %236 = tpu.matmul %234, %235, %cst_130 {dimension_numbers = #tpu.dot_dimension_numbers<[1], [0], [0], [1], [0, 0, 1, 1], [], []>} : vector<32x128xbf16>, vector<128x128xbf16>, vector<32x128xf32> -> vector<32x128xf32>
    %c0_131 = arith.constant 0 : index
    %c0_132 = arith.constant 0 : index
    %237 = vector.load %arg6[%c0_131, %c0_132] : memref<1x128xf32, #tpu.memory_space<vmem>>, vector<1x128xf32>
    %238 = vector.broadcast %237 : vector<1x128xf32> to vector<32x128xf32>
    %239 = arith.addf %236, %238 : vector<32x128xf32>
    %c0_133 = arith.constant 0 : index
    %c0_134 = arith.constant 0 : index
    %240 = vector.load %arg5[%c0_133, %c0_134] : memref<32x128xf32, #tpu.memory_space<vmem>>, vector<32x128xf32>
    %cst_135 = arith.constant dense<0.000000e+00> : vector<32x128xf32>
    %241 = tpu.matmul %225, %240, %cst_135 {dimension_numbers = #tpu.dot_dimension_numbers<[1], [0], [0], [1], [0, 0, 1, 1], [], []>} : vector<32x32xf32>, vector<32x128xf32>, vector<32x128xf32> -> vector<32x128xf32>
    %242 = arith.addf %204, %241 : vector<32x128xf32>
    %243 = arith.negf %242 : vector<32x128xf32>
    %244 = math.exp %243 : vector<32x128xf32>
    %cst_136 = arith.constant 1.000000e+00 : f32
    %245 = vector.broadcast %cst_136 : f32 to vector<32x128xf32>
    %246 = arith.addf %245, %244 : vector<32x128xf32>
    %247 = arith.divf %245, %246 : vector<32x128xf32>
    %248 = vector.extract_strided_slice %247 {offsets = [0, 0], sizes = [32, 32], strides = [1, 1]} : vector<32x128xf32> to vector<32x32xf32>
    %249 = vector.extract_strided_slice %247 {offsets = [0, 32], sizes = [32, 32], strides = [1, 1]} : vector<32x128xf32> to vector<32x32xf32>
    %250 = vector.extract_strided_slice %247 {offsets = [0, 64], sizes = [32, 32], strides = [1, 1]} : vector<32x128xf32> to vector<32x32xf32>
    %cst_137 = arith.constant 2.000000e+00 : f32
    %251 = vector.broadcast %cst_137 : f32 to vector<32x32xf32>
    %252 = arith.mulf %251, %250 : vector<32x32xf32>
    %cst_138 = arith.constant 1.000000e+00 : f32
    %253 = vector.broadcast %cst_138 : f32 to vector<32x32xf32>
    %254 = arith.subf %252, %253 : vector<32x32xf32>
    %255 = vector.extract_strided_slice %247 {offsets = [0, 96], sizes = [32, 32], strides = [1, 1]} : vector<32x128xf32> to vector<32x32xf32>
    %256 = arith.mulf %249, %223 : vector<32x32xf32>
    %257 = arith.mulf %248, %254 : vector<32x32xf32>
    %258 = arith.addf %256, %257 : vector<32x32xf32>
    %259 = math.tanh %258 : vector<32x32xf32>
    %260 = arith.mulf %255, %259 : vector<32x32xf32>
    %c256 = arith.constant 256 : index
    %c0_139 = arith.constant 0 : index
    %261 = vector.load %arg1[%c256, %c0_139] : memref<320x16xbf16, #tpu.memory_space<vmem>>, vector<32x16xbf16>
    %c0_140 = arith.constant 0 : index
    %c0_141 = arith.constant 0 : index
    %262 = vector.load %arg2[%c0_140, %c0_141] : memref<16x128xbf16, #tpu.memory_space<vmem>>, vector<16x128xbf16>
    %cst_142 = arith.constant dense<0.000000e+00> : vector<32x128xf32>
    %263 = tpu.matmul %261, %262, %cst_142 {dimension_numbers = #tpu.dot_dimension_numbers<[1], [0], [0], [1], [0, 0, 1, 1], [], []>} : vector<32x16xbf16>, vector<16x128xbf16>, vector<32x128xf32> -> vector<32x128xf32>
    %c0_143 = arith.constant 0 : index
    %c0_144 = arith.constant 0 : index
    %264 = vector.load %arg3[%c0_143, %c0_144] : memref<1x128xf32, #tpu.memory_space<vmem>>, vector<1x128xf32>
    %265 = vector.broadcast %264 : vector<1x128xf32> to vector<32x128xf32>
    %266 = arith.addf %263, %265 : vector<32x128xf32>
    %cst_145 = arith.constant 0.000000e+00 : f32
    %267 = vector.broadcast %cst_145 : f32 to vector<32x128xf32>
    %268 = arith.maximumf %266, %267 : vector<32x128xf32>
    %269 = arith.truncf %268 : vector<32x128xf32> to vector<32x128xbf16>
    %c0_146 = arith.constant 0 : index
    %c0_147 = arith.constant 0 : index
    %270 = vector.load %arg4[%c0_146, %c0_147] : memref<128x128xbf16, #tpu.memory_space<vmem>>, vector<128x128xbf16>
    %cst_148 = arith.constant dense<0.000000e+00> : vector<32x128xf32>
    %271 = tpu.matmul %269, %270, %cst_148 {dimension_numbers = #tpu.dot_dimension_numbers<[1], [0], [0], [1], [0, 0, 1, 1], [], []>} : vector<32x128xbf16>, vector<128x128xbf16>, vector<32x128xf32> -> vector<32x128xf32>
    %c0_149 = arith.constant 0 : index
    %c0_150 = arith.constant 0 : index
    %272 = vector.load %arg6[%c0_149, %c0_150] : memref<1x128xf32, #tpu.memory_space<vmem>>, vector<1x128xf32>
    %273 = vector.broadcast %272 : vector<1x128xf32> to vector<32x128xf32>
    %274 = arith.addf %271, %273 : vector<32x128xf32>
    %c0_151 = arith.constant 0 : index
    %c0_152 = arith.constant 0 : index
    %275 = vector.load %arg5[%c0_151, %c0_152] : memref<32x128xf32, #tpu.memory_space<vmem>>, vector<32x128xf32>
    %cst_153 = arith.constant dense<0.000000e+00> : vector<32x128xf32>
    %276 = tpu.matmul %260, %275, %cst_153 {dimension_numbers = #tpu.dot_dimension_numbers<[1], [0], [0], [1], [0, 0, 1, 1], [], []>} : vector<32x32xf32>, vector<32x128xf32>, vector<32x128xf32> -> vector<32x128xf32>
    %277 = arith.addf %239, %276 : vector<32x128xf32>
    %278 = arith.negf %277 : vector<32x128xf32>
    %279 = math.exp %278 : vector<32x128xf32>
    %cst_154 = arith.constant 1.000000e+00 : f32
    %280 = vector.broadcast %cst_154 : f32 to vector<32x128xf32>
    %281 = arith.addf %280, %279 : vector<32x128xf32>
    %282 = arith.divf %280, %281 : vector<32x128xf32>
    %283 = vector.extract_strided_slice %282 {offsets = [0, 0], sizes = [32, 32], strides = [1, 1]} : vector<32x128xf32> to vector<32x32xf32>
    %284 = vector.extract_strided_slice %282 {offsets = [0, 32], sizes = [32, 32], strides = [1, 1]} : vector<32x128xf32> to vector<32x32xf32>
    %285 = vector.extract_strided_slice %282 {offsets = [0, 64], sizes = [32, 32], strides = [1, 1]} : vector<32x128xf32> to vector<32x32xf32>
    %cst_155 = arith.constant 2.000000e+00 : f32
    %286 = vector.broadcast %cst_155 : f32 to vector<32x32xf32>
    %287 = arith.mulf %286, %285 : vector<32x32xf32>
    %cst_156 = arith.constant 1.000000e+00 : f32
    %288 = vector.broadcast %cst_156 : f32 to vector<32x32xf32>
    %289 = arith.subf %287, %288 : vector<32x32xf32>
    %290 = vector.extract_strided_slice %282 {offsets = [0, 96], sizes = [32, 32], strides = [1, 1]} : vector<32x128xf32> to vector<32x32xf32>
    %291 = arith.mulf %284, %258 : vector<32x32xf32>
    %292 = arith.mulf %283, %289 : vector<32x32xf32>
    %293 = arith.addf %291, %292 : vector<32x32xf32>
    %294 = math.tanh %293 : vector<32x32xf32>
    %295 = arith.mulf %290, %294 : vector<32x32xf32>
    %c288 = arith.constant 288 : index
    %c0_157 = arith.constant 0 : index
    %296 = vector.load %arg1[%c288, %c0_157] : memref<320x16xbf16, #tpu.memory_space<vmem>>, vector<32x16xbf16>
    %c0_158 = arith.constant 0 : index
    %c0_159 = arith.constant 0 : index
    %297 = vector.load %arg2[%c0_158, %c0_159] : memref<16x128xbf16, #tpu.memory_space<vmem>>, vector<16x128xbf16>
    %cst_160 = arith.constant dense<0.000000e+00> : vector<32x128xf32>
    %298 = tpu.matmul %296, %297, %cst_160 {dimension_numbers = #tpu.dot_dimension_numbers<[1], [0], [0], [1], [0, 0, 1, 1], [], []>} : vector<32x16xbf16>, vector<16x128xbf16>, vector<32x128xf32> -> vector<32x128xf32>
    %c0_161 = arith.constant 0 : index
    %c0_162 = arith.constant 0 : index
    %299 = vector.load %arg3[%c0_161, %c0_162] : memref<1x128xf32, #tpu.memory_space<vmem>>, vector<1x128xf32>
    %300 = vector.broadcast %299 : vector<1x128xf32> to vector<32x128xf32>
    %301 = arith.addf %298, %300 : vector<32x128xf32>
    %cst_163 = arith.constant 0.000000e+00 : f32
    %302 = vector.broadcast %cst_163 : f32 to vector<32x128xf32>
    %303 = arith.maximumf %301, %302 : vector<32x128xf32>
    %304 = arith.truncf %303 : vector<32x128xf32> to vector<32x128xbf16>
    %c0_164 = arith.constant 0 : index
    %c0_165 = arith.constant 0 : index
    %305 = vector.load %arg4[%c0_164, %c0_165] : memref<128x128xbf16, #tpu.memory_space<vmem>>, vector<128x128xbf16>
    %cst_166 = arith.constant dense<0.000000e+00> : vector<32x128xf32>
    %306 = tpu.matmul %304, %305, %cst_166 {dimension_numbers = #tpu.dot_dimension_numbers<[1], [0], [0], [1], [0, 0, 1, 1], [], []>} : vector<32x128xbf16>, vector<128x128xbf16>, vector<32x128xf32> -> vector<32x128xf32>
    %c0_167 = arith.constant 0 : index
    %c0_168 = arith.constant 0 : index
    %307 = vector.load %arg6[%c0_167, %c0_168] : memref<1x128xf32, #tpu.memory_space<vmem>>, vector<1x128xf32>
    %308 = vector.broadcast %307 : vector<1x128xf32> to vector<32x128xf32>
    %309 = arith.addf %306, %308 : vector<32x128xf32>
    %c0_169 = arith.constant 0 : index
    %c0_170 = arith.constant 0 : index
    %310 = vector.load %arg5[%c0_169, %c0_170] : memref<32x128xf32, #tpu.memory_space<vmem>>, vector<32x128xf32>
    %cst_171 = arith.constant dense<0.000000e+00> : vector<32x128xf32>
    %311 = tpu.matmul %295, %310, %cst_171 {dimension_numbers = #tpu.dot_dimension_numbers<[1], [0], [0], [1], [0, 0, 1, 1], [], []>} : vector<32x32xf32>, vector<32x128xf32>, vector<32x128xf32> -> vector<32x128xf32>
    %312 = arith.addf %274, %311 : vector<32x128xf32>
    %313 = arith.negf %312 : vector<32x128xf32>
    %314 = math.exp %313 : vector<32x128xf32>
    %cst_172 = arith.constant 1.000000e+00 : f32
    %315 = vector.broadcast %cst_172 : f32 to vector<32x128xf32>
    %316 = arith.addf %315, %314 : vector<32x128xf32>
    %317 = arith.divf %315, %316 : vector<32x128xf32>
    %318 = vector.extract_strided_slice %317 {offsets = [0, 0], sizes = [32, 32], strides = [1, 1]} : vector<32x128xf32> to vector<32x32xf32>
    %319 = vector.extract_strided_slice %317 {offsets = [0, 32], sizes = [32, 32], strides = [1, 1]} : vector<32x128xf32> to vector<32x32xf32>
    %320 = vector.extract_strided_slice %317 {offsets = [0, 64], sizes = [32, 32], strides = [1, 1]} : vector<32x128xf32> to vector<32x32xf32>
    %cst_173 = arith.constant 2.000000e+00 : f32
    %321 = vector.broadcast %cst_173 : f32 to vector<32x32xf32>
    %322 = arith.mulf %321, %320 : vector<32x32xf32>
    %cst_174 = arith.constant 1.000000e+00 : f32
    %323 = vector.broadcast %cst_174 : f32 to vector<32x32xf32>
    %324 = arith.subf %322, %323 : vector<32x32xf32>
    %325 = vector.extract_strided_slice %317 {offsets = [0, 96], sizes = [32, 32], strides = [1, 1]} : vector<32x128xf32> to vector<32x32xf32>
    %326 = arith.mulf %319, %293 : vector<32x32xf32>
    %327 = arith.mulf %318, %324 : vector<32x32xf32>
    %328 = arith.addf %326, %327 : vector<32x32xf32>
    %329 = math.tanh %328 : vector<32x32xf32>
    %330 = arith.mulf %325, %329 : vector<32x32xf32>
    %c0_175 = arith.constant 0 : index
    %c0_176 = arith.constant 0 : index
    %331 = vector.load %arg5[%c0_175, %c0_176] : memref<32x128xf32, #tpu.memory_space<vmem>>, vector<32x128xf32>
    %cst_177 = arith.constant dense<0.000000e+00> : vector<32x128xf32>
    %332 = tpu.matmul %330, %331, %cst_177 {dimension_numbers = #tpu.dot_dimension_numbers<[1], [0], [0], [1], [0, 0, 1, 1], [], []>} : vector<32x32xf32>, vector<32x128xf32>, vector<32x128xf32> -> vector<32x128xf32>
    %333 = arith.addf %309, %332 : vector<32x128xf32>
    %334 = arith.negf %333 : vector<32x128xf32>
    %335 = math.exp %334 : vector<32x128xf32>
    %cst_178 = arith.constant 1.000000e+00 : f32
    %336 = vector.broadcast %cst_178 : f32 to vector<32x128xf32>
    %337 = arith.addf %336, %335 : vector<32x128xf32>
    %338 = arith.divf %336, %337 : vector<32x128xf32>
    %339 = vector.extract_strided_slice %338 {offsets = [0, 0], sizes = [32, 32], strides = [1, 1]} : vector<32x128xf32> to vector<32x32xf32>
    %340 = vector.extract_strided_slice %338 {offsets = [0, 32], sizes = [32, 32], strides = [1, 1]} : vector<32x128xf32> to vector<32x32xf32>
    %341 = vector.extract_strided_slice %338 {offsets = [0, 64], sizes = [32, 32], strides = [1, 1]} : vector<32x128xf32> to vector<32x32xf32>
    %cst_179 = arith.constant 2.000000e+00 : f32
    %342 = vector.broadcast %cst_179 : f32 to vector<32x32xf32>
    %343 = arith.mulf %342, %341 : vector<32x32xf32>
    %cst_180 = arith.constant 1.000000e+00 : f32
    %344 = vector.broadcast %cst_180 : f32 to vector<32x32xf32>
    %345 = arith.subf %343, %344 : vector<32x32xf32>
    %346 = vector.extract_strided_slice %338 {offsets = [0, 96], sizes = [32, 32], strides = [1, 1]} : vector<32x128xf32> to vector<32x32xf32>
    %347 = arith.mulf %340, %328 : vector<32x32xf32>
    %348 = arith.mulf %339, %345 : vector<32x32xf32>
    %349 = arith.addf %347, %348 : vector<32x32xf32>
    %350 = math.tanh %349 : vector<32x32xf32>
    %351 = arith.mulf %346, %350 : vector<32x32xf32>
    %cst_181 = arith.constant 0.000000e+00 : f32
    %352 = vector.broadcast %cst_181 : f32 to vector<32x32xf32>
    %353 = arith.maximumf %351, %352 : vector<32x32xf32>
    %c0_182 = arith.constant 0 : index
    %c0_183 = arith.constant 0 : index
    %354 = vector.load %arg7[%c0_182, %c0_183] : memref<1x32xf32, #tpu.memory_space<vmem>>, vector<1x32xf32>
    %355 = vector.broadcast %354 : vector<1x32xf32> to vector<32x32xf32>
    %356 = arith.mulf %353, %355 : vector<32x32xf32>
    %cst_184 = arith.constant dense<0.000000e+00> : vector<32xf32>
    %357 = vector.multi_reduction <add>, %356, %cst_184 [1] : vector<32x32xf32> to vector<32xf32>
    %358 = vector.shape_cast %357 : vector<32xf32> to vector<32x1xf32>
    %c0_185 = arith.constant 0 : index
    %c0_186 = arith.constant 0 : index
    %359 = vector.load %arg8[%c0_185, %c0_186] : memref<1x1xf32, #tpu.memory_space<vmem>>, vector<1x1xf32>
    %360 = vector.broadcast %359 : vector<1x1xf32> to vector<32x1xf32>
    %361 = arith.addf %358, %360 : vector<32x1xf32>
    %362 = arith.negf %361 : vector<32x1xf32>
    %363 = math.exp %362 : vector<32x1xf32>
    %cst_187 = arith.constant 1.000000e+00 : f32
    %364 = vector.broadcast %cst_187 : f32 to vector<32x1xf32>
    %365 = arith.addf %364, %363 : vector<32x1xf32>
    %366 = arith.divf %364, %365 : vector<32x1xf32>
    %c0_188 = arith.constant 0 : index
    %c0_189 = arith.constant 0 : index
    %367 = vector.load %arg9[%c0_188, %c0_189] : memref<32x1xf32, #tpu.memory_space<vmem>>, vector<32x1xf32>
    tpu.vector_store %arg9[%c0_188, %c0_189], %366 {strides = array<i32>} : memref<32x1xf32, #tpu.memory_space<vmem>>, vector<32x1xf32>,
    return
  }
  func.func @transform_0(%arg0: i32) -> (i32, i32) {
    %c0_i32 = arith.constant 0 : i32
    %c0_i32_0 = arith.constant 0 : i32
    return %arg0, %c0_i32 : i32, i32
  }
  func.func @transform_1(%arg0: i32) -> (i32, i32) {
    %c0_i32 = arith.constant 0 : i32
    %c0_i32_0 = arith.constant 0 : i32
    %c0_i32_1 = arith.constant 0 : i32
    return %c0_i32, %c0_i32_0 : i32, i32
  }
  func.func @transform_2(%arg0: i32) -> (i32, i32) {
    %c0_i32 = arith.constant 0 : i32
    %c0_i32_0 = arith.constant 0 : i32
    %c0_i32_1 = arith.constant 0 : i32
    return %c0_i32, %c0_i32_0 : i32, i32
  }
  func.func @transform_3(%arg0: i32) -> (i32, i32) {
    %c0_i32 = arith.constant 0 : i32
    %c0_i32_0 = arith.constant 0 : i32
    %c0_i32_1 = arith.constant 0 : i32
    return %c0_i32, %c0_i32_0 : i32, i32
  }
  func.func @transform_4(%arg0: i32) -> (i32, i32) {
    %c0_i32 = arith.constant 0 : i32
    %c0_i32_0 = arith.constant 0 : i32
    %c0_i32_1 = arith.constant 0 : i32
    return %c0_i32, %c0_i32_0 : i32, i32
  }
  func.func @transform_5(%arg0: i32) -> (i32, i32) {
    %c0_i32 = arith.constant 0 : i32
    %c0_i32_0 = arith.constant 0 : i32
    %c0_i32_1 = arith.constant 0 : i32
    return %c0_i32, %c0_i32_0 : i32, i32
  }
  func.func @transform_6(%arg0: i32) -> (i32, i32) {
    %c0_i32 = arith.constant 0 : i32
    %c0_i32_0 = arith.constant 0 : i32
    %c0_i32_1 = arith.constant 0 : i32
    return %c0_i32, %c0_i32_0 : i32, i32
  }
  func.func @transform_7(%arg0: i32) -> (i32, i32) {
    %c0_i32 = arith.constant 0 : i32
    %c0_i32_0 = arith.constant 0 : i32
    %c0_i32_1 = arith.constant 0 : i32
    return %c0_i32, %c0_i32_0 : i32, i32
  }
  func.func @transform_8(%arg0: i32) -> (i32, i32) {
    %c0_i32 = arith.constant 0 : i32
    %c0_i32_0 = arith.constant 0 : i32
    return %arg0, %c0_i32 : i32, i32
  }
}

</mosaic_0001>

<bundles_post_ra>
// kernel: tpu_custom_call.1
= control target key start
LH: loop header
LB: loop body
LE: loop exit
PB: predicated region body
PF: predicated region fallthrough
CT: control target
= control target key end

     0   :  { %vm58_vm0 = vcmask 130048   ;;  %v3499_v15 = vmov 0.0   ;;  %s3500_s17 = smov 64   ;;  %s3501_s18 = smov 32   ;;  %s4630_s1 = inlined_call_operand.vmem [shape: bf16[16,128], index: 1, kind: input, shape index: {}]   ;;  %s4631_s0 = inlined_call_operand.vmem [shape: bf16[320,16], index: 0, kind: input, shape index: {}]   ;;  %s4632_s3 = inlined_call_operand.vmem [shape: bf16[128,128], index: 3, kind: input, shape index: {}]   ;;  %s4633_s4 = inlined_call_operand.vmem [shape: f32[32,128], index: 4, kind: input, shape index: {}]   ;;  %s4634_s2 = inlined_call_operand.vmem [shape: f32[1,128], index: 2, kind: input, shape index: {}]   ;;  %s4635_s5 = inlined_call_operand.vmem [shape: f32[1,128], index: 5, kind: input, shape index: {}]   ;;  %s4636_s6 = inlined_call_operand.vmem [shape: f32[1,32], index: 6, kind: input, shape index: {}]   ;;  %s4637_s7 = inlined_call_operand.<no memory space> [shape: f32[1,1], index: 7, kind: input, shape index: {}]   ;;  %s4638_s8 = inlined_call_operand.vmem [shape: f32[32,1], index: 8, kind: output, shape index: {}]  }
   0x1   :  { %v3551_v0 = vld [vmem:[%s4630_s1] sm:$0xff]  ;;  %v3559_v2 = vld [vmem:[%s4632_s3 + $0x38] sm:$0xff]  ;;  %v3573_v4 = vld [vmem:[%s4632_s3 + $0x30] sm:$0xff]  ;;  %s3502_s16 = smov 96  }
   0x2   :  { %v3182_v1 = vld [vmem:[%s4631_s0] sm:$0xff]  ;;  %v3564_v3 = vld [vmem:[%s4633_s4 + $0x18] sm:$0xff]  ;;  %72 = vmatpush.bf16.msra.mxu0 %v3551_v0  ;;  %204 = vmatpush.bf16.msra.mxu2 %v3551_v0  ;;  %v3578_v5 = vld [vmem:[%s4633_s4 + $0x10] sm:$0xff] }
   0x3   :  { %158 = vmatpush.bf16.msra.mxu1 %v3559_v2  ;;  %222 = vmatpush.bf16.msra.mxu3 %v3559_v2  ;;  %v3588_v6 = vld [vmem:[%s4632_s3 + $0x28] sm:$0xff]  ;;  %v3595_v7 = vld [vmem:[%s4632_s3 + $0x20] sm:$0xff]  ;;  %v3607_v9 = vld [vmem:[%s4632_s3 + $0x18] sm:$0xff] }
   0x4   :  { %v3183_v8 = vld [vmem:[%s4631_s0 + $0x8] sm:$0xff]  ;;  %v3614_v10 = vld [vmem:[%s4632_s3 + $0x10] sm:$0xff]  ;;  %v3634_v13 = vld [vmem:[%s4632_s3] sm:$0xff] }
   0x5   :  { %2938 = vmatmul.msk.bf16.vlgmr.msra.gmra.mxu0 %vm58_vm0, %v3182_v1  ;;  %v3619_v11 = vld [vmem:[%s4633_s4 + $0x8] sm:$0xff]  ;;  %v3639_v14 = vld [vmem:[%s4633_s4] sm:$0xff] }
   0x6   :  { %261 = vmatpush.msrb.mxu0 %v3564_v3  ;;  %461 = vmatpush.bf16.msrb.mxu2 %v3551_v0  ;;  %v3627_v12 = vld [vmem:[%s4632_s3 + $0x8] sm:$0xff]  ;;  %v3663_v17 = vld [vmem:[%s4634_s2] ss:$0 sm:$0xff] }
   0x7   :  { %159 = vmatpush.bf16.msra.mxu1 %v3573_v4  ;;  %223 = vmatpush.bf16.msra.mxu3 %v3573_v4  ;;  %v3681_v32 = vld [vmem:[%s4635_s5] ss:$0 sm:$0xff] }
   0x8   :  { %262 = vmatpush.msrb.mxu0 %v3578_v5 }
   0xa   :  { %263 = vmatpush.msrb.mxu0 %v3619_v11 }
   0xb   :  { %160 = vmatpush.bf16.msra.mxu1 %v3588_v6  ;;  %224 = vmatpush.bf16.msra.mxu3 %v3588_v6 }
   0xc   :  { %264 = vmatpush.msrb.mxu0 %v3639_v14 }
   0xe   :  { %730 = vmatpush.bf16.msra.mxu0 %v3551_v0 }
   0xf   :  { %161 = vmatpush.bf16.msra.mxu1 %v3595_v7  ;;  %225 = vmatpush.bf16.msra.mxu3 %v3595_v7 }
  0x13   :  { %162 = vmatpush.bf16.msra.mxu1 %v3607_v9  ;;  %226 = vmatpush.bf16.msra.mxu3 %v3607_v9 }
  0x15   :  { %2939 = vmatmul.msk.bf16.gmra.mxu0 %vm58_vm0, %v3183_v8 }
  0x17   :  { %163 = vmatpush.bf16.msra.mxu1 %v3614_v10  ;;  %227 = vmatpush.bf16.msra.mxu3 %v3614_v10 }
  0x1b   :  { %164 = vmatpush.bf16.msra.mxu1 %v3627_v12  ;;  %228 = vmatpush.bf16.msra.mxu3 %v3627_v12 }
  0x1f   :  { %165 = vmatpush.bf16.msra.mxu1 %v3634_v13  ;;  %229 = vmatpush.bf16.msra.mxu3 %v3634_v13 }
  0x23   :  { %479 = vmatpush.bf16.msrb.mxu1 %v3559_v2  ;;  %530 = vmatpush.msrb.mxu3 %v3564_v3 }
  0x25   :  { %531 = vmatpush.msrb.mxu3 %v3578_v5  ;;  %265 = vmatmul.f32.vlgmr.msrb.gmra.mxu0 %v3499_v15 }
  0x26   :  { %1017 = vmatpush.bf16.msrb.mxu0 %v3559_v2 }
  0x27   :  { %480 = vmatpush.bf16.msrb.mxu1 %v3573_v4  ;;  %532 = vmatpush.msrb.mxu3 %v3619_v11 }
  0x29   :  { %533 = vmatpush.msrb.mxu3 %v3639_v14 }
  0x2a   :  { %1018 = vmatpush.bf16.msrb.mxu0 %v3573_v4 }
  0x2b   :  { %481 = vmatpush.bf16.msrb.mxu1 %v3588_v6 }
  0x2d   :  { %268 = vmatmul.f32.gmra.mxu0 %v3499_v15 }
  0x2e   :  { %1019 = vmatpush.bf16.msrb.mxu0 %v3588_v6 }
  0x2f   :  { %482 = vmatpush.bf16.msrb.mxu1 %v3595_v7 }
  0x32   :  { %1020 = vmatpush.bf16.msrb.mxu0 %v3595_v7 }
  0x33   :  { %483 = vmatpush.bf16.msrb.mxu1 %v3607_v9 }
  0x35   :  { %271 = vmatmul.f32.gmra.mxu0 %v3499_v15 }
  0x36   :  { %1021 = vmatpush.bf16.msrb.mxu0 %v3607_v9 }
  0x37   :  { %484 = vmatpush.bf16.msrb.mxu1 %v3614_v10 }
  0x3a   :  { %1022 = vmatpush.bf16.msrb.mxu0 %v3614_v10 }
  0x3b   :  { %485 = vmatpush.bf16.msrb.mxu1 %v3627_v12 }
  0x3d   :  { %274 = vmatmul.f32.gmra.mxu0 %v3499_v15 }
  0x3e   :  { %1023 = vmatpush.bf16.msrb.mxu0 %v3627_v12 }
  0x3f   :  { %486 = vmatpush.bf16.msrb.mxu1 %v3634_v13 }
  0x42   :  { %1024 = vmatpush.bf16.msrb.mxu0 %v3634_v13 }
  0x82   :  { %v74_v16 = vpop.f32.mrf.mxu0 }
  0x83   :  { %v75_v18 = vadd.f32 %v3663_v17, %v74_v16 }
  0x85   :  { %v84_v21 = vmax.f32 %v75_v18, 0.0 }
  0x8a   :  { %v76_v19 = vpop.f32.mrf.mxu0 }
  0x8b   :  { %v77_v20 = vadd.f32 %v3663_v17, %v76_v19 }
  0x8d   :  { %v85_v22 = vmax.f32 %v77_v20, 0.0 }
  0x8f   :  { %v88_v23 = vpack.c.bf16 %v85_v22, %v84_v21 }
  0x91   :  { %166 = vmatmul.bf16.vlgmr.msra.gmra.mxu1 %v88_v23 }
  0x92   :  { %v79_v24 = vpop.f32.mrf.mxu0  ;;  %799 = vmatpush.msra.mxu1 %v3564_v3 }
  0x93   :  { %v80_v25 = vadd.f32 %v3663_v17, %v79_v24 }
  0x94   :  { %800 = vmatpush.msra.mxu1 %v3578_v5 }
  0x95   :  { %v86_v28 = vmax.f32 %v80_v25, 0.0 }
  0x96   :  { %801 = vmatpush.msra.mxu1 %v3619_v11 }
  0x98   :  { %802 = vmatpush.msra.mxu1 %v3639_v14 }
  0x9a   :  { %v81_v26 = vpop.f32.mrf.mxu0 }
  0x9b   :  { %v82_v27 = vadd.f32 %v3663_v17, %v81_v26 }
  0x9d   :  { %v87_v29 = vmax.f32 %v82_v27, 0.0 }
  0x9f   :  { %v89_v30 = vpack.c.bf16 %v87_v29, %v86_v28 }
  0xa1   :  { %171 = vmatmul.bf16.gmra.mxu1 %v89_v30 }
  0xa2   :  { %v266_v31 = vpop.f32.mrf.mxu0 }
  0xaa   :  { %v269_v36 = vpop.f32.mrf.mxu0 }
  0xb2   :  { %v272_v44 = vpop.f32.mrf.mxu0 }
  0xba   :  { %v275_v54 = vpop.f32.mrf.mxu0 }
 0x10e   :  { %v167_v33 = vpop.f32.mrf.mxu1 }
 0x10f   :  { %v168_v34 = vadd.f32 %v3681_v32, %v167_v33 }
 0x111   :  { %v278_v35 = vadd.f32 %v266_v31, %v168_v34 }
 0x113   :  { %v2982_v37 = vmul.f32 -1.442695, %v278_v35 }
 0x115   :  { %3219 = vpow2.f32 %v2982_v37 }
 0x116   :  { %v169_v38 = vpop.f32.mrf.mxu1 }
 0x117   :  { %v170_v39 = vadd.f32 %v3681_v32, %v169_v38 }
 0x119   :  { %v279_v40 = vadd.f32 %v269_v36, %v170_v39 }
 0x11b   :  { %v3220_v41 = vpop.eup %3219  ;;  %v2983_v42 = vmul.f32 -1.442695, %v279_v40 }
 0x11c   :  { %v294_v43 = vadd.f32 1.0, %v3220_v41 }
 0x11d   :  { %3221 = vpow2.f32 %v2983_v42 }
 0x11e   :  { %3223 = vrcp.f32 %v294_v43  ;;  %v172_v45 = vpop.f32.mrf.mxu1  ;;  %v309_v57 = vand.u32 2147483648, %v294_v43  ;;  %v307_v60 = vand.u32 2147483647, %v294_v43  ;;  %vm303_vm2 = vweird.f32 %v294_v43 }
 0x11f   :  { %v173_v46 = vadd.f32 %v3681_v32, %v172_v45 }
 0x120   :  { %v310_v15 = vor.u32 1.1754944e-38, %v309_v57  ;;  %vm308_vm4 = vcmp.eq.f32.partialorder %v307_v60, 8.507059e+37 }
 0x121   :  { %v280_v47 = vadd.f32 %v272_v44, %v173_v46 }
 0x123   :  { %v3222_v48 = vpop.eup %3221  ;;  %v2984_v49 = vmul.f32 -1.442695, %v280_v47 }
 0x124   :  { %v3224_v50 = vpop.eup %3223  ;;  %v295_v51 = vadd.f32 1.0, %v3222_v48 }
 0x125   :  { %v299_v52 = vmul.f32 %v3224_v50, %v294_v43  ;;  %3225 = vpow2.f32 %v2984_v49  ;;  %vm304_vm1 = vweird.f32 %v3224_v50 }
 0x126   :  { %3227 = vrcp.f32 %v295_v51  ;;  %v174_v53 = vpop.f32.mrf.mxu1  ;;  %vm305_vm3 = vmor %vm303_vm2, %vm304_vm1  ;;  %v324_v22 = vand.u32 2147483648, %v295_v51  ;;  %v322_v25 = vand.u32 2147483647, %v295_v51  ;;  %vm318_vm6 = vweird.f32 %v295_v51 }
 0x127   :  { %v175_v55 = vadd.f32 %v3681_v32, %v174_v53  ;;  %v300_v56 = vsub.f32 1.0, %v299_v52  ;;  %vm245_vm2 = vcmask 261120  }
 0x128   :  { %v325_v30 = vor.u32 1.1754944e-38, %v324_v22  ;;  %vm323_vm8 = vcmp.eq.f32.partialorder %v322_v25, 8.507059e+37 }
 0x129   :  { %v281_v58 = vadd.f32 %v275_v54, %v175_v55  ;;  %v301_v59 = vmul.f32 %v3224_v50, %v300_v56 }
 0x12b   :  { %v3226_v61 = vpop.eup %3225  ;;  %v2985_v62 = vmul.f32 -1.442695, %v281_v58  ;;  %v302_v63 = vadd.f32 %v3224_v50, %v301_v59 }
 0x12c   :  { %v3228_v1 = vpop.eup %3227  ;;  %v296_v8 = vadd.f32 1.0, %v3226_v61 }
 0x12d   :  { %v314_v16 = vmul.f32 %v3228_v1, %v295_v51  ;;  %3229 = vpow2.f32 %v2985_v62  ;;  %v306_v18 = vsel %vm305_vm3, %v3224_v50, %v302_v63  ;;  %vm319_vm5 = vweird.f32 %v3228_v1 }
 0x12e   :  { %3231 = vrcp.f32 %v296_v8  ;;  %v3687_v19 = vsel %vm308_vm4, %v310_v15, %v306_v18  ;;  %vm320_vm7 = vmor %vm318_vm6, %vm319_vm5  ;;  %v339_v37 = vand.u32 2147483648, %v296_v8  ;;  %v337_v40 = vand.u32 2147483647, %v296_v8 }
 0x12f   :  { %v315_v20 = vsub.f32 1.0, %v314_v16  ;;  %v358_v21 = vmul.f32 2.0, %v3687_v19  ;;  %vm333_vm10 = vweird.f32 %v296_v8  ;;  %v3193_v16 = vld [vmem:[%s4631_s0 + $0x10] sm:$0xff]  ;;  %v366_v18 = vmul.f32 0.0, %v3687_v19 }
 0x130   :  { %v340_v43 = vor.u32 1.1754944e-38, %v339_v37  ;;  %vm338_vm12 = vcmp.eq.f32.partialorder %v337_v40, 8.507059e+37  ;;  %2980 = vmatmul.msk.bf16.vlgmr.msra.gmra.mxu2 %vm58_vm0, %v3193_v16 }
 0x131   :  { %v2986_v23 = vadd.f32 -1.0, %v358_v21  ;;  %v316_v24 = vmul.f32 %v3228_v1, %v315_v20  ;;  %748 = vmatpush.bf16.msra.mxu2 %v3559_v2  ;;  %v3194_v21 = vld [vmem:[%s4631_s0 + $0x18] sm:$0xff] }
 0x133   :  { %v3230_v26 = vpop.eup %3229  ;;  %374 = vrot.lane.b32.xlu0 %v2986_v23, %s3500_s17  ;;  %v317_v27 = vadd.f32 %v3228_v1, %v316_v24 }
 0x134   :  { %v3232_v28 = vpop.eup %3231  ;;  %v297_v29 = vadd.f32 1.0, %v3230_v26 }
 0x135   :  { %v329_v31 = vmul.f32 %v3232_v28, %v296_v8  ;;  %v321_v33 = vsel %vm320_vm7, %v3228_v1, %v317_v27  ;;  %vm334_vm9 = vweird.f32 %v3232_v28  ;;  %749 = vmatpush.bf16.msra.mxu2 %v3573_v4 }
 0x136   :  { %3233 = vrcp.f32 %v297_v29  ;;  %v3691_v34 = vsel %vm323_vm8, %v325_v30, %v321_v33  ;;  %vm335_vm11 = vmor %vm333_vm10, %vm334_vm9  ;;  %v354_v49 = vand.u32 2147483648, %v297_v29  ;;  %v352_v52 = vand.u32 2147483647, %v297_v29 }
 0x137   :  { %v359_v35 = vmul.f32 2.0, %v3691_v34  ;;  %v330_v36 = vsub.f32 1.0, %v329_v31  ;;  %vm348_vm14 = vweird.f32 %v297_v29  ;;  %v367_v23 = vmul.f32 0.0, %v3691_v34 }
 0x138   :  { %v355_v54 = vor.u32 1.1754944e-38, %v354_v49  ;;  %vm353_vm1 = vcmp.eq.f32.partialorder %v352_v52, 8.507059e+37 }
 0x139   :  { %v2987_v38 = vadd.f32 -1.0, %v359_v35  ;;  %v331_v39 = vmul.f32 %v3232_v28, %v330_v36  ;;  %750 = vmatpush.bf16.msra.mxu2 %v3588_v6 }
 0x13b   :  { %376 = vrot.lane.b32.xlu0 %v2987_v38, %s3500_s17  ;;  %v332_v41 = vadd.f32 %v3232_v28, %v331_v39 }
 0x13c   :  { %v3234_v42 = vpop.eup %3233 }
 0x13d   :  { %v344_v44 = vmul.f32 %v3234_v42, %v297_v29  ;;  %v336_v45 = vsel %vm335_vm11, %v3232_v28, %v332_v41  ;;  %vm349_vm13 = vweird.f32 %v3234_v42  ;;  %751 = vmatpush.bf16.msra.mxu2 %v3595_v7 }
 0x13e   :  { %v3695_v46 = vsel %vm338_vm12, %v340_v43, %v336_v45  ;;  %vm350_vm15 = vmor %vm348_vm14, %vm349_vm13 }
 0x13f   :  { %v345_v47 = vsub.f32 1.0, %v344_v44  ;;  %v360_v48 = vmul.f32 2.0, %v3695_v46  ;;  %v368_v28 = vmul.f32 0.0, %v3695_v46 }
 0x140   :  { %2981 = vmatmul.msk.bf16.gmra.mxu2 %vm58_vm0, %v3194_v21 }
 0x141   :  { %v2988_v50 = vadd.f32 -1.0, %v360_v48  ;;  %v346_v51 = vmul.f32 %v3234_v42, %v345_v47  ;;  %752 = vmatpush.bf16.msra.mxu2 %v3607_v9 }
 0x143   :  { %378 = vrot.lane.b32.xlu1 %v2988_v50, %s3500_s17  ;;  %v347_v53 = vadd.f32 %v3234_v42, %v346_v51 }
 0x145   :  { %v351_v55 = vsel %vm350_vm15, %v3234_v42, %v347_v53  ;;  %753 = vmatpush.bf16.msra.mxu2 %v3614_v10 }
 0x146   :  { %v3699_v56 = vsel %vm353_vm1, %v355_v54, %v351_v55 }
 0x147   :  { %v361_v57 = vmul.f32 2.0, %v3699_v56  ;;  %v369_v31 = vmul.f32 0.0, %v3699_v56 }
 0x149   :  { %v2989_v58 = vadd.f32 -1.0, %v361_v57  ;;  %754 = vmatpush.bf16.msra.mxu2 %v3627_v12 }
 0x14b   :  { %380 = vrot.lane.b32.xlu1 %v2989_v58, %s3500_s17 }
 0x14d   :  { %755 = vmatpush.bf16.msra.mxu2 %v3634_v13 }
 0x1a5   :  { %v375_v59 = vpop.permute.xlu0 %374 }
 0x1a6   :  { %v386_v60 = vmul.f32 %v375_v59, %v3687_v19 }
 0x1a8   :  { %394 = vrot.lane.b32.xlu2 %v386_v60, %s3501_s18 }
 0x1ad   :  { %v377_v61 = vpop.permute.xlu0 %376 }
 0x1ae   :  { %v387_v62 = vmul.f32 %v377_v61, %v3691_v34 }
 0x1b0   :  { %396 = vrot.lane.b32.xlu2 %v387_v62, %s3501_s18 }
 0x1b3   :  { %v206_v40 = vpop.f32.mrf.mxu2 }
 0x1b4   :  { %v207_v41 = vadd.f32 %v3663_v17, %v206_v40 }
 0x1b5   :  { %v379_v63 = vpop.permute.xlu1 %378 }
 0x1b6   :  { %v388_v1 = vmul.f32 %v379_v63, %v3695_v46  ;;  %v216_v44 = vmax.f32 %v207_v41, 0.0 }
 0x1b8   :  { %398 = vrot.lane.b32.xlu0 %v388_v1, %s3501_s18 }
 0x1bb   :  { %v208_v42 = vpop.f32.mrf.mxu2 }
 0x1bc   :  { %v209_v43 = vadd.f32 %v3663_v17, %v208_v42 }
 0x1bd   :  { %v381_v8 = vpop.permute.xlu1 %380 }
 0x1be   :  { %v389_v15 = vmul.f32 %v381_v8, %v3699_v56  ;;  %v217_v45 = vmax.f32 %v209_v43, 0.0 }
 0x1c0   :  { %400 = vrot.lane.b32.xlu1 %v389_v15, %s3501_s18  ;;  %v220_v49 = vpack.c.bf16 %v217_v45, %v216_v44 }
 0x1c2   :  { %230 = vmatmul.bf16.vlgmr.msra.gmra.mxu3 %v220_v49 }
 0x1c3   :  { %v211_v50 = vpop.f32.mrf.mxu2  ;;  %999 = vmatpush.bf16.msra.mxu3 %v3551_v0 }
 0x1cb   :  { %v213_v51 = vpop.f32.mrf.mxu2 }
 0x1cc   :  { %v214_v52 = vadd.f32 %v3663_v17, %v213_v51 }
 0x1ce   :  { %v219_v54 = vmax.f32 %v214_v52, 0.0 }
 0x202   :  { %v395_v20 = vpop.permute.xlu2 %394 }
 0x203   :  { %v3722_v22 = vadd.f32 %v395_v20, %v366_v18 }
 0x205   :  { %3235 = vtanh.f32 %v3722_v22 }
 0x20a   :  { %v397_v24 = vpop.permute.xlu2 %396 }
 0x20b   :  { %v3236_v25 = vpop.eup %3235  ;;  %v3729_v26 = vadd.f32 %v397_v24, %v367_v23 }
 0x20c   :  { %418 = vrot.lane.b32.xlu2 %v3236_v25, %s3500_s17 }
 0x20d   :  { %3237 = vtanh.f32 %v3729_v26 }
 0x213   :  { %v3238_v27 = vpop.eup %3237 }
 0x214   :  { %420 = vrot.lane.b32.xlu0 %v3238_v27, %s3500_s17 }
 0x22a   :  { %v399_v29 = vpop.permute.xlu0 %398 }
 0x22b   :  { %v3738_v30 = vadd.f32 %v399_v29, %v368_v28 }
 0x22d   :  { %3239 = vtanh.f32 %v3738_v30 }
 0x232   :  { %v401_v33 = vpop.permute.xlu1 %400 }
 0x233   :  { %v3240_v35 = vpop.eup %3239  ;;  %v3742_v36 = vadd.f32 %v401_v33, %v369_v31 }
 0x234   :  { %422 = vrot.lane.b32.xlu1 %v3240_v35, %s3500_s17 }
 0x235   :  { %3241 = vtanh.f32 %v3742_v36 }
 0x23b   :  { %v3242_v37 = vpop.eup %3241 }
 0x23c   :  { %424 = vrot.lane.b32.xlu2 %v3242_v37, %s3500_s17 }
 0x245   :  { %v231_v62 = vpop.f32.mrf.mxu3 }
 0x246   :  { %v232_v15 = vadd.f32 %v3681_v32, %v231_v62 }
 0x24d   :  { %v233_v63 = vpop.f32.mrf.mxu3 }
 0x266   :  { %v419_v38 = vpop.permute.xlu2 %418 }
 0x267   :  { %v430_v39 = vmul.f32 %v419_v38, %v3687_v19  ;;  %v212_v19 = vadd.f32 %v3663_v17, %v211_v50 }
 0x269   :  { %502 = vrot.lane.b32.xlu0 %v430_v39, %s3501_s18  ;;  %v218_v53 = vmax.f32 %v212_v19, 0.0  ;;  %v234_v39 = vadd.f32 %v3681_v32, %v233_v63 }
 0x26b   :  { %v221_v58 = vpack.c.bf16 %v219_v54, %v218_v53 }
 0x26d   :  { %235 = vmatmul.bf16.gmra.mxu3 %v221_v58 }
 0x286   :  { %v421_v47 = vpop.permute.xlu0 %420 }
 0x287   :  { %v431_v48 = vmul.f32 %v421_v47, %v3691_v34 }
 0x289   :  { %504 = vrot.lane.b32.xlu1 %v431_v48, %s3501_s18 }
 0x296   :  { %v425_v55 = vpop.permute.xlu2 %424 }
 0x297   :  { %v433_v57 = vmul.f32 %v425_v55, %v3699_v56 }
 0x299   :  { %508 = vrot.lane.b32.xlu0 %v433_v57, %s3501_s18 }
 0x2a6   :  { %v423_v34 = vpop.permute.xlu1 %422 }
 0x2a7   :  { %v432_v59 = vmul.f32 %v423_v34, %v3695_v46 }
 0x2a9   :  { %506 = vrot.lane.b32.xlu2 %v432_v59, %s3501_s18 }
 0x2db   :  { %v503_v60 = vpop.permute.xlu0 %502 }
 0x2dc   :  { %3000 = vmatmul.msk.f32.vlgmr.msrb.gmra.mxu3 %vm245_vm2, %v503_v60 }
 0x2dd   :  { %1286 = vmatpush.bf16.msrb.mxu3 %v3559_v2 }
 0x2e1   :  { %1287 = vmatpush.bf16.msrb.mxu3 %v3573_v4 }
 0x2e5   :  { %1288 = vmatpush.bf16.msrb.mxu3 %v3588_v6 }
 0x2e9   :  { %1289 = vmatpush.bf16.msrb.mxu3 %v3595_v7 }
 0x2ed   :  { %1290 = vmatpush.bf16.msrb.mxu3 %v3607_v9 }
 0x2f0   :  { %v236_v1 = vpop.f32.mrf.mxu3 }
 0x2f1   :  { %1291 = vmatpush.bf16.msrb.mxu3 %v3614_v10  ;;  %v237_v45 = vadd.f32 %v3681_v32, %v236_v1 }
 0x2f5   :  { %1292 = vmatpush.bf16.msrb.mxu3 %v3627_v12 }
 0x2f8   :  { %v238_v8 = vpop.f32.mrf.mxu3 }
 0x2f9   :  { %1293 = vmatpush.bf16.msrb.mxu3 %v3634_v13  ;;  %v239_v51 = vadd.f32 %v3681_v32, %v238_v8 }
 0x2fb   :  { %v505_v46 = vpop.permute.xlu1 %504 }
 0x2fc   :  { %3001 = vmatmul.msk.f32.gmra.mxu3 %vm245_vm2, %v505_v46 }
 0x303   :  { %v507_v56 = vpop.permute.xlu2 %506 }
 0x304   :  { %3002 = vmatmul.msk.f32.gmra.mxu3 %vm245_vm2, %v507_v56 }
 0x30b   :  { %v509_v61 = vpop.permute.xlu0 %508 }
 0x30c   :  { %3003 = vmatmul.msk.f32.gmra.mxu3 %vm245_vm2, %v509_v61 }
 0x35f   :  { %v535_v16 = vpop.f32.mrf.mxu3 }
 0x360   :  { %v547_v18 = vadd.f32 %v535_v16, %v232_v15 }
 0x362   :  { %v3004_v20 = vmul.f32 -1.442695, %v547_v18 }
 0x364   :  { %3243 = vpow2.f32 %v3004_v20 }
 0x36a   :  { %v3244_v21 = vpop.eup %3243 }
 0x36b   :  { %v563_v23 = vadd.f32 1.0, %v3244_v21 }
 0x36d   :  { %3245 = vrcp.f32 %v563_v23  ;;  %v578_v28 = vand.u32 2147483648, %v563_v23  ;;  %v576_v31 = vand.u32 2147483647, %v563_v23  ;;  %vm572_vm4 = vweird.f32 %v563_v23 }
 0x36f   :  { %v579_v35 = vor.u32 1.1754944e-38, %v578_v28  ;;  %vm577_vm6 = vcmp.eq.f32.partialorder %v576_v31, 8.507059e+37 }
 0x373   :  { %v3246_v24 = vpop.eup %3245 }
 0x374   :  { %v568_v25 = vmul.f32 %v3246_v24, %v563_v23  ;;  %vm573_vm3 = vweird.f32 %v3246_v24 }
 0x375   :  { %vm574_vm5 = vmor %vm572_vm4, %vm573_vm3 }
 0x376   :  { %v569_v27 = vsub.f32 1.0, %v568_v25 }
 0x378   :  { %v570_v29 = vmul.f32 %v3246_v24, %v569_v27 }
 0x37a   :  { %v571_v33 = vadd.f32 %v3246_v24, %v570_v29 }
 0x37c   :  { %v575_v37 = vsel %vm574_vm5, %v3246_v24, %v571_v33 }
 0x37d   :  { %v3773_v38 = vsel %vm577_vm6, %v579_v35, %v575_v37 }
 0x37e   :  { %v627_v40 = vmul.f32 2.0, %v3773_v38 }
 0x37f   :  { %v538_v41 = vpop.f32.mrf.mxu3 }
 0x380   :  { %v548_v42 = vadd.f32 %v538_v41, %v234_v39  ;;  %v3008_v43 = vadd.f32 -1.0, %v627_v40 }
 0x382   :  { %v3005_v44 = vmul.f32 -1.442695, %v548_v42  ;;  %643 = vrot.lane.b32.xlu1 %v3008_v43, %s3500_s17 }
 0x384   :  { %3247 = vpow2.f32 %v3005_v44 }
 0x387   :  { %v541_v47 = vpop.f32.mrf.mxu3 }
 0x388   :  { %v549_v48 = vadd.f32 %v541_v47, %v237_v45 }
 0x38a   :  { %v3248_v49 = vpop.eup %3247  ;;  %v3006_v50 = vmul.f32 -1.442695, %v549_v48 }
 0x38b   :  { %v564_v19 = vadd.f32 1.0, %v3248_v49 }
 0x38c   :  { %3249 = vpow2.f32 %v3006_v50 }
 0x38d   :  { %3251 = vrcp.f32 %v564_v19  ;;  %v593_v60 = vand.u32 2147483648, %v564_v19  ;;  %v591_v56 = vand.u32 2147483647, %v564_v19  ;;  %vm587_vm8 = vweird.f32 %v564_v19 }
 0x38f   :  { %v544_v52 = vpop.f32.mrf.mxu3  ;;  %v594_v8 = vor.u32 1.1754944e-38, %v593_v60  ;;  %vm592_vm10 = vcmp.eq.f32.partialorder %v591_v56, 8.507059e+37 }
 0x390   :  { %v550_v53 = vadd.f32 %v544_v52, %v239_v51 }
 0x392   :  { %v3250_v54 = vpop.eup %3249  ;;  %v3007_v55 = vmul.f32 -1.442695, %v550_v53 }
 0x393   :  { %v3252_v57 = vpop.eup %3251  ;;  %v565_v58 = vadd.f32 1.0, %v3250_v54 }
 0x394   :  { %v583_v34 = vmul.f32 %v3252_v57, %v564_v19  ;;  %3253 = vpow2.f32 %v3007_v55  ;;  %vm588_vm7 = vweird.f32 %v3252_v57 }
 0x395   :  { %3255 = vrcp.f32 %v565_v58  ;;  %vm589_vm9 = vmor %vm587_vm8, %vm588_vm7  ;;  %v608_v23 = vand.u32 2147483648, %v565_v58  ;;  %v606_v27 = vand.u32 2147483647, %v565_v58  ;;  %vm602_vm12 = vweird.f32 %v565_v58 }
 0x396   :  { %v584_v59 = vsub.f32 1.0, %v583_v34 }
 0x397   :  { %v609_v31 = vor.u32 1.1754944e-38, %v608_v23  ;;  %vm607_vm14 = vcmp.eq.f32.partialorder %v606_v27, 8.507059e+37 }
 0x398   :  { %v585_v46 = vmul.f32 %v3252_v57, %v584_v59  ;;  %v635_v59 = vmul.f32 %v3773_v38, %v3722_v22  ;;  %v3196_v22 = vld [vmem:[%s4631_s0 + $0x28] sm:$0xff] }
 0x39a   :  { %v3254_v61 = vpop.eup %3253  ;;  %v586_v62 = vadd.f32 %v3252_v57, %v585_v46 }
 0x39b   :  { %v3256_v63 = vpop.eup %3255  ;;  %v566_v1 = vadd.f32 1.0, %v3254_v61  ;;  %v3195_v61 = vld [vmem:[%s4631_s0 + $0x20] sm:$0xff] }
 0x39c   :  { %v598_v15 = vmul.f32 %v3256_v63, %v565_v58  ;;  %v590_v16 = vsel %vm589_vm9, %v3252_v57, %v586_v62  ;;  %vm603_vm11 = vweird.f32 %v3256_v63  ;;  %2998 = vmatmul.msk.bf16.vlgmr.msrb.gmra.mxu2 %vm58_vm0, %v3195_v61 }
 0x39d   :  { %3257 = vrcp.f32 %v566_v1  ;;  %v3780_v18 = vsel %vm592_vm10, %v594_v8, %v590_v16  ;;  %vm604_vm13 = vmor %vm602_vm12, %vm603_vm11  ;;  %v623_v41 = vand.u32 2147483648, %v566_v1  ;;  %v621_v44 = vand.u32 2147483647, %v566_v1  ;;  %1068 = vmatpush.msrb.mxu2 %v3564_v3 }
 0x39e   :  { %v599_v20 = vsub.f32 1.0, %v598_v15  ;;  %v628_v21 = vmul.f32 2.0, %v3780_v18  ;;  %vm617_vm1 = vweird.f32 %v566_v1  ;;  %v636_v62 = vmul.f32 %v3780_v18, %v3729_v26 }
 0x39f   :  { %v624_v47 = vor.u32 1.1754944e-38, %v623_v41  ;;  %vm622_vm4 = vcmp.eq.f32.partialorder %v621_v44, 8.507059e+37  ;;  %1069 = vmatpush.msrb.mxu2 %v3578_v5 }
 0x3a0   :  { %v3009_v24 = vadd.f32 -1.0, %v628_v21  ;;  %v600_v25 = vmul.f32 %v3256_v63, %v599_v20 }
 0x3a1   :  { %1070 = vmatpush.msrb.mxu2 %v3619_v11 }
 0x3a2   :  { %645 = vrot.lane.b32.xlu2 %v3009_v24, %s3500_s17  ;;  %v601_v28 = vadd.f32 %v3256_v63, %v600_v25 }
 0x3a3   :  { %v3258_v29 = vpop.eup %3257  ;;  %1071 = vmatpush.msrb.mxu2 %v3639_v14 }
 0x3a4   :  { %v613_v33 = vmul.f32 %v3258_v29, %v566_v1  ;;  %v605_v35 = vsel %vm604_vm13, %v3256_v63, %v601_v28  ;;  %vm618_vm15 = vweird.f32 %v3258_v29 }
 0x3a5   :  { %v3784_v37 = vsel %vm607_vm14, %v609_v31, %v605_v35  ;;  %vm619_vm3 = vmor %vm617_vm1, %vm618_vm15 }
 0x3a6   :  { %v614_v39 = vsub.f32 1.0, %v613_v33  ;;  %v629_v40 = vmul.f32 2.0, %v3784_v37  ;;  %v637_v26 = vmul.f32 %v3784_v37, %v3738_v30 }
 0x3a8   :  { %v3010_v42 = vadd.f32 -1.0, %v629_v40  ;;  %v615_v43 = vmul.f32 %v3258_v29, %v614_v39 }
 0x3aa   :  { %647 = vrot.lane.b32.xlu0 %v3010_v42, %s3500_s17  ;;  %v616_v45 = vadd.f32 %v3258_v29, %v615_v43 }
 0x3ac   :  { %v620_v48 = vsel %vm619_vm3, %v3258_v29, %v616_v45  ;;  %2999 = vmatmul.msk.bf16.gmra.mxu2 %vm58_vm0, %v3196_v22 }
 0x3ad   :  { %v3788_v49 = vsel %vm622_vm4, %v624_v47, %v620_v48 }
 0x3ae   :  { %v630_v50 = vmul.f32 2.0, %v3788_v49  ;;  %v638_v5 = vmul.f32 %v3788_v49, %v3742_v36 }
 0x3b0   :  { %v3011_v19 = vadd.f32 -1.0, %v630_v50 }
 0x3b2   :  { %649 = vrot.lane.b32.xlu1 %v3011_v19, %s3500_s17 }
 0x3f4   :  { %v644_v51 = vpop.permute.xlu1 %643 }
 0x3f5   :  { %v655_v52 = vmul.f32 %v644_v51, %v3773_v38 }
 0x3f7   :  { %663 = vrot.lane.b32.xlu2 %v655_v52, %s3501_s18 }
 0x3fc   :  { %v646_v53 = vpop.permute.xlu2 %645 }
 0x3fd   :  { %v656_v54 = vmul.f32 %v646_v53, %v3780_v18 }
 0x3ff   :  { %665 = vrot.lane.b32.xlu0 %v656_v54, %s3501_s18 }
 0x41c   :  { %v648_v55 = vpop.permute.xlu0 %647 }
 0x41d   :  { %v657_v57 = vmul.f32 %v648_v55, %v3784_v37 }
 0x41f   :  { %667 = vrot.lane.b32.xlu1 %v657_v57, %s3501_s18  ;;  %v463_v23 = vpop.f32.mrf.mxu2 }
 0x420   :  { %v464_v24 = vadd.f32 %v3663_v17, %v463_v23 }
 0x422   :  { %v473_v27 = vmax.f32 %v464_v24, 0.0 }
 0x424   :  { %v650_v58 = vpop.permute.xlu1 %649 }
 0x425   :  { %v658_v34 = vmul.f32 %v650_v58, %v3788_v49 }
 0x427   :  { %669 = vrot.lane.b32.xlu2 %v658_v34, %s3501_s18  ;;  %v465_v25 = vpop.f32.mrf.mxu2 }
 0x428   :  { %v466_v30 = vadd.f32 %v3663_v17, %v465_v25 }
 0x42a   :  { %v474_v28 = vmax.f32 %v466_v30, 0.0 }
 0x42c   :  { %v477_v31 = vpack.c.bf16 %v474_v28, %v473_v27 }
 0x42e   :  { %487 = vmatmul.bf16.vlgmr.msrb.gmra.mxu1 %v477_v31 }
 0x42f   :  { %v468_v35 = vpop.f32.mrf.mxu2  ;;  %1268 = vmatpush.bf16.msrb.mxu1 %v3551_v0 }
 0x430   :  { %v469_v39 = vadd.f32 %v3663_v17, %v468_v35 }
 0x432   :  { %v475_v42 = vmax.f32 %v469_v39, 0.0 }
 0x437   :  { %v470_v41 = vpop.f32.mrf.mxu2 }
 0x438   :  { %v471_v43 = vadd.f32 %v3663_v17, %v470_v41 }
 0x43a   :  { %v476_v44 = vmax.f32 %v471_v43, 0.0 }
 0x451   :  { %v664_v60 = vpop.permute.xlu2 %663 }
 0x452   :  { %v3802_v46 = vadd.f32 %v664_v60, %v635_v59 }
 0x454   :  { %3259 = vtanh.f32 %v3802_v46 }
 0x45a   :  { %v3260_v56 = vpop.eup %3259 }
 0x45b   :  { %687 = vrot.lane.b32.xlu0 %v3260_v56, %s3500_s17 }
 0x471   :  { %v666_v63 = vpop.permute.xlu0 %665 }
 0x472   :  { %v3820_v1 = vadd.f32 %v666_v63, %v636_v62 }
 0x474   :  { %3261 = vtanh.f32 %v3820_v1 }
 0x47a   :  { %v3262_v3 = vpop.eup %3261 }
 0x47b   :  { %689 = vrot.lane.b32.xlu1 %v3262_v3, %s3500_s17 }
 0x481   :  { %v670_v11 = vpop.permute.xlu2 %669 }
 0x482   :  { %v3826_v14 = vadd.f32 %v670_v11, %v638_v5 }
 0x484   :  { %3263 = vtanh.f32 %v3826_v14 }
 0x48a   :  { %v3264_v8 = vpop.eup %3263 }
 0x48b   :  { %693 = vrot.lane.b32.xlu0 %v3264_v8, %s3500_s17 }
 0x491   :  { %v668_v15 = vpop.permute.xlu1 %667 }
 0x492   :  { %v3832_v16 = vadd.f32 %v668_v15, %v637_v26 }
 0x494   :  { %3265 = vtanh.f32 %v3832_v16 }
 0x49a   :  { %v3266_v20 = vpop.eup %3265 }
 0x49b   :  { %691 = vrot.lane.b32.xlu2 %v3266_v20, %s3500_s17 }
 0x4cd   :  { %v688_v36 = vpop.permute.xlu0 %687 }
 0x4ce   :  { %v699_v21 = vmul.f32 %v688_v36, %v3773_v38 }
 0x4d0   :  { %771 = vrot.lane.b32.xlu1 %v699_v21, %s3501_s18 }
 0x4ed   :  { %v690_v29 = vpop.permute.xlu1 %689 }
 0x4ee   :  { %v700_v33 = vmul.f32 %v690_v29, %v3780_v18  ;;  %v478_v18 = vpack.c.bf16 %v476_v44, %v475_v42 }
 0x4f0   :  { %773 = vrot.lane.b32.xlu2 %v700_v33, %s3501_s18  ;;  %492 = vmatmul.bf16.gmra.mxu1 %v478_v18 }
 0x4f5   :  { %v692_v38 = vpop.permute.xlu2 %691 }
 0x4f6   :  { %v701_v40 = vmul.f32 %v692_v38, %v3784_v37 }
 0x4f8   :  { %775 = vrot.lane.b32.xlu0 %v701_v40, %s3501_s18 }
 0x4fd   :  { %v694_v45 = vpop.permute.xlu0 %693 }
 0x4fe   :  { %v702_v47 = vmul.f32 %v694_v45, %v3788_v49 }
 0x500   :  { %777 = vrot.lane.b32.xlu1 %v702_v47, %s3501_s18 }
 0x542   :  { %v772_v0 = vpop.permute.xlu1 %771 }
 0x543   :  { %3022 = vmatmul.msk.f32.vlgmr.msra.gmra.mxu1 %vm245_vm2, %v772_v0 }
 0x544   :  { %1555 = vmatpush.bf16.msra.mxu1 %v3559_v2 }
 0x548   :  { %1556 = vmatpush.bf16.msra.mxu1 %v3573_v4  ;;  %v488_v4 = vpop.f32.mrf.mxu1 }
 0x54a   :  { %v774_v37 = vpop.permute.xlu2 %773 }
 0x54b   :  { %3023 = vmatmul.msk.f32.gmra.mxu1 %vm245_vm2, %v774_v37 }
 0x54c   :  { %1557 = vmatpush.bf16.msra.mxu1 %v3588_v6 }
 0x550   :  { %1558 = vmatpush.bf16.msra.mxu1 %v3595_v7  ;;  %v490_v48 = vpop.f32.mrf.mxu1  ;;  %v489_v7 = vadd.f32 %v3681_v32, %v488_v4 }
 0x554   :  { %1559 = vmatpush.bf16.msra.mxu1 %v3607_v9 }
 0x558   :  { %1560 = vmatpush.bf16.msra.mxu1 %v3614_v10  ;;  %v491_v10 = vadd.f32 %v3681_v32, %v490_v48 }
 0x55c   :  { %1561 = vmatpush.bf16.msra.mxu1 %v3627_v12 }
 0x560   :  { %1562 = vmatpush.bf16.msra.mxu1 %v3634_v13 }
 0x56a   :  { %v776_v17 = vpop.permute.xlu0 %775 }
 0x56b   :  { %3024 = vmatmul.msk.f32.gmra.mxu1 %vm245_vm2, %v776_v17 }
 0x56d   :  { %v493_v49 = vpop.f32.mrf.mxu1 }
 0x56e   :  { %v494_v27 = vadd.f32 %v3681_v32, %v493_v49 }
 0x572   :  { %v778_v2 = vpop.permute.xlu1 %777 }
 0x573   :  { %3025 = vmatmul.msk.f32.gmra.mxu1 %vm245_vm2, %v778_v2 }
 0x575   :  { %v495_v6 = vpop.f32.mrf.mxu1 }
 0x576   :  { %v496_v35 = vadd.f32 %v3681_v32, %v495_v6 }
 0x5c0   :  { %v804_v50 = vpop.f32.mrf.mxu1 }
 0x5c1   :  { %v816_v9 = vadd.f32 %v804_v50, %v489_v7 }
 0x5c3   :  { %v3026_v19 = vmul.f32 -1.442695, %v816_v9 }
 0x5c5   :  { %3267 = vpow2.f32 %v3026_v19 }
 0x5c8   :  { %v807_v12 = vpop.f32.mrf.mxu1 }
 0x5c9   :  { %v817_v13 = vadd.f32 %v807_v12, %v491_v10 }
 0x5cb   :  { %v3268_v51 = vpop.eup %3267  ;;  %v3027_v52 = vmul.f32 -1.442695, %v817_v13 }
 0x5cc   :  { %v832_v53 = vadd.f32 1.0, %v3268_v51 }
 0x5cd   :  { %3269 = vpow2.f32 %v3027_v52 }
 0x5ce   :  { %3271 = vrcp.f32 %v832_v53  ;;  %v847_v59 = vand.u32 2147483648, %v832_v53  ;;  %v845_v56 = vand.u32 2147483647, %v832_v53  ;;  %vm841_vm6 = vweird.f32 %v832_v53 }
 0x5d0   :  { %v848_v62 = vor.u32 1.1754944e-38, %v847_v59  ;;  %vm846_vm8 = vcmp.eq.f32.partialorder %v845_v56, 8.507059e+37 }
 0x5d3   :  { %v3270_v54 = vpop.eup %3269 }
 0x5d4   :  { %v3272_v55 = vpop.eup %3271  ;;  %v833_v57 = vadd.f32 1.0, %v3270_v54 }
 0x5d5   :  { %v837_v58 = vmul.f32 %v3272_v55, %v832_v53  ;;  %vm842_vm5 = vweird.f32 %v3272_v55 }
 0x5d6   :  { %3273 = vrcp.f32 %v833_v57  ;;  %vm843_vm7 = vmor %vm841_vm6, %vm842_vm5  ;;  %v862_v26 = vand.u32 2147483648, %v833_v57  ;;  %v860_v36 = vand.u32 2147483647, %v833_v57  ;;  %vm856_vm10 = vweird.f32 %v833_v57 }
 0x5d7   :  { %v838_v34 = vsub.f32 1.0, %v837_v58 }
 0x5d8   :  { %v863_v23 = vor.u32 1.1754944e-38, %v862_v26  ;;  %vm861_vm12 = vcmp.eq.f32.partialorder %v860_v36, 8.507059e+37 }
 0x5d9   :  { %v839_v60 = vmul.f32 %v3272_v55, %v838_v34 }
 0x5db   :  { %v840_v61 = vadd.f32 %v3272_v55, %v839_v60 }
 0x5dc   :  { %v3274_v22 = vpop.eup %3273 }
 0x5dd   :  { %v852_v63 = vmul.f32 %v3274_v22, %v833_v57  ;;  %v844_v3 = vsel %vm843_vm7, %v3272_v55, %v840_v61  ;;  %vm857_vm9 = vweird.f32 %v3274_v22 }
 0x5de   :  { %v3863_v5 = vsel %vm846_vm8, %v848_v62, %v844_v3  ;;  %vm858_vm11 = vmor %vm856_vm10, %vm857_vm9  ;;  %v3197_v62 = vld [vmem:[%s4631_s0 + $0x30] sm:$0xff] }
 0x5df   :  { %v853_v11 = vsub.f32 1.0, %v852_v63  ;;  %v896_v8 = vmul.f32 2.0, %v3863_v5  ;;  %3020 = vmatmul.msk.bf16.vlgmr.msra.gmra.mxu0 %vm58_vm0, %v3197_v62  ;;  %v3896_v63 = vld [vmem:[%s4633_s4 + $0x18] sm:$0xff]  ;;  %v3902_v3 = vld [vmem:[%s4633_s4 + $0x10] sm:$0xff]  ;;  %v904_v26 = vmul.f32 %v3863_v5, %v3802_v46 }
 0x5e0   :  { %1337 = vmatpush.msra.mxu0 %v3896_v63 }
 0x5e1   :  { %v3030_v15 = vadd.f32 -1.0, %v896_v8  ;;  %v854_v20 = vmul.f32 %v3274_v22, %v853_v11  ;;  %v3908_v11 = vld [vmem:[%s4633_s4 + $0x8] sm:$0xff]  ;;  %v3914_v8 = vld [vmem:[%s4633_s4] sm:$0xff] }
 0x5e2   :  { %1338 = vmatpush.msra.mxu0 %v3902_v3 }
 0x5e3   :  { %912 = vrot.lane.b32.xlu2 %v3030_v15, %s3500_s17  ;;  %v855_v21 = vadd.f32 %v3274_v22, %v854_v20 }
 0x5e4   :  { %1339 = vmatpush.msra.mxu0 %v3908_v11 }
 0x5e5   :  { %v859_v24 = vsel %vm858_vm11, %v3274_v22, %v855_v21  ;;  %v3198_v21 = vld [vmem:[%s4631_s0 + $0x38] sm:$0xff] }
 0x5e6   :  { %v3867_v25 = vsel %vm861_vm12, %v863_v23, %v859_v24  ;;  %1340 = vmatpush.msra.mxu0 %v3914_v8 }
 0x5e7   :  { %v897_v30 = vmul.f32 2.0, %v3867_v25  ;;  %v905_v23 = vmul.f32 %v3867_v25, %v3820_v1 }
 0x5e8   :  { %v810_v28 = vpop.f32.mrf.mxu1 }
 0x5e9   :  { %v818_v29 = vadd.f32 %v810_v28, %v494_v27  ;;  %v3031_v31 = vadd.f32 -1.0, %v897_v30 }
 0x5eb   :  { %v3028_v33 = vmul.f32 -1.442695, %v818_v29  ;;  %914 = vrot.lane.b32.xlu0 %v3031_v31, %s3500_s17 }
 0x5ed   :  { %3275 = vpow2.f32 %v3028_v33 }
 0x5ef   :  { %3021 = vmatmul.msk.bf16.gmra.mxu0 %vm58_vm0, %v3198_v21 }
 0x5f0   :  { %v813_v38 = vpop.f32.mrf.mxu1 }
 0x5f1   :  { %v819_v39 = vadd.f32 %v813_v38, %v496_v35 }
 0x5f3   :  { %v3276_v40 = vpop.eup %3275  ;;  %v3029_v41 = vmul.f32 -1.442695, %v819_v39  ;;  %v3948_v39 = vld [vmem:[%s4634_s2] ss:$0 sm:$0xff] }
 0x5f4   :  { %v834_v42 = vadd.f32 1.0, %v3276_v40 }
 0x5f5   :  { %3277 = vpow2.f32 %v3029_v41 }
 0x5f6   :  { %3279 = vrcp.f32 %v834_v42  ;;  %v877_v0 = vand.u32 2147483648, %v834_v42  ;;  %v875_v17 = vand.u32 2147483647, %v834_v42  ;;  %vm871_vm14 = vweird.f32 %v834_v42 }
 0x5f8   :  { %v878_v4 = vor.u32 1.1754944e-38, %v877_v0  ;;  %vm876_vm1 = vcmp.eq.f32.partialorder %v875_v17, 8.507059e+37 }
 0x5fb   :  { %v3278_v43 = vpop.eup %3277 }
 0x5fc   :  { %v3280_v44 = vpop.eup %3279  ;;  %v835_v45 = vadd.f32 1.0, %v3278_v43 }
 0x5fd   :  { %v867_v18 = vmul.f32 %v3280_v44, %v834_v42  ;;  %vm872_vm13 = vweird.f32 %v3280_v44 }
 0x5fe   :  { %3281 = vrcp.f32 %v835_v45  ;;  %vm873_vm15 = vmor %vm871_vm14, %vm872_vm13  ;;  %v892_v9 = vand.u32 2147483648, %v835_v45  ;;  %v890_v12 = vand.u32 2147483647, %v835_v45  ;;  %vm886_vm4 = vweird.f32 %v835_v45 }
 0x5ff   :  { %v868_v47 = vsub.f32 1.0, %v867_v18 }
 0x600   :  { %v893_v51 = vor.u32 1.1754944e-38, %v892_v9  ;;  %vm891_vm6 = vcmp.eq.f32.partialorder %v890_v12, 8.507059e+37  ;;  %v3984_v12 = vld [vmem:[%s4632_s3 + $0x28] sm:$0xff] }
 0x601   :  { %v869_v37 = vmul.f32 %v3280_v44, %v868_v47 }
 0x603   :  { %v870_v2 = vadd.f32 %v3280_v44, %v869_v37 }
 0x604   :  { %v3282_v32 = vpop.eup %3281 }
 0x605   :  { %v882_v48 = vmul.f32 %v3282_v32, %v835_v45  ;;  %v874_v49 = vsel %vm873_vm15, %v3280_v44, %v870_v2  ;;  %vm887_vm3 = vweird.f32 %v3282_v32  ;;  %v3955_v45 = vld [vmem:[%s4630_s1] sm:$0xff] }
 0x606   :  { %v3873_v6 = vsel %vm876_vm1, %v878_v4, %v874_v49  ;;  %vm888_vm5 = vmor %vm886_vm4, %vm887_vm3 }
 0x607   :  { %v883_v7 = vsub.f32 1.0, %v882_v48  ;;  %v898_v50 = vmul.f32 2.0, %v3873_v6  ;;  %v906_v46 = vmul.f32 %v3873_v6, %v3832_v16 }
 0x609   :  { %v3032_v19 = vadd.f32 -1.0, %v898_v50  ;;  %v884_v10 = vmul.f32 %v3282_v32, %v883_v7 }
 0x60b   :  { %916 = vrot.lane.b32.xlu1 %v3032_v19, %s3500_s17  ;;  %v885_v13 = vadd.f32 %v3282_v32, %v884_v10  ;;  %v3972_v10 = vld [vmem:[%s4632_s3 + $0x38] sm:$0xff] }
 0x60d   :  { %v889_v52 = vsel %vm888_vm5, %v3282_v32, %v885_v13  ;;  %v3990_v13 = vld [vmem:[%s4632_s3 + $0x20] sm:$0xff] }
 0x60e   :  { %v3877_v53 = vsel %vm891_vm6, %v893_v51, %v889_v52  ;;  %v3996_v51 = vld [vmem:[%s4632_s3 + $0x18] sm:$0xff]  ;;  %v4002_v52 = vld [vmem:[%s4632_s3 + $0x10] sm:$0xff] }
 0x60f   :  { %v899_v54 = vmul.f32 2.0, %v3877_v53  ;;  %v907_v31 = vmul.f32 %v3877_v53, %v3826_v14 }
 0x611   :  { %v3033_v55 = vadd.f32 -1.0, %v899_v54  ;;  %v4014_v54 = vld [vmem:[%s4632_s3] sm:$0xff] }
 0x613   :  { %918 = vrot.lane.b32.xlu2 %v3033_v55, %s3500_s17 }
 0x63d   :  { %v913_v57 = vpop.permute.xlu2 %912 }
 0x63e   :  { %v924_v58 = vmul.f32 %v913_v57, %v3863_v5 }
 0x640   :  { %932 = vrot.lane.b32.xlu0 %v924_v58, %s3501_s18 }
 0x65c   :  { %v732_v38 = vpop.f32.mrf.mxu0 }
 0x65d   :  { %v915_v34 = vpop.permute.xlu0 %914  ;;  %v733_v40 = vadd.f32 %v3948_v39, %v732_v38 }
 0x65e   :  { %v925_v59 = vmul.f32 %v915_v34, %v3867_v25 }
 0x65f   :  { %v742_v41 = vmax.f32 %v733_v40, 0.0 }
 0x660   :  { %934 = vrot.lane.b32.xlu1 %v925_v59, %s3501_s18 }
 0x664   :  { %v734_v14 = vpop.f32.mrf.mxu0 }
 0x665   :  { %v735_v42 = vadd.f32 %v3948_v39, %v734_v14 }
 0x667   :  { %v743_v43 = vmax.f32 %v735_v42, 0.0 }
 0x669   :  { %v746_v44 = vpack.c.bf16 %v743_v43, %v742_v41 }
 0x66b   :  { %756 = vmatmul.bf16.vlgmr.msra.gmra.mxu2 %v746_v44 }
 0x66c   :  { %1537 = vmatpush.bf16.msra.mxu2 %v3955_v45  ;;  %v737_v17 = vpop.f32.mrf.mxu0 }
 0x66d   :  { %v919_v60 = vpop.permute.xlu2 %918  ;;  %v738_v2 = vadd.f32 %v3948_v39, %v737_v17 }
 0x66e   :  { %v927_v56 = vmul.f32 %v919_v60, %v3877_v53 }
 0x66f   :  { %v744_v4 = vmax.f32 %v738_v2, 0.0 }
 0x670   :  { %938 = vrot.lane.b32.xlu0 %v927_v56, %s3501_s18 }
 0x674   :  { %v739_v32 = vpop.f32.mrf.mxu0 }
 0x675   :  { %v740_v48 = vadd.f32 %v3948_v39, %v739_v32 }
 0x677   :  { %v745_v49 = vmax.f32 %v740_v48, 0.0 }
 0x679   :  { %v747_v7 = vpack.c.bf16 %v745_v49, %v744_v4 }
 0x67b   :  { %761 = vmatmul.bf16.gmra.mxu2 %v747_v7 }
 0x67d   :  { %v917_v61 = vpop.permute.xlu1 %916 }
 0x67e   :  { %v926_v22 = vmul.f32 %v917_v61, %v3873_v6  ;;  %v4023_v61 = vld [vmem:[%s4635_s5] ss:$0 sm:$0xff] }
 0x680   :  { %936 = vrot.lane.b32.xlu2 %v926_v22, %s3501_s18 }
 0x6b2   :  { %v933_v15 = vpop.permute.xlu0 %932 }
 0x6b3   :  { %v3919_v20 = vadd.f32 %v933_v15, %v904_v26 }
 0x6b5   :  { %3283 = vtanh.f32 %v3919_v20 }
 0x6bb   :  { %v3284_v36 = vpop.eup %3283 }
 0x6bc   :  { %956 = vrot.lane.b32.xlu1 %v3284_v36, %s3500_s17 }
 0x6d2   :  { %v935_v24 = vpop.permute.xlu1 %934 }
 0x6d3   :  { %v3929_v27 = vadd.f32 %v935_v24, %v905_v23 }
 0x6d5   :  { %3285 = vtanh.f32 %v3929_v27 }
 0x6da   :  { %v937_v30 = vpop.permute.xlu2 %936 }
 0x6db   :  { %v3286_v28 = vpop.eup %3285  ;;  %v3934_v29 = vadd.f32 %v937_v30, %v906_v46 }
 0x6dc   :  { %958 = vrot.lane.b32.xlu2 %v3286_v28, %s3500_s17 }
 0x6dd   :  { %3287 = vtanh.f32 %v3934_v29 }
 0x6e2   :  { %v939_v1 = vpop.permute.xlu0 %938 }
 0x6e3   :  { %v3288_v33 = vpop.eup %3287  ;;  %v3940_v35 = vadd.f32 %v939_v1, %v907_v31 }
 0x6e4   :  { %960 = vrot.lane.b32.xlu0 %v3288_v33, %s3500_s17 }
 0x6e5   :  { %3289 = vtanh.f32 %v3940_v35 }
 0x6eb   :  { %v3290_v16 = vpop.eup %3289 }
 0x6ec   :  { %962 = vrot.lane.b32.xlu1 %v3290_v16, %s3500_s17 }
 0x6ee   :  { %v757_v34 = vpop.f32.mrf.mxu2 }
 0x6ef   :  { %v758_v22 = vadd.f32 %v4023_v61, %v757_v34 }
 0x6f6   :  { %v759_v59 = vpop.f32.mrf.mxu2 }
 0x6f7   :  { %v760_v40 = vadd.f32 %v4023_v61, %v759_v59 }
 0x6fe   :  { %v762_v60 = vpop.f32.mrf.mxu2 }
 0x706   :  { %v764_v56 = vpop.f32.mrf.mxu2 }
 0x72e   :  { %v957_v18 = vpop.permute.xlu1 %956 }
 0x72f   :  { %v968_v47 = vmul.f32 %v957_v18, %v3863_v5 }
 0x731   :  { %1040 = vrot.lane.b32.xlu2 %v968_v47, %s3501_s18 }
 0x736   :  { %v959_v0 = vpop.permute.xlu2 %958 }
 0x737   :  { %v969_v37 = vmul.f32 %v959_v0, %v3867_v25 }
 0x739   :  { %1042 = vrot.lane.b32.xlu0 %v969_v37, %s3501_s18 }
 0x756   :  { %v961_v50 = vpop.permute.xlu0 %960 }
 0x757   :  { %v970_v5 = vmul.f32 %v961_v50, %v3873_v6  ;;  %v3978_v6 = vld [vmem:[%s4632_s3 + $0x30] sm:$0xff] }
 0x759   :  { %1044 = vrot.lane.b32.xlu1 %v970_v5, %s3501_s18  ;;  %v763_v5 = vadd.f32 %v4023_v61, %v762_v60 }
 0x75e   :  { %v963_v9 = vpop.permute.xlu1 %962 }
 0x75f   :  { %v971_v25 = vmul.f32 %v963_v9, %v3877_v53  ;;  %v4008_v53 = vld [vmem:[%s4632_s3 + $0x8] sm:$0xff] }
 0x761   :  { %1046 = vrot.lane.b32.xlu2 %v971_v25, %s3501_s18 }
 0x78b   :  { %v1041_v19 = vpop.permute.xlu2 %1040 }
 0x78c   :  { %3044 = vmatmul.msk.f32.vlgmr.msrb.gmra.mxu2 %vm245_vm2, %v1041_v19 }
 0x78d   :  { %1824 = vmatpush.bf16.msrb.mxu2 %v3972_v10 }
 0x791   :  { %1825 = vmatpush.bf16.msrb.mxu2 %v3978_v6 }
 0x795   :  { %1826 = vmatpush.bf16.msrb.mxu2 %v3984_v12 }
 0x799   :  { %1827 = vmatpush.bf16.msrb.mxu2 %v3990_v13 }
 0x79d   :  { %1828 = vmatpush.bf16.msrb.mxu2 %v3996_v51 }
 0x7a1   :  { %1829 = vmatpush.bf16.msrb.mxu2 %v4002_v52 }
 0x7a5   :  { %1830 = vmatpush.bf16.msrb.mxu2 %v4008_v53 }
 0x7a9   :  { %1831 = vmatpush.bf16.msrb.mxu2 %v4014_v54 }
 0x7ab   :  { %v1043_v55 = vpop.permute.xlu0 %1042 }
 0x7ac   :  { %3045 = vmatmul.msk.f32.gmra.mxu2 %vm245_vm2, %v1043_v55 }
 0x7bb   :  { %v1047_v58 = vpop.permute.xlu2 %1046 }
 0x7cb   :  { %v1045_v57 = vpop.permute.xlu1 %1044 }
 0x7cc   :  { %3046 = vmatmul.msk.f32.gmra.mxu2 %vm245_vm2, %v1045_v57 }
 0x7d4   :  { %3047 = vmatmul.msk.f32.gmra.mxu2 %vm245_vm2, %v1047_v58  ;;  %v765_v58 = vadd.f32 %v4023_v61, %v764_v56 }
 0x80f   :  { %v1073_v62 = vpop.f32.mrf.mxu2 }
 0x810   :  { %v1085_v26 = vadd.f32 %v1073_v62, %v758_v22 }
 0x812   :  { %v3048_v15 = vmul.f32 -1.442695, %v1085_v26 }
 0x814   :  { %3291 = vpow2.f32 %v3048_v15 }
 0x81a   :  { %v3292_v36 = vpop.eup %3291 }
 0x81b   :  { %v1101_v21 = vadd.f32 1.0, %v3292_v36 }
 0x81d   :  { %3293 = vrcp.f32 %v1101_v21  ;;  %v1116_v30 = vand.u32 2147483648, %v1101_v21  ;;  %v1114_v31 = vand.u32 2147483647, %v1101_v21  ;;  %vm1110_vm8 = vweird.f32 %v1101_v21 }
 0x81f   :  { %v1117_v33 = vor.u32 1.1754944e-38, %v1116_v30  ;;  %vm1115_vm10 = vcmp.eq.f32.partialorder %v1114_v31, 8.507059e+37 }
 0x823   :  { %v3294_v23 = vpop.eup %3293 }
 0x824   :  { %v1106_v24 = vmul.f32 %v3294_v23, %v1101_v21  ;;  %vm1111_vm7 = vweird.f32 %v3294_v23 }
 0x825   :  { %vm1112_vm9 = vmor %vm1110_vm8, %vm1111_vm7 }
 0x826   :  { %v1107_v46 = vsub.f32 1.0, %v1106_v24 }
 0x828   :  { %v1108_v28 = vmul.f32 %v3294_v23, %v1107_v46 }
 0x82a   :  { %v1109_v1 = vadd.f32 %v3294_v23, %v1108_v28 }
 0x82c   :  { %v1113_v16 = vsel %vm1112_vm9, %v3294_v23, %v1109_v1 }
 0x82d   :  { %v4026_v38 = vsel %vm1115_vm10, %v1117_v33, %v1113_v16 }
 0x82e   :  { %v1165_v14 = vmul.f32 2.0, %v4026_v38 }
 0x82f   :  { %v1076_v41 = vpop.f32.mrf.mxu2 }
 0x830   :  { %v1086_v42 = vadd.f32 %v1076_v41, %v760_v40  ;;  %v3052_v43 = vadd.f32 -1.0, %v1165_v14 }
 0x832   :  { %v3049_v44 = vmul.f32 -1.442695, %v1086_v42  ;;  %1181 = vrot.lane.b32.xlu0 %v3052_v43, %s3500_s17 }
 0x834   :  { %3295 = vpow2.f32 %v3049_v44 }
 0x83a   :  { %v3296_v18 = vpop.eup %3295 }
 0x83b   :  { %v1102_v47 = vadd.f32 1.0, %v3296_v18 }
 0x83d   :  { %3297 = vrcp.f32 %v1102_v47  ;;  %v1131_v2 = vand.u32 2147483648, %v1102_v47  ;;  %v1129_v4 = vand.u32 2147483647, %v1102_v47  ;;  %vm1125_vm12 = vweird.f32 %v1102_v47 }
 0x83f   :  { %v1132_v49 = vor.u32 1.1754944e-38, %v1131_v2  ;;  %vm1130_vm14 = vcmp.eq.f32.partialorder %v1129_v4, 8.507059e+37 }
 0x843   :  { %v3298_v0 = vpop.eup %3297 }
 0x844   :  { %v1121_v37 = vmul.f32 %v3298_v0, %v1102_v47  ;;  %vm1126_vm11 = vweird.f32 %v3298_v0 }
 0x845   :  { %vm1127_vm13 = vmor %vm1125_vm12, %vm1126_vm11 }
 0x846   :  { %v1122_v17 = vsub.f32 1.0, %v1121_v37 }
 0x848   :  { %v1123_v32 = vmul.f32 %v3298_v0, %v1122_v17 }
 0x84a   :  { %v1124_v48 = vadd.f32 %v3298_v0, %v1123_v32 }
 0x84c   :  { %v1128_v7 = vsel %vm1127_vm13, %v3298_v0, %v1124_v48 }
 0x84d   :  { %v4031_v50 = vsel %vm1130_vm14, %v1132_v49, %v1128_v7 }
 0x84e   :  { %v1166_v9 = vmul.f32 2.0, %v4031_v50 }
 0x84f   :  { %v1079_v25 = vpop.f32.mrf.mxu2 }
 0x850   :  { %v1087_v19 = vadd.f32 %v1079_v25, %v763_v5  ;;  %v3053_v55 = vadd.f32 -1.0, %v1166_v9 }
 0x852   :  { %v3050_v57 = vmul.f32 -1.442695, %v1087_v19  ;;  %1183 = vrot.lane.b32.xlu1 %v3053_v55, %s3500_s17  ;;  %v3199_v19 = vld [vmem:[%s4631_s0 + $0x40] sm:$0xff]  ;;  %v1173_v55 = vmul.f32 %v4026_v38, %v3919_v20 }
 0x853   :  { %3042 = vmatmul.msk.bf16.vlgmr.msra.gmra.mxu3 %vm58_vm0, %v3199_v19 }
 0x854   :  { %3299 = vpow2.f32 %v3050_v57  ;;  %1606 = vmatpush.msra.mxu3 %v3896_v63 }
 0x856   :  { %1607 = vmatpush.msra.mxu3 %v3902_v3 }
 0x857   :  { %v1082_v34 = vpop.f32.mrf.mxu2 }
 0x858   :  { %v1088_v59 = vadd.f32 %v1082_v34, %v765_v58  ;;  %1608 = vmatpush.msra.mxu3 %v3908_v11  ;;  %v3200_v58 = vld [vmem:[%s4631_s0 + $0x48] sm:$0xff] }
 0x85a   :  { %v3300_v22 = vpop.eup %3299  ;;  %v3051_v62 = vmul.f32 -1.442695, %v1088_v59  ;;  %1609 = vmatpush.msra.mxu3 %v3914_v8  ;;  %v1174_v59 = vmul.f32 %v4031_v50, %v3929_v27 }
 0x85b   :  { %v1103_v26 = vadd.f32 1.0, %v3300_v22 }
 0x85c   :  { %3301 = vpow2.f32 %v3051_v62 }
 0x85d   :  { %3303 = vrcp.f32 %v1103_v26  ;;  %v1146_v24 = vand.u32 2147483648, %v1103_v26  ;;  %v1144_v30 = vand.u32 2147483647, %v1103_v26  ;;  %vm1140_vm1 = vweird.f32 %v1103_v26 }
 0x85f   :  { %v1147_v31 = vor.u32 1.1754944e-38, %v1146_v24  ;;  %vm1145_vm4 = vcmp.eq.f32.partialorder %v1144_v30, 8.507059e+37 }
 0x862   :  { %v3302_v15 = vpop.eup %3301 }
 0x863   :  { %v3304_v60 = vpop.eup %3303  ;;  %v1104_v36 = vadd.f32 1.0, %v3302_v15  ;;  %3043 = vmatmul.msk.bf16.gmra.mxu3 %vm58_vm0, %v3200_v58 }
 0x864   :  { %v1136_v21 = vmul.f32 %v3304_v60, %v1103_v26  ;;  %vm1141_vm15 = vweird.f32 %v3304_v60 }
 0x865   :  { %3305 = vrcp.f32 %v1104_v36  ;;  %vm1142_vm3 = vmor %vm1140_vm1, %vm1141_vm15  ;;  %v1161_v41 = vand.u32 2147483648, %v1104_v36  ;;  %v1159_v44 = vand.u32 2147483647, %v1104_v36  ;;  %vm1155_vm6 = vweird.f32 %v1104_v36 }
 0x866   :  { %v1137_v23 = vsub.f32 1.0, %v1136_v21 }
 0x867   :  { %v1162_v47 = vor.u32 1.1754944e-38, %v1161_v41  ;;  %vm1160_vm8 = vcmp.eq.f32.partialorder %v1159_v44, 8.507059e+37 }
 0x868   :  { %v1138_v46 = vmul.f32 %v3304_v60, %v1137_v23 }
 0x86a   :  { %v1139_v28 = vadd.f32 %v3304_v60, %v1138_v46 }
 0x86b   :  { %v3306_v56 = vpop.eup %3305 }
 0x86c   :  { %v1151_v1 = vmul.f32 %v3306_v56, %v1104_v36  ;;  %v1143_v33 = vsel %vm1142_vm3, %v3304_v60, %v1139_v28  ;;  %vm1156_vm5 = vweird.f32 %v3306_v56 }
 0x86d   :  { %v4037_v16 = vsel %vm1145_vm4, %v1147_v31, %v1143_v33  ;;  %vm1157_vm7 = vmor %vm1155_vm6, %vm1156_vm5 }
 0x86e   :  { %v1152_v40 = vsub.f32 1.0, %v1151_v1  ;;  %v1167_v14 = vmul.f32 2.0, %v4037_v16  ;;  %v1175_v15 = vmul.f32 %v4037_v16, %v3934_v29 }
 0x870   :  { %v3054_v42 = vadd.f32 -1.0, %v1167_v14  ;;  %v1153_v43 = vmul.f32 %v3306_v56, %v1152_v40 }
 0x872   :  { %1185 = vrot.lane.b32.xlu2 %v3054_v42, %s3500_s17  ;;  %v1154_v18 = vadd.f32 %v3306_v56, %v1153_v43 }
 0x874   :  { %v1158_v0 = vsel %vm1157_vm7, %v3306_v56, %v1154_v18 }
 0x875   :  { %v4041_v37 = vsel %vm1160_vm8, %v1162_v47, %v1158_v0 }
 0x876   :  { %v1168_v17 = vmul.f32 2.0, %v4041_v37  ;;  %v1176_v21 = vmul.f32 %v4041_v37, %v3940_v35 }
 0x878   :  { %v3055_v2 = vadd.f32 -1.0, %v1168_v17 }
 0x87a   :  { %1187 = vrot.lane.b32.xlu0 %v3055_v2, %s3500_s17 }
 0x8a4   :  { %v1182_v32 = vpop.permute.xlu0 %1181 }
 0x8a5   :  { %v1193_v4 = vmul.f32 %v1182_v32, %v4026_v38 }
 0x8a7   :  { %1201 = vrot.lane.b32.xlu1 %v1193_v4, %s3501_s18 }
 0x8c4   :  { %v1184_v48 = vpop.permute.xlu1 %1183 }
 0x8c5   :  { %v1194_v49 = vmul.f32 %v1184_v48, %v4031_v50 }
 0x8c7   :  { %1203 = vrot.lane.b32.xlu2 %v1194_v49, %s3501_s18 }
 0x8cc   :  { %v1186_v7 = vpop.permute.xlu2 %1185 }
 0x8cd   :  { %v1195_v5 = vmul.f32 %v1186_v7, %v4037_v16 }
 0x8cf   :  { %1205 = vrot.lane.b32.xlu0 %v1195_v5, %s3501_s18 }
 0x8d6   :  { %v1001_v28 = vpop.f32.mrf.mxu3 }
 0x8d7   :  { %v1002_v56 = vadd.f32 %v3948_v39, %v1001_v28 }
 0x8d9   :  { %v1011_v1 = vmax.f32 %v1002_v56, 0.0 }
 0x8de   :  { %v1003_v31 = vpop.f32.mrf.mxu3 }
 0x8df   :  { %v1004_v35 = vadd.f32 %v3948_v39, %v1003_v31 }
 0x8e1   :  { %v1012_v33 = vmax.f32 %v1004_v35, 0.0 }
 0x8e3   :  { %v1015_v14 = vpack.c.bf16 %v1012_v33, %v1011_v1 }
 0x8e5   :  { %1025 = vmatmul.bf16.vlgmr.msrb.gmra.mxu0 %v1015_v14 }
 0x8e6   :  { %v1006_v42 = vpop.f32.mrf.mxu3  ;;  %1806 = vmatpush.bf16.msrb.mxu0 %v3955_v45 }
 0x8ec   :  { %v1188_v9 = vpop.permute.xlu0 %1187 }
 0x8ed   :  { %v1196_v25 = vmul.f32 %v1188_v9, %v4041_v37 }
 0x8ee   :  { %v1008_v43 = vpop.f32.mrf.mxu3 }
 0x8ef   :  { %1207 = vrot.lane.b32.xlu1 %v1196_v25, %s3501_s18  ;;  %v1009_v18 = vadd.f32 %v3948_v39, %v1008_v43 }
 0x8f1   :  { %v1014_v47 = vmax.f32 %v1009_v18, 0.0 }
 0x919   :  { %v1202_v57 = vpop.permute.xlu1 %1201 }
 0x91a   :  { %v4066_v34 = vadd.f32 %v1202_v57, %v1173_v55 }
 0x91c   :  { %3307 = vtanh.f32 %v4066_v34 }
 0x921   :  { %v1204_v22 = vpop.permute.xlu2 %1203 }
 0x922   :  { %v3308_v62 = vpop.eup %3307  ;;  %v4072_v26 = vadd.f32 %v1204_v22, %v1174_v59 }
 0x923   :  { %1225 = vrot.lane.b32.xlu2 %v3308_v62, %s3500_s17 }
 0x924   :  { %3309 = vtanh.f32 %v4072_v26 }
 0x92a   :  { %v3310_v20 = vpop.eup %3309 }
 0x92b   :  { %1227 = vrot.lane.b32.xlu0 %v3310_v20, %s3500_s17 }
 0x941   :  { %v1206_v60 = vpop.permute.xlu0 %1205 }
 0x942   :  { %v4079_v36 = vadd.f32 %v1206_v60, %v1175_v15 }
 0x944   :  { %3311 = vtanh.f32 %v4079_v36 }
 0x94a   :  { %v3312_v27 = vpop.eup %3311 }
 0x94b   :  { %1229 = vrot.lane.b32.xlu1 %v3312_v27, %s3500_s17 }
 0x961   :  { %v1208_v23 = vpop.permute.xlu1 %1207 }
 0x962   :  { %v4085_v24 = vadd.f32 %v1208_v23, %v1176_v21  ;;  %v1026_v49 = vpop.f32.mrf.mxu0 }
 0x963   :  { %v1027_v25 = vadd.f32 %v4023_v61, %v1026_v49 }
 0x964   :  { %3313 = vtanh.f32 %v4085_v24 }
 0x96a   :  { %v3314_v46 = vpop.eup %3313  ;;  %v1028_v7 = vpop.f32.mrf.mxu0 }
 0x96b   :  { %1231 = vrot.lane.b32.xlu2 %v3314_v46, %s3500_s17 }
 0x97d   :  { %v1226_v29 = vpop.permute.xlu2 %1225 }
 0x97e   :  { %v1237_v30 = vmul.f32 %v1226_v29, %v4026_v38  ;;  %v1007_v38 = vadd.f32 %v3948_v39, %v1006_v42 }
 0x980   :  { %1309 = vrot.lane.b32.xlu0 %v1237_v30, %s3501_s18  ;;  %v1013_v44 = vmax.f32 %v1007_v38, 0.0  ;;  %v1029_v30 = vadd.f32 %v4023_v61, %v1028_v7 }
 0x982   :  { %v1016_v0 = vpack.c.bf16 %v1014_v47, %v1013_v44 }
 0x984   :  { %1030 = vmatmul.bf16.gmra.mxu0 %v1016_v0 }
 0x99d   :  { %v1228_v40 = vpop.permute.xlu0 %1227 }
 0x99e   :  { %v1238_v41 = vmul.f32 %v1228_v40, %v4031_v50 }
 0x9a0   :  { %1311 = vrot.lane.b32.xlu1 %v1238_v41, %s3501_s18 }
 0x9bd   :  { %v1230_v17 = vpop.permute.xlu1 %1229 }
 0x9be   :  { %v1239_v2 = vmul.f32 %v1230_v17, %v4037_v16 }
 0x9c0   :  { %1313 = vrot.lane.b32.xlu2 %v1239_v2, %s3501_s18 }
 0x9c5   :  { %v1232_v50 = vpop.permute.xlu2 %1231 }
 0x9c6   :  { %v1240_v32 = vmul.f32 %v1232_v50, %v4041_v37 }
 0x9c8   :  { %1315 = vrot.lane.b32.xlu0 %v1240_v32, %s3501_s18 }
 0x9f2   :  { %v1310_v4 = vpop.permute.xlu0 %1309 }
 0x9f3   :  { %3066 = vmatmul.msk.f32.vlgmr.msra.gmra.mxu0 %vm245_vm2, %v1310_v4 }
 0x9f4   :  { %2093 = vmatpush.bf16.msra.mxu0 %v3972_v10 }
 0x9f8   :  { %2094 = vmatpush.bf16.msra.mxu0 %v3978_v6 }
 0x9fc   :  { %2095 = vmatpush.bf16.msra.mxu0 %v3984_v12 }
 0xa00   :  { %2096 = vmatpush.bf16.msra.mxu0 %v3990_v13 }
 0xa01   :  { %v1031_v5 = vpop.f32.mrf.mxu0 }
 0xa02   :  { %v1032_v33 = vadd.f32 %v4023_v61, %v1031_v5 }
 0xa04   :  { %2097 = vmatpush.bf16.msra.mxu0 %v3996_v51 }
 0xa08   :  { %2098 = vmatpush.bf16.msra.mxu0 %v4002_v52 }
 0xa09   :  { %v4114_v9 = vpop.f32.mrf.mxu0 }
 0xa0c   :  { %2099 = vmatpush.bf16.msra.mxu0 %v4008_v53 }
 0xa10   :  { %2100 = vmatpush.bf16.msra.mxu0 %v4014_v54 }
 0xa12   :  { %v1312_v16 = vpop.permute.xlu1 %1311 }
 0xa13   :  { %3067 = vmatmul.msk.f32.gmra.mxu0 %vm245_vm2, %v1312_v16 }
 0xa1a   :  { %v1314_v37 = vpop.permute.xlu2 %1313 }
 0xa1b   :  { %3068 = vmatmul.msk.f32.gmra.mxu0 %vm245_vm2, %v1314_v37 }
 0xa3a   :  { %v1316_v48 = vpop.permute.xlu0 %1315 }
 0xa3b   :  { %3069 = vmatmul.msk.f32.gmra.mxu0 %vm245_vm2, %v1316_v48 }
 0xa70   :  { %v1342_v19 = vpop.f32.mrf.mxu0 }
 0xa71   :  { %v1354_v55 = vadd.f32 %v1342_v19, %v1027_v25 }
 0xa73   :  { %v3070_v57 = vmul.f32 -1.442695, %v1354_v55 }
 0xa75   :  { %3315 = vpow2.f32 %v3070_v57 }
 0xa7b   :  { %v3316_v58 = vpop.eup %3315 }
 0xa7c   :  { %v1370_v59 = vadd.f32 1.0, %v3316_v58 }
 0xa7e   :  { %3317 = vrcp.f32 %v1370_v59  ;;  %v1385_v15 = vand.u32 2147483648, %v1370_v59  ;;  %v1383_v27 = vand.u32 2147483647, %v1370_v59  ;;  %vm1379_vm10 = vweird.f32 %v1370_v59 }
 0xa80   :  { %v1386_v23 = vor.u32 1.1754944e-38, %v1385_v15  ;;  %vm1384_vm12 = vcmp.eq.f32.partialorder %v1383_v27, 8.507059e+37 }
 0xa84   :  { %v3318_v22 = vpop.eup %3317 }
 0xa85   :  { %v1375_v62 = vmul.f32 %v3318_v22, %v1370_v59  ;;  %vm1380_vm9 = vweird.f32 %v3318_v22 }
 0xa86   :  { %vm1381_vm11 = vmor %vm1379_vm10, %vm1380_vm9 }
 0xa87   :  { %v1376_v20 = vsub.f32 1.0, %v1375_v62 }
 0xa89   :  { %v1377_v60 = vmul.f32 %v3318_v22, %v1376_v20  ;;  %v1034_v20 = vadd.f32 %v4023_v61, %v4114_v9 }
 0xa8b   :  { %v1378_v21 = vadd.f32 %v3318_v22, %v1377_v60 }
 0xa8d   :  { %v1382_v46 = vsel %vm1381_vm11, %v3318_v22, %v1378_v21 }
 0xa8e   :  { %v4117_v29 = vsel %vm1384_vm12, %v1386_v23, %v1382_v46 }
 0xa8f   :  { %v1434_v28 = vmul.f32 2.0, %v4117_v29 }
 0xa90   :  { %v1345_v56 = vpop.f32.mrf.mxu0 }
 0xa91   :  { %v1355_v31 = vadd.f32 %v1345_v56, %v1029_v30  ;;  %v3074_v1 = vadd.f32 -1.0, %v1434_v28 }
 0xa93   :  { %v3071_v35 = vmul.f32 -1.442695, %v1355_v31  ;;  %1450 = vrot.lane.b32.xlu1 %v3074_v1, %s3500_s17 }
 0xa95   :  { %3319 = vpow2.f32 %v3071_v35 }
 0xa98   :  { %v1348_v40 = vpop.f32.mrf.mxu0 }
 0xa99   :  { %v1356_v14 = vadd.f32 %v1348_v40, %v1032_v33 }
 0xa9b   :  { %v3320_v41 = vpop.eup %3319  ;;  %v3072_v42 = vmul.f32 -1.442695, %v1356_v14 }
 0xa9c   :  { %v1371_v38 = vadd.f32 1.0, %v3320_v41 }
 0xa9d   :  { %3321 = vpow2.f32 %v3072_v42 }
 0xa9e   :  { %3323 = vrcp.f32 %v1371_v38  ;;  %v1400_v17 = vand.u32 2147483648, %v1371_v38  ;;  %v1398_v50 = vand.u32 2147483647, %v1371_v38  ;;  %vm1394_vm14 = vweird.f32 %v1371_v38 }
 0xaa0   :  { %v1401_v16 = vor.u32 1.1754944e-38, %v1400_v17  ;;  %vm1399_vm1 = vcmp.eq.f32.partialorder %v1398_v50, 8.507059e+37 }
 0xaa3   :  { %v3322_v43 = vpop.eup %3321 }
 0xaa4   :  { %v3324_v44 = vpop.eup %3323  ;;  %v1372_v18 = vadd.f32 1.0, %v3322_v43 }
 0xaa5   :  { %v1390_v47 = vmul.f32 %v3324_v44, %v1371_v38  ;;  %vm1395_vm13 = vweird.f32 %v3324_v44 }
 0xaa6   :  { %3325 = vrcp.f32 %v1372_v18  ;;  %vm1396_vm15 = vmor %vm1394_vm14, %vm1395_vm13  ;;  %v1415_v25 = vand.u32 2147483648, %v1372_v18  ;;  %v1413_v57 = vand.u32 2147483647, %v1372_v18  ;;  %vm1409_vm4 = vweird.f32 %v1372_v18 }
 0xaa7   :  { %v1391_v0 = vsub.f32 1.0, %v1390_v47 }
 0xaa8   :  { %v1416_v59 = vor.u32 1.1754944e-38, %v1415_v25  ;;  %vm1414_vm6 = vcmp.eq.f32.partialorder %v1413_v57, 8.507059e+37  ;;  %v3202_v25 = vld [vmem:[%s4631_s0 + $0x58] sm:$0xff] }
 0xaa9   :  { %v1392_v2 = vmul.f32 %v3324_v44, %v1391_v0 }
 0xaab   :  { %v1393_v32 = vadd.f32 %v3324_v44, %v1392_v2 }
 0xaac   :  { %v3326_v4 = vpop.eup %3325 }
 0xaad   :  { %v1405_v37 = vmul.f32 %v3326_v4, %v1372_v18  ;;  %v1397_v48 = vsel %vm1396_vm15, %v3324_v44, %v1393_v32  ;;  %vm1410_vm3 = vweird.f32 %v3326_v4  ;;  %v1442_v32 = vmul.f32 %v4117_v29, %v4066_v34 }
 0xaae   :  { %v4123_v49 = vsel %vm1399_vm1, %v1401_v16, %v1397_v48  ;;  %vm1411_vm5 = vmor %vm1409_vm4, %vm1410_vm3  ;;  %v3201_v48 = vld [vmem:[%s4631_s0 + $0x50] sm:$0xff] }
 0xaaf   :  { %v1406_v7 = vsub.f32 1.0, %v1405_v37  ;;  %v1435_v5 = vmul.f32 2.0, %v4123_v49  ;;  %3064 = vmatmul.msk.bf16.vlgmr.msrb.gmra.mxu1 %vm58_vm0, %v3201_v48  ;;  %v1443_v34 = vmul.f32 %v4123_v49, %v4072_v26 }
 0xab0   :  { %1875 = vmatpush.msrb.mxu1 %v3896_v63 }
 0xab1   :  { %v3075_v19 = vadd.f32 -1.0, %v1435_v5  ;;  %v1407_v55 = vmul.f32 %v3326_v4, %v1406_v7 }
 0xab2   :  { %1876 = vmatpush.msrb.mxu1 %v3902_v3 }
 0xab3   :  { %1452 = vrot.lane.b32.xlu2 %v3075_v19, %s3500_s17  ;;  %v1408_v58 = vadd.f32 %v3326_v4, %v1407_v55 }
 0xab4   :  { %1877 = vmatpush.msrb.mxu1 %v3908_v11 }
 0xab5   :  { %v1412_v22 = vsel %vm1411_vm5, %v3326_v4, %v1408_v58 }
 0xab6   :  { %v4127_v62 = vsel %vm1414_vm6, %v1416_v59, %v1412_v22  ;;  %1878 = vmatpush.msrb.mxu1 %v3914_v8 }
 0xab7   :  { %v1436_v15 = vmul.f32 2.0, %v4127_v62  ;;  %v1444_v3 = vmul.f32 %v4127_v62, %v4079_v36 }
 0xab8   :  { %v1351_v60 = vpop.f32.mrf.mxu0 }
 0xab9   :  { %v1357_v27 = vadd.f32 %v1351_v60, %v1034_v20  ;;  %v3076_v21 = vadd.f32 -1.0, %v1436_v15 }
 0xabb   :  { %v3073_v23 = vmul.f32 -1.442695, %v1357_v27  ;;  %1454 = vrot.lane.b32.xlu0 %v3076_v21, %s3500_s17 }
 0xabd   :  { %3327 = vpow2.f32 %v3073_v23 }
 0xabf   :  { %3065 = vmatmul.msk.bf16.gmra.mxu1 %vm58_vm0, %v3202_v25 }
 0xac3   :  { %v3328_v46 = vpop.eup %3327 }
 0xac4   :  { %v1373_v30 = vadd.f32 1.0, %v3328_v46 }
 0xac6   :  { %3329 = vrcp.f32 %v1373_v30  ;;  %v1430_v1 = vand.u32 2147483648, %v1373_v30  ;;  %v1428_v33 = vand.u32 2147483647, %v1373_v30  ;;  %vm1424_vm8 = vweird.f32 %v1373_v30 }
 0xac8   :  { %v1431_v40 = vor.u32 1.1754944e-38, %v1430_v1  ;;  %vm1429_vm10 = vcmp.eq.f32.partialorder %v1428_v33, 8.507059e+37 }
 0xacc   :  { %v3330_v28 = vpop.eup %3329 }
 0xacd   :  { %v1420_v56 = vmul.f32 %v3330_v28, %v1373_v30  ;;  %vm1425_vm7 = vweird.f32 %v3330_v28 }
 0xace   :  { %vm1426_vm9 = vmor %vm1424_vm8, %vm1425_vm7 }
 0xacf   :  { %v1421_v31 = vsub.f32 1.0, %v1420_v56 }
 0xad1   :  { %v1422_v35 = vmul.f32 %v3330_v28, %v1421_v31 }
 0xad3   :  { %v1423_v9 = vadd.f32 %v3330_v28, %v1422_v35 }
 0xad5   :  { %v1427_v14 = vsel %vm1426_vm9, %v3330_v28, %v1423_v9 }
 0xad6   :  { %v4133_v41 = vsel %vm1429_vm10, %v1431_v40, %v1427_v14 }
 0xad7   :  { %v1437_v42 = vmul.f32 2.0, %v4133_v41  ;;  %v1445_v26 = vmul.f32 %v4133_v41, %v4085_v24 }
 0xad9   :  { %v3077_v38 = vadd.f32 -1.0, %v1437_v42 }
 0xadb   :  { %1456 = vrot.lane.b32.xlu1 %v3077_v38, %s3500_s17 }
 0xb05   :  { %v1451_v43 = vpop.permute.xlu1 %1450 }
 0xb06   :  { %v1462_v44 = vmul.f32 %v1451_v43, %v4117_v29 }
 0xb08   :  { %1470 = vrot.lane.b32.xlu2 %v1462_v44, %s3501_s18 }
 0xb0d   :  { %v1453_v18 = vpop.permute.xlu2 %1452 }
 0xb0e   :  { %v1463_v47 = vmul.f32 %v1453_v18, %v4123_v49 }
 0xb10   :  { %1472 = vrot.lane.b32.xlu0 %v1463_v47, %s3501_s18 }
 0xb2c   :  { %v1270_v22 = vpop.f32.mrf.mxu1 }
 0xb2d   :  { %v1455_v0 = vpop.permute.xlu0 %1454  ;;  %v1271_v20 = vadd.f32 %v3948_v39, %v1270_v22 }
 0xb2e   :  { %v1464_v17 = vmul.f32 %v1455_v0, %v4127_v62 }
 0xb2f   :  { %v1280_v15 = vmax.f32 %v1271_v20, 0.0 }
 0xb30   :  { %1474 = vrot.lane.b32.xlu1 %v1464_v17, %s3501_s18 }
 0xb34   :  { %v1272_v24 = vpop.f32.mrf.mxu1 }
 0xb35   :  { %v1273_v60 = vadd.f32 %v3948_v39, %v1272_v24 }
 0xb37   :  { %v1281_v27 = vmax.f32 %v1273_v60, 0.0 }
 0xb39   :  { %v1284_v21 = vpack.c.bf16 %v1281_v27, %v1280_v15 }
 0xb3b   :  { %1294 = vmatmul.bf16.vlgmr.msrb.gmra.mxu3 %v1284_v21 }
 0xb3c   :  { %2075 = vmatpush.bf16.msrb.mxu3 %v3955_v45 }
 0xb4d   :  { %v1457_v2 = vpop.permute.xlu1 %1456 }
 0xb4e   :  { %v1465_v50 = vmul.f32 %v1457_v2, %v4133_v41 }
 0xb50   :  { %1476 = vrot.lane.b32.xlu2 %v1465_v50, %s3501_s18 }
 0xb62   :  { %v1471_v4 = vpop.permute.xlu2 %1470 }
 0xb63   :  { %v4147_v16 = vadd.f32 %v1471_v4, %v1442_v32 }
 0xb65   :  { %3331 = vtanh.f32 %v4147_v16 }
 0xb6b   :  { %v3332_v37 = vpop.eup %3331 }
 0xb6c   :  { %1494 = vrot.lane.b32.xlu0 %v3332_v37, %s3500_s17 }
 0xb82   :  { %v1473_v7 = vpop.permute.xlu0 %1472 }
 0xb83   :  { %v4161_v5 = vadd.f32 %v1473_v7, %v1443_v34 }
 0xb85   :  { %3333 = vtanh.f32 %v4161_v5 }
 0xb8b   :  { %v3334_v63 = vpop.eup %3333 }
 0xb8c   :  { %1496 = vrot.lane.b32.xlu1 %v3334_v63, %s3500_s17 }
 0xba2   :  { %v1475_v11 = vpop.permute.xlu1 %1474 }
 0xba3   :  { %v4171_v8 = vadd.f32 %v1475_v11, %v1444_v3 }
 0xba5   :  { %3335 = vtanh.f32 %v4171_v8 }
 0xbaa   :  { %v1477_v19 = vpop.permute.xlu2 %1476 }
 0xbab   :  { %v3336_v55 = vpop.eup %3335  ;;  %v4176_v57 = vadd.f32 %v1477_v19, %v1445_v26 }
 0xbac   :  { %1498 = vrot.lane.b32.xlu2 %v3336_v55, %s3500_s17 }
 0xbad   :  { %3337 = vtanh.f32 %v4176_v57 }
 0xbb3   :  { %v3338_v58 = vpop.eup %3337 }
 0xbb4   :  { %1500 = vrot.lane.b32.xlu0 %v3338_v58, %s3500_s17 }
 0xbde   :  { %v1495_v36 = vpop.permute.xlu0 %1494 }
 0xbdf   :  { %v1506_v59 = vmul.f32 %v1495_v36, %v4117_v29  ;;  %v1275_v29 = vpop.f32.mrf.mxu1 }
 0xbe0   :  { %v1276_v56 = vadd.f32 %v3948_v39, %v1275_v29 }
 0xbe1   :  { %1578 = vrot.lane.b32.xlu1 %v1506_v59, %s3501_s18 }
 0xbe2   :  { %v1282_v1 = vmax.f32 %v1276_v56, 0.0 }
 0xbe7   :  { %v1277_v31 = vpop.f32.mrf.mxu1 }
 0xbe8   :  { %v1278_v35 = vadd.f32 %v3948_v39, %v1277_v31 }
 0xbea   :  { %v1283_v33 = vmax.f32 %v1278_v35, 0.0 }
 0xbec   :  { %v1285_v9 = vpack.c.bf16 %v1283_v33, %v1282_v1 }
 0xbee   :  { %1299 = vmatmul.bf16.gmra.mxu3 %v1285_v9 }
 0xbfe   :  { %v1497_v23 = vpop.permute.xlu1 %1496 }
 0xbff   :  { %v1507_v46 = vmul.f32 %v1497_v23, %v4123_v49 }
 0xc01   :  { %1580 = vrot.lane.b32.xlu2 %v1507_v46, %s3501_s18 }
 0xc06   :  { %v1499_v30 = vpop.permute.xlu2 %1498 }
 0xc07   :  { %v1508_v28 = vmul.f32 %v1499_v30, %v4127_v62 }
 0xc09   :  { %1582 = vrot.lane.b32.xlu0 %v1508_v28, %s3501_s18 }
 0xc26   :  { %v1501_v45 = vpop.permute.xlu0 %1500 }
 0xc27   :  { %v1509_v49 = vmul.f32 %v1501_v45, %v4133_v41 }
 0xc29   :  { %1584 = vrot.lane.b32.xlu1 %v1509_v49, %s3501_s18 }
 0xc53   :  { %v1579_v40 = vpop.permute.xlu1 %1578 }
 0xc54   :  { %3088 = vmatmul.msk.f32.vlgmr.msra.gmra.mxu3 %vm245_vm2, %v1579_v40 }
 0xc55   :  { %2362 = vmatpush.bf16.msra.mxu3 %v3972_v10 }
 0xc59   :  { %2363 = vmatpush.bf16.msra.mxu3 %v3978_v6  ;;  %v1295_v6 = vpop.f32.mrf.mxu3 }
 0xc5b   :  { %v1581_v62 = vpop.permute.xlu2 %1580 }
 0xc5c   :  { %3089 = vmatmul.msk.f32.gmra.mxu3 %vm245_vm2, %v1581_v62 }
 0xc5d   :  { %2364 = vmatpush.bf16.msra.mxu3 %v3984_v12 }
 0xc61   :  { %2365 = vmatpush.bf16.msra.mxu3 %v3990_v13  ;;  %v1297_v14 = vpop.f32.mrf.mxu3  ;;  %v1296_v13 = vadd.f32 %v4023_v61, %v1295_v6 }
 0xc65   :  { %2366 = vmatpush.bf16.msra.mxu3 %v3996_v51 }
 0xc69   :  { %2367 = vmatpush.bf16.msra.mxu3 %v4002_v52 }
 0xc6d   :  { %2368 = vmatpush.bf16.msra.mxu3 %v4008_v53  ;;  %v1298_v53 = vadd.f32 %v4023_v61, %v1297_v14 }
 0xc71   :  { %2369 = vmatpush.bf16.msra.mxu3 %v4014_v54  ;;  %v1300_v41 = vpop.f32.mrf.mxu3 }
 0xc72   :  { %v1301_v15 = vadd.f32 %v4023_v61, %v1300_v41 }
 0xc79   :  { %v4206_v12 = vpop.f32.mrf.mxu3 }
 0xc7a   :  { %v1303_v62 = vadd.f32 %v4023_v61, %v4206_v12 }
 0xc7b   :  { %v1583_v39 = vpop.permute.xlu0 %1582 }
 0xc7c   :  { %3090 = vmatmul.msk.f32.gmra.mxu3 %vm245_vm2, %v1583_v39 }
 0xc9b   :  { %v1585_v10 = vpop.permute.xlu1 %1584 }
 0xc9c   :  { %3091 = vmatmul.msk.f32.gmra.mxu3 %vm245_vm2, %v1585_v10 }
 0xcd7   :  { %v1611_v51 = vpop.f32.mrf.mxu3 }
 0xcd8   :  { %v1623_v42 = vadd.f32 %v1611_v51, %v1296_v13 }
 0xcda   :  { %v3092_v52 = vmul.f32 -1.442695, %v1623_v42 }
 0xcdc   :  { %3339 = vpow2.f32 %v3092_v52 }
 0xcdf   :  { %v1614_v54 = vpop.f32.mrf.mxu3 }
 0xce0   :  { %v1624_v38 = vadd.f32 %v1614_v54, %v1298_v53 }
 0xce2   :  { %v3340_v43 = vpop.eup %3339  ;;  %v3093_v44 = vmul.f32 -1.442695, %v1624_v38 }
 0xce3   :  { %v1639_v18 = vadd.f32 1.0, %v3340_v43 }
 0xce4   :  { %3341 = vpow2.f32 %v3093_v44 }
 0xce5   :  { %3343 = vrcp.f32 %v1639_v18  ;;  %v1654_v32 = vand.u32 2147483648, %v1639_v18  ;;  %v1652_v37 = vand.u32 2147483647, %v1639_v18  ;;  %vm1648_vm12 = vweird.f32 %v1639_v18 }
 0xce7   :  { %v1655_v7 = vor.u32 1.1754944e-38, %v1654_v32  ;;  %vm1653_vm14 = vcmp.eq.f32.partialorder %v1652_v37, 8.507059e+37 }
 0xcea   :  { %v3342_v47 = vpop.eup %3341 }
 0xceb   :  { %v3344_v0 = vpop.eup %3343  ;;  %v1640_v17 = vadd.f32 1.0, %v3342_v47 }
 0xcec   :  { %v1644_v2 = vmul.f32 %v3344_v0, %v1639_v18  ;;  %vm1649_vm11 = vweird.f32 %v3344_v0 }
 0xced   :  { %3345 = vrcp.f32 %v1640_v17  ;;  %vm1650_vm13 = vmor %vm1648_vm12, %vm1649_vm11  ;;  %v1669_v19 = vand.u32 2147483648, %v1640_v17  ;;  %v1667_v36 = vand.u32 2147483647, %v1640_v17  ;;  %vm1663_vm1 = vweird.f32 %v1640_v17 }
 0xcee   :  { %v1645_v50 = vsub.f32 1.0, %v1644_v2 }
 0xcef   :  { %v1670_v22 = vor.u32 1.1754944e-38, %v1669_v19  ;;  %vm1668_vm4 = vcmp.eq.f32.partialorder %v1667_v36, 8.507059e+37  ;;  %v3204_v36 = vld [vmem:[%s4631_s0 + $0x68] sm:$0xff] }
 0xcf0   :  { %v1646_v4 = vmul.f32 %v3344_v0, %v1645_v50 }
 0xcf2   :  { %v1647_v48 = vadd.f32 %v3344_v0, %v1646_v4 }
 0xcf3   :  { %v3346_v34 = vpop.eup %3345 }
 0xcf4   :  { %v1659_v25 = vmul.f32 %v3346_v34, %v1640_v17  ;;  %v1651_v63 = vsel %vm1650_vm13, %v3344_v0, %v1647_v48  ;;  %vm1664_vm15 = vweird.f32 %v3346_v34 }
 0xcf5   :  { %v4210_v3 = vsel %vm1653_vm14, %v1655_v7, %v1651_v63  ;;  %vm1665_vm3 = vmor %vm1663_vm1, %vm1664_vm15 }
 0xcf6   :  { %v1660_v11 = vsub.f32 1.0, %v1659_v25  ;;  %v1703_v26 = vmul.f32 2.0, %v4210_v3  ;;  %v1711_v7 = vmul.f32 %v4210_v3, %v4147_v16  ;;  %v4255_v16 = vld [vmem:[%s4633_s4 + $0x10] sm:$0xff] }
 0xcf8   :  { %v3096_v55 = vadd.f32 -1.0, %v1703_v26  ;;  %v1661_v58 = vmul.f32 %v3346_v34, %v1660_v11  ;;  %v3203_v11 = vld [vmem:[%s4631_s0 + $0x60] sm:$0xff]  ;;  %v4249_v26 = vld [vmem:[%s4633_s4 + $0x18] sm:$0xff] }
 0xcf9   :  { %3086 = vmatmul.msk.bf16.vlgmr.msra.gmra.mxu2 %vm58_vm0, %v3203_v11 }
 0xcfa   :  { %1719 = vrot.lane.b32.xlu2 %v3096_v55, %s3500_s17  ;;  %v1662_v59 = vadd.f32 %v3346_v34, %v1661_v58  ;;  %2144 = vmatpush.msra.mxu2 %v4249_v26  ;;  %v4262_v55 = vld [vmem:[%s4633_s4 + $0x8] sm:$0xff]  ;;  %v4268_v58 = vld [vmem:[%s4633_s4] sm:$0xff] }
 0xcfc   :  { %v1666_v20 = vsel %vm1665_vm3, %v3346_v34, %v1662_v59  ;;  %2145 = vmatpush.msra.mxu2 %v4255_v16 }
 0xcfd   :  { %v4214_v24 = vsel %vm1668_vm4, %v1670_v22, %v1666_v20 }
 0xcfe   :  { %v1704_v60 = vmul.f32 2.0, %v4214_v24  ;;  %2146 = vmatpush.msra.mxu2 %v4262_v55  ;;  %v1712_v59 = vmul.f32 %v4214_v24, %v4161_v5 }
 0xcff   :  { %v1617_v27 = vpop.f32.mrf.mxu3 }
 0xd00   :  { %v1625_v21 = vadd.f32 %v1617_v27, %v1301_v15  ;;  %v3097_v23 = vadd.f32 -1.0, %v1704_v60  ;;  %2147 = vmatpush.msra.mxu2 %v4268_v58 }
 0xd02   :  { %v3094_v46 = vmul.f32 -1.442695, %v1625_v21  ;;  %1721 = vrot.lane.b32.xlu0 %v3097_v23, %s3500_s17 }
 0xd04   :  { %3347 = vpow2.f32 %v3094_v46 }
 0xd09   :  { %3087 = vmatmul.msk.bf16.gmra.mxu2 %vm58_vm0, %v3204_v36 }
 0xd0a   :  { %v3348_v29 = vpop.eup %3347 }
 0xd0b   :  { %v1641_v30 = vadd.f32 1.0, %v3348_v29 }
 0xd0d   :  { %3349 = vrcp.f32 %v1641_v30  ;;  %v1684_v1 = vand.u32 2147483648, %v1641_v30  ;;  %v1682_v33 = vand.u32 2147483647, %v1641_v30  ;;  %vm1678_vm6 = vweird.f32 %v1641_v30 }
 0xd0f   :  { %v1685_v45 = vor.u32 1.1754944e-38, %v1684_v1  ;;  %vm1683_vm8 = vcmp.eq.f32.partialorder %v1682_v33, 8.507059e+37 }
 0xd13   :  { %v3350_v28 = vpop.eup %3349 }
 0xd14   :  { %v1674_v56 = vmul.f32 %v3350_v28, %v1641_v30  ;;  %vm1679_vm5 = vweird.f32 %v3350_v28 }
 0xd15   :  { %vm1680_vm7 = vmor %vm1678_vm6, %vm1679_vm5 }
 0xd16   :  { %v1675_v31 = vsub.f32 1.0, %v1674_v56 }
 0xd18   :  { %v1676_v35 = vmul.f32 %v3350_v28, %v1675_v31 }
 0xd1a   :  { %v1677_v9 = vadd.f32 %v3350_v28, %v1676_v35 }
 0xd1c   :  { %v1681_v49 = vsel %vm1680_vm7, %v3350_v28, %v1677_v9 }
 0xd1d   :  { %v4219_v40 = vsel %vm1683_vm8, %v1685_v45, %v1681_v49 }
 0xd1e   :  { %v1705_v39 = vmul.f32 2.0, %v4219_v40  ;;  %v1713_v15 = vmul.f32 %v4219_v40, %v4171_v8 }
 0xd1f   :  { %v1620_v10 = vpop.f32.mrf.mxu3 }
 0xd20   :  { %v1626_v6 = vadd.f32 %v1620_v10, %v1303_v62  ;;  %v3098_v14 = vadd.f32 -1.0, %v1705_v39 }
 0xd22   :  { %v3095_v41 = vmul.f32 -1.442695, %v1626_v6  ;;  %1723 = vrot.lane.b32.xlu1 %v3098_v14, %s3500_s17 }
 0xd24   :  { %3351 = vpow2.f32 %v3095_v41 }
 0xd2a   :  { %v3352_v13 = vpop.eup %3351 }
 0xd2b   :  { %v1642_v51 = vadd.f32 1.0, %v3352_v13 }
 0xd2d   :  { %3353 = vrcp.f32 %v1642_v51  ;;  %v1699_v54 = vand.u32 2147483648, %v1642_v51  ;;  %v1697_v43 = vand.u32 2147483647, %v1642_v51  ;;  %vm1693_vm10 = vweird.f32 %v1642_v51 }
 0xd2f   :  { %v1700_v12 = vor.u32 1.1754944e-38, %v1699_v54  ;;  %vm1698_vm12 = vcmp.eq.f32.partialorder %v1697_v43, 8.507059e+37 }
 0xd33   :  { %v3354_v42 = vpop.eup %3353 }
 0xd34   :  { %v1689_v52 = vmul.f32 %v3354_v42, %v1642_v51  ;;  %vm1694_vm9 = vweird.f32 %v3354_v42 }
 0xd35   :  { %vm1695_vm11 = vmor %vm1693_vm10, %vm1694_vm9 }
 0xd36   :  { %v1690_v53 = vsub.f32 1.0, %v1689_v52 }
 0xd38   :  { %v1691_v38 = vmul.f32 %v3354_v42, %v1690_v53 }
 0xd3a   :  { %v1692_v61 = vadd.f32 %v3354_v42, %v1691_v38 }
 0xd3c   :  { %v1696_v44 = vsel %vm1695_vm11, %v3354_v42, %v1692_v61 }
 0xd3d   :  { %v4225_v18 = vsel %vm1698_vm12, %v1700_v12, %v1696_v44 }
 0xd3e   :  { %v1706_v47 = vmul.f32 2.0, %v4225_v18  ;;  %v1714_v5 = vmul.f32 %v4225_v18, %v4176_v57  ;;  %v4300_v57 = vld [vmem:[%s4634_s2] ss:$0 sm:$0xff] }
 0xd40   :  { %v3099_v0 = vadd.f32 -1.0, %v1706_v47 }
 0xd42   :  { %1725 = vrot.lane.b32.xlu2 %v3099_v0, %s3500_s17 }
 0xd54   :  { %v1720_v17 = vpop.permute.xlu2 %1719 }
 0xd55   :  { %v1731_v2 = vmul.f32 %v1720_v17, %v4210_v3 }
 0xd57   :  { %1739 = vrot.lane.b32.xlu0 %v1731_v2, %s3501_s18 }
 0xd74   :  { %v1722_v50 = vpop.permute.xlu0 %1721 }
 0xd75   :  { %v1732_v32 = vmul.f32 %v1722_v50, %v4214_v24 }
 0xd77   :  { %1741 = vrot.lane.b32.xlu1 %v1732_v32, %s3501_s18 }
 0xd7c   :  { %v1539_v1 = vpop.f32.mrf.mxu2 }
 0xd7d   :  { %v1540_v35 = vadd.f32 %v4300_v57, %v1539_v1 }
 0xd7f   :  { %v1549_v9 = vmax.f32 %v1540_v35, 0.0 }
 0xd84   :  { %v1541_v33 = vpop.f32.mrf.mxu2 }
 0xd85   :  { %v1542_v45 = vadd.f32 %v4300_v57, %v1541_v33 }
 0xd8c   :  { %v1544_v62 = vpop.f32.mrf.mxu2 }
 0xd8d   :  { %v1545_v39 = vadd.f32 %v4300_v57, %v1544_v62 }
 0xd8f   :  { %v1551_v14 = vmax.f32 %v1545_v39, 0.0 }
 0xd94   :  { %v1724_v4 = vpop.permute.xlu1 %1723  ;;  %v1546_v10 = vpop.f32.mrf.mxu2 }
 0xd95   :  { %v1733_v37 = vmul.f32 %v1724_v4, %v4219_v40  ;;  %v1547_v6 = vadd.f32 %v4300_v57, %v1546_v10 }
 0xd97   :  { %1743 = vrot.lane.b32.xlu2 %v1733_v37, %s3501_s18  ;;  %v1552_v41 = vmax.f32 %v1547_v6, 0.0 }
 0xd99   :  { %v1554_v42 = vpack.c.bf16 %v1552_v41, %v1551_v14 }
 0xd9c   :  { %v1726_v48 = vpop.permute.xlu2 %1725 }
 0xd9d   :  { %v1734_v34 = vmul.f32 %v1726_v48, %v4225_v18 }
 0xd9f   :  { %1745 = vrot.lane.b32.xlu0 %v1734_v34, %s3501_s18 }
 0xdc9   :  { %v1740_v25 = vpop.permute.xlu0 %1739 }
 0xdca   :  { %v4239_v63 = vadd.f32 %v1740_v25, %v1711_v7 }
 0xdcc   :  { %3355 = vtanh.f32 %v4239_v63 }
 0xdd2   :  { %v3356_v19 = vpop.eup %3355 }
 0xdd3   :  { %1763 = vrot.lane.b32.xlu1 %v3356_v19, %s3500_s17 }
 0xde9   :  { %v1742_v22 = vpop.permute.xlu1 %1741 }
 0xdea   :  { %v4277_v20 = vadd.f32 %v1742_v22, %v1712_v59 }
 0xdec   :  { %3357 = vtanh.f32 %v4277_v20 }
 0xdf1   :  { %v1744_v60 = vpop.permute.xlu2 %1743 }
 0xdf2   :  { %v3358_v27 = vpop.eup %3357  ;;  %v4282_v21 = vadd.f32 %v1744_v60, %v1713_v15 }
 0xdf3   :  { %1765 = vrot.lane.b32.xlu2 %v3358_v27, %s3500_s17 }
 0xdf4   :  { %3359 = vtanh.f32 %v4282_v21 }
 0xdfa   :  { %v3360_v23 = vpop.eup %3359 }
 0xdfb   :  { %1767 = vrot.lane.b32.xlu0 %v3360_v23, %s3500_s17 }
 0xe11   :  { %v1746_v46 = vpop.permute.xlu0 %1745 }
 0xe12   :  { %v4289_v29 = vadd.f32 %v1746_v46, %v1714_v5 }
 0xe14   :  { %3361 = vtanh.f32 %v4289_v29 }
 0xe1a   :  { %v3362_v8 = vpop.eup %3361 }
 0xe1b   :  { %1769 = vrot.lane.b32.xlu1 %v3362_v8, %s3500_s17 }
 0xe45   :  { %v1764_v30 = vpop.permute.xlu1 %1763 }
 0xe46   :  { %v1775_v28 = vmul.f32 %v1764_v30, %v4210_v3  ;;  %v1550_v3 = vmax.f32 %v1542_v45, 0.0 }
 0xe48   :  { %1847 = vrot.lane.b32.xlu2 %v1775_v28, %s3501_s18  ;;  %v1553_v49 = vpack.c.bf16 %v1550_v3, %v1549_v9 }
 0xe4a   :  { %1563 = vmatmul.bf16.vlgmr.msra.gmra.mxu1 %v1553_v49 }
 0xe4d   :  { %v1766_v56 = vpop.permute.xlu2 %1765 }
 0xe4e   :  { %v1776_v31 = vmul.f32 %v1766_v56, %v4214_v24  ;;  %v3495_v24 = vld [vmem:[%s4630_s1] sm:$0xff] }
 0xe4f   :  { %2344 = vmatpush.bf16.msra.mxu1 %v3495_v24 }
 0xe50   :  { %1849 = vrot.lane.b32.xlu0 %v1776_v31, %s3501_s18 }
 0xe5a   :  { %1568 = vmatmul.bf16.gmra.mxu1 %v1554_v42 }
 0xe6d   :  { %v1768_v13 = vpop.permute.xlu0 %1767 }
 0xe6e   :  { %v1777_v51 = vmul.f32 %v1768_v13, %v4219_v40 }
 0xe70   :  { %1851 = vrot.lane.b32.xlu1 %v1777_v51, %s3501_s18 }
 0xe8d   :  { %v1770_v52 = vpop.permute.xlu1 %1769 }
 0xe8e   :  { %v1778_v53 = vmul.f32 %v1770_v52, %v4225_v18  ;;  %v4320_v18 = vld [vmem:[%s4635_s5] ss:$0 sm:$0xff] }
 0xe90   :  { %1853 = vrot.lane.b32.xlu2 %v1778_v53, %s3501_s18 }
 0xea2   :  { %v1848_v54 = vpop.permute.xlu2 %1847 }
 0xea3   :  { %3110 = vmatmul.msk.f32.vlgmr.msrb.gmra.mxu1 %vm245_vm2, %v1848_v54 }
 0xec2   :  { %v1850_v38 = vpop.permute.xlu0 %1849 }
 0xec3   :  { %3111 = vmatmul.msk.f32.gmra.mxu1 %vm245_vm2, %v1850_v38 }
 0xec7   :  { %v1564_v40 = vpop.f32.mrf.mxu1 }
 0xec8   :  { %v1565_v0 = vadd.f32 %v4320_v18, %v1564_v40 }
 0xecf   :  { %v1566_v12 = vpop.f32.mrf.mxu1 }
 0xed0   :  { %v1567_v15 = vadd.f32 %v4320_v18, %v1566_v12 }
 0xed7   :  { %v1569_v44 = vpop.f32.mrf.mxu1 }
 0xed8   :  { %v1570_v62 = vadd.f32 %v4320_v18, %v1569_v44 }
 0xedf   :  { %v1571_v47 = vpop.f32.mrf.mxu1 }
 0xee0   :  { %v1572_v41 = vadd.f32 %v4320_v18, %v1571_v47 }
 0xee2   :  { %v1852_v43 = vpop.permute.xlu1 %1851 }
 0xee3   :  { %3112 = vmatmul.msk.f32.gmra.mxu1 %vm245_vm2, %v1852_v43 }
 0xeea   :  { %v1854_v61 = vpop.permute.xlu2 %1853 }
 0xeeb   :  { %3113 = vmatmul.msk.f32.gmra.mxu1 %vm245_vm2, %v1854_v61 }
 0xf20   :  { %v1880_v17 = vpop.f32.mrf.mxu1 }
 0xf21   :  { %v1892_v2 = vadd.f32 %v1880_v17, %v1565_v0 }
 0xf23   :  { %v3114_v50 = vmul.f32 -1.442695, %v1892_v2 }
 0xf25   :  { %3363 = vpow2.f32 %v3114_v50 }
 0xf2b   :  { %v3364_v32 = vpop.eup %3363 }
 0xf2c   :  { %v1908_v4 = vadd.f32 1.0, %v3364_v32 }
 0xf2e   :  { %3365 = vrcp.f32 %v1908_v4  ;;  %v1923_v7 = vand.u32 2147483648, %v1908_v4  ;;  %v1921_v11 = vand.u32 2147483647, %v1908_v4  ;;  %vm1917_vm14 = vweird.f32 %v1908_v4 }
 0xf30   :  { %v1924_v36 = vor.u32 1.1754944e-38, %v1923_v7  ;;  %vm1922_vm1 = vcmp.eq.f32.partialorder %v1921_v11, 8.507059e+37 }
 0xf34   :  { %v3366_v37 = vpop.eup %3365 }
 0xf35   :  { %v1913_v48 = vmul.f32 %v3366_v37, %v1908_v4  ;;  %vm1918_vm13 = vweird.f32 %v3366_v37 }
 0xf36   :  { %vm1919_vm15 = vmor %vm1917_vm14, %vm1918_vm13 }
 0xf37   :  { %v1914_v34 = vsub.f32 1.0, %v1913_v48 }
 0xf39   :  { %v1915_v25 = vmul.f32 %v3366_v37, %v1914_v34 }
 0xf3b   :  { %v1916_v19 = vadd.f32 %v3366_v37, %v1915_v25 }
 0xf3d   :  { %v1920_v59 = vsel %vm1919_vm15, %v3366_v37, %v1916_v19 }
 0xf3e   :  { %v4323_v22 = vsel %vm1922_vm1, %v1924_v36, %v1920_v59 }
 0xf3f   :  { %v1972_v60 = vmul.f32 2.0, %v4323_v22 }
 0xf40   :  { %v1883_v27 = vpop.f32.mrf.mxu1 }
 0xf41   :  { %v1893_v23 = vadd.f32 %v1883_v27, %v1567_v15  ;;  %v3118_v5 = vadd.f32 -1.0, %v1972_v60 }
 0xf43   :  { %v3115_v46 = vmul.f32 -1.442695, %v1893_v23  ;;  %1988 = vrot.lane.b32.xlu0 %v3118_v5, %s3500_s17 }
 0xf45   :  { %3367 = vpow2.f32 %v3115_v46 }
 0xf4b   :  { %v3368_v8 = vpop.eup %3367 }
 0xf4c   :  { %v1909_v30 = vadd.f32 1.0, %v3368_v8 }
 0xf4e   :  { %3369 = vrcp.f32 %v1909_v30  ;;  %v1938_v1 = vand.u32 2147483648, %v1909_v30  ;;  %v1936_v33 = vand.u32 2147483647, %v1909_v30  ;;  %vm1932_vm4 = vweird.f32 %v1909_v30 }
 0xf50   :  { %v1939_v45 = vor.u32 1.1754944e-38, %v1938_v1  ;;  %vm1937_vm6 = vcmp.eq.f32.partialorder %v1936_v33, 8.507059e+37  ;;  %v1980_v1 = vmul.f32 %v4323_v22, %v4239_v63  ;;  %v3205_v63 = vld [vmem:[%s4631_s0 + $0x70] sm:$0xff] }
 0xf51   :  { %3108 = vmatmul.msk.bf16.vlgmr.msrb.gmra.mxu0 %vm58_vm0, %v3205_v63 }
 0xf52   :  { %2413 = vmatpush.msrb.mxu0 %v4249_v26 }
 0xf54   :  { %v3370_v28 = vpop.eup %3369  ;;  %2414 = vmatpush.msrb.mxu0 %v4255_v16 }
 0xf55   :  { %v1928_v56 = vmul.f32 %v3370_v28, %v1909_v30  ;;  %vm1933_vm3 = vweird.f32 %v3370_v28 }
 0xf56   :  { %vm1934_vm5 = vmor %vm1932_vm4, %vm1933_vm3  ;;  %2415 = vmatpush.msrb.mxu0 %v4262_v55 }
 0xf57   :  { %v1929_v31 = vsub.f32 1.0, %v1928_v56 }
 0xf58   :  { %2416 = vmatpush.msrb.mxu0 %v4268_v58 }
 0xf59   :  { %v1930_v35 = vmul.f32 %v3370_v28, %v1929_v31 }
 0xf5b   :  { %v1931_v9 = vadd.f32 %v3370_v28, %v1930_v35 }
 0xf5d   :  { %v1935_v3 = vsel %vm1934_vm5, %v3370_v28, %v1931_v9 }
 0xf5e   :  { %v4328_v49 = vsel %vm1937_vm6, %v1939_v45, %v1935_v3 }
 0xf5f   :  { %v1973_v24 = vmul.f32 2.0, %v4328_v49  ;;  %v1981_v9 = vmul.f32 %v4328_v49, %v4277_v20  ;;  %v3206_v20 = vld [vmem:[%s4631_s0 + $0x78] sm:$0xff] }
 0xf60   :  { %v1886_v39 = vpop.f32.mrf.mxu1 }
 0xf61   :  { %v1894_v10 = vadd.f32 %v1886_v39, %v1570_v62  ;;  %v3119_v6 = vadd.f32 -1.0, %v1973_v24  ;;  %3109 = vmatmul.msk.bf16.gmra.mxu0 %vm58_vm0, %v3206_v20 }
 0xf63   :  { %v3116_v14 = vmul.f32 -1.442695, %v1894_v10  ;;  %1990 = vrot.lane.b32.xlu1 %v3119_v6, %s3500_s17 }
 0xf65   :  { %3371 = vpow2.f32 %v3116_v14 }
 0xf68   :  { %v1889_v13 = vpop.f32.mrf.mxu1 }
 0xf69   :  { %v1895_v51 = vadd.f32 %v1889_v13, %v1572_v41 }
 0xf6b   :  { %v3372_v42 = vpop.eup %3371  ;;  %v3117_v52 = vmul.f32 -1.442695, %v1895_v51 }
 0xf6c   :  { %v1910_v53 = vadd.f32 1.0, %v3372_v42 }
 0xf6d   :  { %3373 = vpow2.f32 %v3117_v52 }
 0xf6e   :  { %3375 = vrcp.f32 %v1910_v53  ;;  %v1953_v12 = vand.u32 2147483648, %v1910_v53  ;;  %v1951_v0 = vand.u32 2147483647, %v1910_v53  ;;  %vm1947_vm8 = vweird.f32 %v1910_v53 }
 0xf70   :  { %v1954_v2 = vor.u32 1.1754944e-38, %v1953_v12  ;;  %vm1952_vm10 = vcmp.eq.f32.partialorder %v1951_v0, 8.507059e+37 }
 0xf73   :  { %v3374_v54 = vpop.eup %3373 }
 0xf74   :  { %v3376_v38 = vpop.eup %3375  ;;  %v1911_v43 = vadd.f32 1.0, %v3374_v54 }
 0xf75   :  { %v1943_v61 = vmul.f32 %v3376_v38, %v1910_v53  ;;  %vm1948_vm7 = vweird.f32 %v3376_v38 }
 0xf76   :  { %3377 = vrcp.f32 %v1911_v43  ;;  %vm1949_vm9 = vmor %vm1947_vm8, %vm1948_vm7  ;;  %v1968_v34 = vand.u32 2147483648, %v1911_v43  ;;  %v1966_v11 = vand.u32 2147483647, %v1911_v43  ;;  %vm1962_vm12 = vweird.f32 %v1911_v43 }
 0xf77   :  { %v1944_v40 = vsub.f32 1.0, %v1943_v61 }
 0xf78   :  { %v1969_v36 = vor.u32 1.1754944e-38, %v1968_v34  ;;  %vm1967_vm14 = vcmp.eq.f32.partialorder %v1966_v11, 8.507059e+37 }
 0xf79   :  { %v1945_v44 = vmul.f32 %v3376_v38, %v1944_v40 }
 0xf7b   :  { %v1946_v17 = vadd.f32 %v3376_v38, %v1945_v44 }
 0xf7c   :  { %v3378_v47 = vpop.eup %3377 }
 0xf7d   :  { %v1958_v50 = vmul.f32 %v3378_v47, %v1911_v43  ;;  %v1950_v32 = vsel %vm1949_vm9, %v3376_v38, %v1946_v17  ;;  %vm1963_vm11 = vweird.f32 %v3378_v47 }
 0xf7e   :  { %v4334_v4 = vsel %vm1952_vm10, %v1954_v2, %v1950_v32  ;;  %vm1964_vm13 = vmor %vm1962_vm12, %vm1963_vm11 }
 0xf7f   :  { %v1959_v37 = vsub.f32 1.0, %v1958_v50  ;;  %v1974_v48 = vmul.f32 2.0, %v4334_v4  ;;  %v1982_v39 = vmul.f32 %v4334_v4, %v4282_v21 }
 0xf81   :  { %v3120_v7 = vadd.f32 -1.0, %v1974_v48  ;;  %v1960_v25 = vmul.f32 %v3378_v47, %v1959_v37 }
 0xf83   :  { %1992 = vrot.lane.b32.xlu2 %v3120_v7, %s3500_s17  ;;  %v1961_v19 = vadd.f32 %v3378_v47, %v1960_v25 }
 0xf85   :  { %v1965_v59 = vsel %vm1964_vm13, %v3378_v47, %v1961_v19 }
 0xf86   :  { %v4338_v15 = vsel %vm1967_vm14, %v1969_v36, %v1965_v59 }
 0xf87   :  { %v1975_v60 = vmul.f32 2.0, %v4338_v15  ;;  %v1983_v41 = vmul.f32 %v4338_v15, %v4289_v29 }
 0xf89   :  { %v3121_v27 = vadd.f32 -1.0, %v1975_v60 }
 0xf8b   :  { %1994 = vrot.lane.b32.xlu0 %v3121_v27, %s3500_s17 }
 0xfb5   :  { %v1989_v23 = vpop.permute.xlu0 %1988 }
 0xfb6   :  { %v2000_v5 = vmul.f32 %v1989_v23, %v4323_v22 }
 0xfb8   :  { %2008 = vrot.lane.b32.xlu1 %v2000_v5, %s3501_s18 }
 0xfce   :  { %v1808_v38 = vpop.f32.mrf.mxu0 }
 0xfcf   :  { %v1809_v29 = vadd.f32 %v4300_v57, %v1808_v38 }
 0xfd1   :  { %v1818_v61 = vmax.f32 %v1809_v29, 0.0 }
 0xfd5   :  { %v1991_v46 = vpop.permute.xlu1 %1990 }
 0xfd6   :  { %v2001_v8 = vmul.f32 %v1991_v46, %v4328_v49  ;;  %v1810_v43 = vpop.f32.mrf.mxu0 }
 0xfd7   :  { %v1811_v40 = vadd.f32 %v4300_v57, %v1810_v43 }
 0xfd8   :  { %2010 = vrot.lane.b32.xlu2 %v2001_v8, %s3501_s18 }
 0xfd9   :  { %v1819_v12 = vmax.f32 %v1811_v40, 0.0 }
 0xfdb   :  { %v1822_v44 = vpack.c.bf16 %v1819_v12, %v1818_v61 }
 0xfdd   :  { %v1993_v30 = vpop.permute.xlu2 %1992  ;;  %1832 = vmatmul.bf16.vlgmr.msrb.gmra.mxu2 %v1822_v44 }
 0xfde   :  { %v2002_v28 = vmul.f32 %v1993_v30, %v4334_v4  ;;  %v1813_v0 = vpop.f32.mrf.mxu0  ;;  %2618 = vmatpush.msrb.mxu2 %v4249_v26 }
 0xfe0   :  { %2012 = vrot.lane.b32.xlu0 %v2002_v28, %s3501_s18  ;;  %2619 = vmatpush.msrb.mxu2 %v4255_v16 }
 0xfe2   :  { %2620 = vmatpush.msrb.mxu2 %v4262_v55 }
 0xfe4   :  { %2621 = vmatpush.msrb.mxu2 %v4268_v58 }
 0xffd   :  { %v1995_v56 = vpop.permute.xlu0 %1994 }
 0xffe   :  { %v2003_v31 = vmul.f32 %v1995_v56, %v4338_v15 }
0x1000   :  { %2014 = vrot.lane.b32.xlu1 %v2003_v31, %s3501_s18 }
0x102a   :  { %v2009_v35 = vpop.permute.xlu1 %2008 }
0x102b   :  { %v4352_v33 = vadd.f32 %v2009_v35, %v1980_v1 }
0x102d   :  { %3379 = vtanh.f32 %v4352_v33 }
0x1032   :  { %v2011_v45 = vpop.permute.xlu2 %2010 }
0x1033   :  { %v3380_v3 = vpop.eup %3379  ;;  %v4357_v62 = vadd.f32 %v2011_v45, %v1981_v9 }
0x1034   :  { %2032 = vrot.lane.b32.xlu2 %v3380_v3, %s3500_s17 }
0x1035   :  { %3381 = vtanh.f32 %v4357_v62 }
0x103b   :  { %v3382_v24 = vpop.eup %3381 }
0x103c   :  { %2034 = vrot.lane.b32.xlu0 %v3382_v24, %s3500_s17 }
0x1052   :  { %v2013_v10 = vpop.permute.xlu0 %2012 }
0x1053   :  { %v4376_v6 = vadd.f32 %v2013_v10, %v1982_v39 }
0x1055   :  { %3383 = vtanh.f32 %v4376_v6 }
0x105b   :  { %v3384_v14 = vpop.eup %3383 }
0x105c   :  { %2036 = vrot.lane.b32.xlu1 %v3384_v14, %s3500_s17 }
0x1060   :  { %v1833_v34 = vpop.f32.mrf.mxu2 }
0x1061   :  { %v1834_v19 = vadd.f32 %v4320_v18, %v1833_v34 }
0x1068   :  { %v1835_v7 = vpop.f32.mrf.mxu2 }
0x1069   :  { %v1836_v9 = vadd.f32 %v4320_v18, %v1835_v7 }
0x1072   :  { %v2015_v13 = vpop.permute.xlu1 %2014 }
0x1073   :  { %v4382_v51 = vadd.f32 %v2015_v13, %v1983_v41 }
0x1075   :  { %3385 = vtanh.f32 %v4382_v51 }
0x107b   :  { %v3386_v42 = vpop.eup %3385 }
0x107c   :  { %2038 = vrot.lane.b32.xlu2 %v3386_v42, %s3500_s17 }
0x108e   :  { %v2033_v21 = vpop.permute.xlu2 %2032 }
0x108f   :  { %v2044_v52 = vmul.f32 %v2033_v21, %v4323_v22  ;;  %v1814_v22 = vadd.f32 %v4300_v57, %v1813_v0 }
0x1091   :  { %2116 = vrot.lane.b32.xlu0 %v2044_v52, %s3501_s18  ;;  %v1820_v17 = vmax.f32 %v1814_v22, 0.0 }
0x10ae   :  { %v2035_v53 = vpop.permute.xlu0 %2034 }
0x10af   :  { %v2045_v54 = vmul.f32 %v2035_v53, %v4328_v49  ;;  %v1815_v49 = vpop.f32.mrf.mxu0 }
0x10b0   :  { %v1816_v47 = vadd.f32 %v4300_v57, %v1815_v49 }
0x10b1   :  { %2118 = vrot.lane.b32.xlu1 %v2045_v54, %s3501_s18 }
0x10b2   :  { %v1821_v32 = vmax.f32 %v1816_v47, 0.0 }
0x10b4   :  { %v1823_v37 = vpack.c.bf16 %v1821_v32, %v1820_v17 }
0x10b6   :  { %1837 = vmatmul.bf16.gmra.mxu2 %v1823_v37 }
0x10ce   :  { %v2037_v2 = vpop.permute.xlu1 %2036 }
0x10cf   :  { %v2046_v50 = vmul.f32 %v2037_v2, %v4334_v4 }
0x10d1   :  { %2120 = vrot.lane.b32.xlu2 %v2046_v50, %s3501_s18 }
0x10d6   :  { %v2039_v26 = vpop.permute.xlu2 %2038 }
0x10d7   :  { %v2047_v16 = vmul.f32 %v2039_v26, %v4338_v15 }
0x10d9   :  { %2122 = vrot.lane.b32.xlu0 %v2047_v16, %s3501_s18 }
0x1103   :  { %v2117_v55 = vpop.permute.xlu0 %2116 }
0x1104   :  { %3132 = vmatmul.msk.f32.vlgmr.msra.gmra.mxu2 %vm245_vm2, %v2117_v55 }
0x1123   :  { %v2119_v58 = vpop.permute.xlu1 %2118 }
0x1124   :  { %3133 = vmatmul.msk.f32.gmra.mxu2 %vm245_vm2, %v2119_v58 }
0x112b   :  { %v2121_v48 = vpop.permute.xlu2 %2120 }
0x112c   :  { %3134 = vmatmul.msk.f32.gmra.mxu2 %vm245_vm2, %v2121_v48 }
0x1139   :  { %v1838_v25 = vpop.f32.mrf.mxu2 }
0x113a   :  { %v1839_v39 = vadd.f32 %v4320_v18, %v1838_v25 }
0x1141   :  { %v4406_v11 = vpop.f32.mrf.mxu2 }
0x1142   :  { %v1841_v48 = vadd.f32 %v4320_v18, %v4406_v11 }
0x114b   :  { %v2123_v4 = vpop.permute.xlu0 %2122 }
0x114c   :  { %3135 = vmatmul.msk.f32.gmra.mxu2 %vm245_vm2, %v2123_v4 }
0x1187   :  { %v2149_v36 = vpop.f32.mrf.mxu2 }
0x1188   :  { %v2161_v59 = vadd.f32 %v2149_v36, %v1834_v19 }
0x118a   :  { %v3136_v15 = vmul.f32 -1.442695, %v2161_v59 }
0x118c   :  { %3387 = vpow2.f32 %v3136_v15 }
0x1192   :  { %v3388_v60 = vpop.eup %3387 }
0x1193   :  { %v2177_v27 = vadd.f32 1.0, %v3388_v60 }
0x1195   :  { %3389 = vrcp.f32 %v2177_v27  ;;  %v2192_v8 = vand.u32 2147483648, %v2177_v27  ;;  %v2190_v28 = vand.u32 2147483647, %v2177_v27  ;;  %vm2186_vm1 = vweird.f32 %v2177_v27 }
0x1197   :  { %v2193_v31 = vor.u32 1.1754944e-38, %v2192_v8  ;;  %vm2191_vm4 = vcmp.eq.f32.partialorder %v2190_v28, 8.507059e+37 }
0x119b   :  { %v3390_v23 = vpop.eup %3389 }
0x119c   :  { %v2182_v5 = vmul.f32 %v3390_v23, %v2177_v27  ;;  %vm2187_vm15 = vweird.f32 %v3390_v23 }
0x119d   :  { %vm2188_vm3 = vmor %vm2186_vm1, %vm2187_vm15 }
0x119e   :  { %v2183_v46 = vsub.f32 1.0, %v2182_v5 }
0x11a0   :  { %v2184_v30 = vmul.f32 %v3390_v23, %v2183_v46 }
0x11a2   :  { %v2185_v56 = vadd.f32 %v3390_v23, %v2184_v30 }
0x11a4   :  { %v2189_v1 = vsel %vm2188_vm3, %v3390_v23, %v2185_v56 }
0x11a5   :  { %v4409_v35 = vsel %vm2191_vm4, %v2193_v31, %v2189_v1 }
0x11a6   :  { %v2241_v45 = vmul.f32 2.0, %v4409_v35 }
0x11a7   :  { %v2152_v3 = vpop.f32.mrf.mxu2 }
0x11a8   :  { %v2162_v63 = vadd.f32 %v2152_v3, %v1836_v9  ;;  %v3140_v24 = vadd.f32 -1.0, %v2241_v45 }
0x11aa   :  { %v3137_v20 = vmul.f32 -1.442695, %v2162_v63  ;;  %2257 = vrot.lane.b32.xlu1 %v3140_v24, %s3500_s17 }
0x11ac   :  { %3391 = vpow2.f32 %v3137_v20 }
0x11af   :  { %v2155_v10 = vpop.f32.mrf.mxu2 }
0x11b0   :  { %v2163_v14 = vadd.f32 %v2155_v10, %v1839_v39  ;;  %v2249_v10 = vmul.f32 %v4409_v35, %v4352_v33 }
0x11b2   :  { %v3392_v41 = vpop.eup %3391  ;;  %v3138_v13 = vmul.f32 -1.442695, %v2163_v14 }
0x11b3   :  { %v2178_v42 = vadd.f32 1.0, %v3392_v41 }
0x11b4   :  { %3393 = vpow2.f32 %v3138_v13 }
0x11b5   :  { %3395 = vrcp.f32 %v2178_v42  ;;  %v2207_v29 = vand.u32 2147483648, %v2178_v42  ;;  %v2205_v61 = vand.u32 2147483647, %v2178_v42  ;;  %vm2201_vm6 = vweird.f32 %v2178_v42 }
0x11b7   :  { %v2208_v44 = vor.u32 1.1754944e-38, %v2207_v29  ;;  %vm2206_vm8 = vcmp.eq.f32.partialorder %v2205_v61, 8.507059e+37 }
0x11ba   :  { %v3394_v21 = vpop.eup %3393 }
0x11bb   :  { %v3396_v52 = vpop.eup %3395  ;;  %v2179_v53 = vadd.f32 1.0, %v3394_v21 }
0x11bc   :  { %v2197_v54 = vmul.f32 %v3396_v52, %v2178_v42  ;;  %vm2202_vm5 = vweird.f32 %v3396_v52  ;;  %v3207_v42 = vld [vmem:[%s4631_s0 + $0x80] sm:$0xff] }
0x11bd   :  { %3397 = vrcp.f32 %v2179_v53  ;;  %vm2203_vm7 = vmor %vm2201_vm6, %vm2202_vm5  ;;  %v2222_v2 = vand.u32 2147483648, %v2179_v53  ;;  %v2220_v37 = vand.u32 2147483647, %v2179_v53  ;;  %vm2216_vm10 = vweird.f32 %v2179_v53  ;;  %3130 = vmatmul.msk.bf16.vlgmr.msrb.gmra.mxu3 %vm58_vm0, %v3207_v42 }
0x11be   :  { %v2198_v38 = vsub.f32 1.0, %v2197_v54  ;;  %v3208_v54 = vld [vmem:[%s4631_s0 + $0x88] sm:$0xff] }
0x11bf   :  { %v2223_v16 = vor.u32 1.1754944e-38, %v2222_v2  ;;  %vm2221_vm12 = vcmp.eq.f32.partialorder %v2220_v37, 8.507059e+37 }
0x11c0   :  { %v2199_v43 = vmul.f32 %v3396_v52, %v2198_v38 }
0x11c2   :  { %v2200_v40 = vadd.f32 %v3396_v52, %v2199_v43 }
0x11c3   :  { %v3398_v12 = vpop.eup %3397 }
0x11c4   :  { %v2212_v0 = vmul.f32 %v3398_v12, %v2179_v53  ;;  %v2204_v22 = vsel %vm2203_vm7, %v3396_v52, %v2200_v40  ;;  %vm2217_vm9 = vweird.f32 %v3398_v12 }
0x11c5   :  { %v4415_v49 = vsel %vm2206_vm8, %v2208_v44, %v2204_v22  ;;  %vm2218_vm11 = vmor %vm2216_vm10, %vm2217_vm9 }
0x11c6   :  { %v2213_v17 = vsub.f32 1.0, %v2212_v0  ;;  %v2242_v47 = vmul.f32 2.0, %v4415_v49  ;;  %v2250_v21 = vmul.f32 %v4415_v49, %v4357_v62 }
0x11c8   :  { %v3141_v50 = vadd.f32 -1.0, %v2242_v47  ;;  %v2214_v32 = vmul.f32 %v3398_v12, %v2213_v17 }
0x11ca   :  { %2259 = vrot.lane.b32.xlu2 %v3141_v50, %s3500_s17  ;;  %v2215_v26 = vadd.f32 %v3398_v12, %v2214_v32 }
0x11cc   :  { %v2219_v55 = vsel %vm2218_vm11, %v3398_v12, %v2215_v26 }
0x11cd   :  { %v4419_v58 = vsel %vm2221_vm12, %v2223_v16, %v2219_v55  ;;  %3131 = vmatmul.msk.bf16.gmra.mxu3 %vm58_vm0, %v3208_v54 }
0x11ce   :  { %v2243_v4 = vmul.f32 2.0, %v4419_v58  ;;  %v2251_v38 = vmul.f32 %v4419_v58, %v4376_v6 }
0x11cf   :  { %v2158_v34 = vpop.f32.mrf.mxu2 }
0x11d0   :  { %v2164_v7 = vadd.f32 %v2158_v34, %v1841_v48  ;;  %v3142_v25 = vadd.f32 -1.0, %v2243_v4 }
0x11d2   :  { %v3139_v19 = vmul.f32 -1.442695, %v2164_v7  ;;  %2261 = vrot.lane.b32.xlu0 %v3142_v25, %s3500_s17 }
0x11d4   :  { %3399 = vpow2.f32 %v3139_v19 }
0x11da   :  { %v3400_v36 = vpop.eup %3399 }
0x11db   :  { %v2180_v59 = vadd.f32 1.0, %v3400_v36 }
0x11dd   :  { %3401 = vrcp.f32 %v2180_v59  ;;  %v2237_v23 = vand.u32 2147483648, %v2180_v59  ;;  %v2235_v46 = vand.u32 2147483647, %v2180_v59  ;;  %vm2231_vm14 = vweird.f32 %v2180_v59 }
0x11df   :  { %v2238_v8 = vor.u32 1.1754944e-38, %v2237_v23  ;;  %vm2236_vm1 = vcmp.eq.f32.partialorder %v2235_v46, 8.507059e+37 }
0x11e3   :  { %v3402_v15 = vpop.eup %3401 }
0x11e4   :  { %v2227_v60 = vmul.f32 %v3402_v15, %v2180_v59  ;;  %vm2232_vm13 = vweird.f32 %v3402_v15 }
0x11e5   :  { %vm2233_vm15 = vmor %vm2231_vm14, %vm2232_vm13 }
0x11e6   :  { %v2228_v27 = vsub.f32 1.0, %v2227_v60 }
0x11e8   :  { %v2229_v5 = vmul.f32 %v3402_v15, %v2228_v27 }
0x11ea   :  { %v2230_v11 = vadd.f32 %v3402_v15, %v2229_v5 }
0x11ec   :  { %v2234_v30 = vsel %vm2233_vm15, %v3402_v15, %v2230_v11 }
0x11ed   :  { %v4425_v28 = vsel %vm2236_vm1, %v2238_v8, %v2234_v30 }
0x11ee   :  { %v2244_v56 = vmul.f32 2.0, %v4425_v28  ;;  %v2252_v62 = vmul.f32 %v4425_v28, %v4382_v51 }
0x11f0   :  { %v3143_v31 = vadd.f32 -1.0, %v2244_v56 }
0x11f2   :  { %2263 = vrot.lane.b32.xlu1 %v3143_v31, %s3500_s17 }
0x121c   :  { %v2258_v1 = vpop.permute.xlu1 %2257 }
0x121d   :  { %v2269_v9 = vmul.f32 %v2258_v1, %v4409_v35 }
0x121f   :  { %2277 = vrot.lane.b32.xlu2 %v2269_v9, %s3501_s18 }
0x1224   :  { %v2260_v45 = vpop.permute.xlu2 %2259 }
0x1225   :  { %v2270_v3 = vmul.f32 %v2260_v45, %v4415_v49 }
0x1227   :  { %2279 = vrot.lane.b32.xlu0 %v2270_v3, %s3501_s18 }
0x1240   :  { %v2077_v51 = vpop.f32.mrf.mxu3 }
0x1241   :  { %v2078_v2 = vadd.f32 %v4300_v57, %v2077_v51 }
0x1243   :  { %v2087_v37 = vmax.f32 %v2078_v2, 0.0 }
0x1244   :  { %v2262_v63 = vpop.permute.xlu0 %2261 }
0x1245   :  { %v2271_v24 = vmul.f32 %v2262_v63, %v4419_v58 }
0x1247   :  { %2281 = vrot.lane.b32.xlu1 %v2271_v24, %s3501_s18 }
0x1248   :  { %v2079_v32 = vpop.f32.mrf.mxu3 }
0x1249   :  { %v2080_v26 = vadd.f32 %v4300_v57, %v2079_v32 }
0x1250   :  { %v2082_v55 = vpop.f32.mrf.mxu3 }
0x1258   :  { %v2084_v48 = vpop.f32.mrf.mxu3 }
0x1259   :  { %v2085_v34 = vadd.f32 %v4300_v57, %v2084_v48 }
0x125b   :  { %v2090_v7 = vmax.f32 %v2085_v34, 0.0 }
0x1264   :  { %v2264_v20 = vpop.permute.xlu1 %2263 }
0x1265   :  { %v2272_v39 = vmul.f32 %v2264_v20, %v4425_v28 }
0x1267   :  { %2283 = vrot.lane.b32.xlu2 %v2272_v39, %s3501_s18 }
0x1279   :  { %v2278_v14 = vpop.permute.xlu2 %2277 }
0x127a   :  { %v4439_v41 = vadd.f32 %v2278_v14, %v2249_v10 }
0x127c   :  { %3403 = vtanh.f32 %v4439_v41 }
0x1282   :  { %v3404_v13 = vpop.eup %3403 }
0x1283   :  { %2301 = vrot.lane.b32.xlu0 %v3404_v13, %s3500_s17 }
0x1299   :  { %v2280_v52 = vpop.permute.xlu0 %2279 }
0x129a   :  { %v4449_v53 = vadd.f32 %v2280_v52, %v2250_v21 }
0x129c   :  { %3405 = vtanh.f32 %v4449_v53 }
0x12a2   :  { %v3406_v33 = vpop.eup %3405 }
0x12a3   :  { %2303 = vrot.lane.b32.xlu1 %v3406_v33, %s3500_s17 }
0x12b9   :  { %v2282_v29 = vpop.permute.xlu1 %2281 }
0x12ba   :  { %v4459_v43 = vadd.f32 %v2282_v29, %v2251_v38 }
0x12bc   :  { %3407 = vtanh.f32 %v4459_v43 }
0x12c1   :  { %v2284_v61 = vpop.permute.xlu2 %2283 }
0x12c2   :  { %v3408_v40 = vpop.eup %3407  ;;  %v4464_v12 = vadd.f32 %v2284_v61, %v2252_v62 }
0x12c3   :  { %2305 = vrot.lane.b32.xlu2 %v3408_v40, %s3500_s17 }
0x12c4   :  { %3409 = vtanh.f32 %v4464_v12 }
0x12ca   :  { %v3410_v44 = vpop.eup %3409 }
0x12cb   :  { %2307 = vrot.lane.b32.xlu0 %v3410_v44, %s3500_s17 }
0x12f5   :  { %v2302_v6 = vpop.permute.xlu0 %2301 }
0x12f6   :  { %v2313_v0 = vmul.f32 %v2302_v6, %v4409_v35  ;;  %v2088_v35 = vmax.f32 %v2080_v26, 0.0 }
0x12f8   :  { %2385 = vrot.lane.b32.xlu1 %v2313_v0, %s3501_s18  ;;  %v2091_v16 = vpack.c.bf16 %v2088_v35, %v2087_v37 }
0x12fa   :  { %2101 = vmatmul.bf16.vlgmr.msra.gmra.mxu0 %v2091_v16 }
0x1315   :  { %v2304_v22 = vpop.permute.xlu1 %2303 }
0x1316   :  { %v2314_v17 = vmul.f32 %v2304_v22, %v4415_v49  ;;  %v2083_v49 = vadd.f32 %v4300_v57, %v2082_v55 }
0x1318   :  { %2387 = vrot.lane.b32.xlu2 %v2314_v17, %s3501_s18  ;;  %v2089_v4 = vmax.f32 %v2083_v49, 0.0 }
0x131a   :  { %v2092_v25 = vpack.c.bf16 %v2090_v7, %v2089_v4 }
0x131c   :  { %2106 = vmatmul.bf16.gmra.mxu0 %v2092_v25 }
0x131d   :  { %v2306_v47 = vpop.permute.xlu2 %2305 }
0x131e   :  { %v2315_v50 = vmul.f32 %v2306_v47, %v4419_v58 }
0x1320   :  { %2389 = vrot.lane.b32.xlu0 %v2315_v50, %s3501_s18 }
0x133d   :  { %v2308_v58 = vpop.permute.xlu0 %2307 }
0x133e   :  { %v2316_v19 = vmul.f32 %v2308_v58, %v4425_v28 }
0x1340   :  { %2391 = vrot.lane.b32.xlu1 %v2316_v19, %s3501_s18 }
0x136a   :  { %v2386_v36 = vpop.permute.xlu1 %2385 }
0x136b   :  { %3154 = vmatmul.msk.f32.vlgmr.msrb.gmra.mxu0 %vm245_vm2, %v2386_v36 }
0x1372   :  { %v2388_v59 = vpop.permute.xlu2 %2387 }
0x1373   :  { %3155 = vmatmul.msk.f32.gmra.mxu0 %vm245_vm2, %v2388_v59 }
0x1377   :  { %v2102_v57 = vpop.f32.mrf.mxu0 }
0x1378   :  { %v2103_v46 = vadd.f32 %v4320_v18, %v2102_v57 }
0x137f   :  { %v2104_v27 = vpop.f32.mrf.mxu0 }
0x1380   :  { %v2105_v28 = vadd.f32 %v4320_v18, %v2104_v27 }
0x1392   :  { %v2390_v15 = vpop.permute.xlu0 %2389 }
0x1393   :  { %3156 = vmatmul.msk.f32.gmra.mxu0 %vm245_vm2, %v2390_v15 }
0x1399   :  { %v2107_v23 = vpop.f32.mrf.mxu0 }
0x139a   :  { %v2108_v47 = vadd.f32 %v4320_v18, %v2107_v23 }
0x13a1   :  { %v4485_v5 = vpop.f32.mrf.mxu0 }
0x13a2   :  { %v2110_v59 = vadd.f32 %v4320_v18, %v4485_v5 }
0x13b2   :  { %v2392_v60 = vpop.permute.xlu1 %2391 }
0x13b3   :  { %3157 = vmatmul.msk.f32.gmra.mxu0 %vm245_vm2, %v2392_v60 }
0x13e8   :  { %v2418_v11 = vpop.f32.mrf.mxu0 }
0x13e9   :  { %v2430_v8 = vadd.f32 %v2418_v11, %v2103_v46 }
0x13eb   :  { %v3158_v30 = vmul.f32 -1.442695, %v2430_v8 }
0x13ed   :  { %3411 = vpow2.f32 %v3158_v30 }
0x13f0   :  { %v2421_v56 = vpop.f32.mrf.mxu0 }
0x13f1   :  { %v2431_v31 = vadd.f32 %v2421_v56, %v2105_v28 }
0x13f3   :  { %v3412_v1 = vpop.eup %3411  ;;  %v3159_v9 = vmul.f32 -1.442695, %v2431_v31 }
0x13f4   :  { %v2446_v45 = vadd.f32 1.0, %v3412_v1 }
0x13f5   :  { %3413 = vpow2.f32 %v3159_v9 }
0x13f6   :  { %3415 = vrcp.f32 %v2446_v45  ;;  %v2461_v10 = vand.u32 2147483648, %v2446_v45  ;;  %v2459_v13 = vand.u32 2147483647, %v2446_v45  ;;  %vm2455_vm4 = vweird.f32 %v2446_v45 }
0x13f8   :  { %v2462_v52 = vor.u32 1.1754944e-38, %v2461_v10  ;;  %vm2460_vm6 = vcmp.eq.f32.partialorder %v2459_v13, 8.507059e+37 }
0x13fb   :  { %v3414_v3 = vpop.eup %3413 }
0x13fc   :  { %v3416_v63 = vpop.eup %3415  ;;  %v2447_v24 = vadd.f32 1.0, %v3414_v3 }
0x13fd   :  { %v2451_v20 = vmul.f32 %v3416_v63, %v2446_v45  ;;  %vm2456_vm3 = vweird.f32 %v3416_v63 }
0x13fe   :  { %3417 = vrcp.f32 %v2447_v24  ;;  %vm2457_vm5 = vmor %vm2455_vm4, %vm2456_vm3  ;;  %v2476_v61 = vand.u32 2147483648, %v2447_v24  ;;  %v2474_v6 = vand.u32 2147483647, %v2447_v24  ;;  %vm2470_vm8 = vweird.f32 %v2447_v24 }
0x13ff   :  { %v2452_v39 = vsub.f32 1.0, %v2451_v20 }
0x1400   :  { %v2477_v22 = vor.u32 1.1754944e-38, %v2476_v61  ;;  %vm2475_vm10 = vcmp.eq.f32.partialorder %v2474_v6, 8.507059e+37 }
0x1401   :  { %v2453_v14 = vmul.f32 %v3416_v63, %v2452_v39 }
0x1403   :  { %v2454_v42 = vadd.f32 %v3416_v63, %v2453_v14 }
0x1404   :  { %v3418_v21 = vpop.eup %3417 }
0x1405   :  { %v2466_v33 = vmul.f32 %v3418_v21, %v2447_v24  ;;  %v2458_v54 = vsel %vm2457_vm5, %v3416_v63, %v2454_v42  ;;  %vm2471_vm7 = vweird.f32 %v3418_v21 }
0x1406   :  { %v4489_v38 = vsel %vm2460_vm6, %v2462_v52, %v2458_v54  ;;  %vm2472_vm9 = vmor %vm2470_vm8, %vm2471_vm7 }
0x1407   :  { %v2467_v29 = vsub.f32 1.0, %v2466_v33  ;;  %v2510_v62 = vmul.f32 2.0, %v4489_v38  ;;  %v2518_v52 = vmul.f32 %v4489_v38, %v4439_v41 }
0x1409   :  { %v3162_v40 = vadd.f32 -1.0, %v2510_v62  ;;  %v2468_v44 = vmul.f32 %v3418_v21, %v2467_v29 }
0x140b   :  { %2526 = vrot.lane.b32.xlu2 %v3162_v40, %s3500_s17  ;;  %v2469_v0 = vadd.f32 %v3418_v21, %v2468_v44 }
0x140d   :  { %v2473_v17 = vsel %vm2472_vm9, %v3418_v21, %v2469_v0 }
0x140e   :  { %v4493_v51 = vsel %vm2475_vm10, %v2477_v22, %v2473_v17 }
0x140f   :  { %v2511_v2 = vmul.f32 2.0, %v4493_v51  ;;  %v2519_v62 = vmul.f32 %v4493_v51, %v4449_v53  ;;  %v3209_v53 = vld [vmem:[%s4631_s0 + $0x90] sm:$0xff] }
0x1410   :  { %v2424_v50 = vpop.f32.mrf.mxu0  ;;  %3152 = vmatmul.msk.bf16.vlgmr.msra.gmra.mxu1 %vm58_vm0, %v3209_v53 }
0x1411   :  { %v2432_v32 = vadd.f32 %v2424_v50, %v2108_v47  ;;  %v3163_v37 = vadd.f32 -1.0, %v2511_v2 }
0x1413   :  { %v3160_v26 = vmul.f32 -1.442695, %v2432_v32  ;;  %2528 = vrot.lane.b32.xlu0 %v3163_v37, %s3500_s17 }
0x1415   :  { %3419 = vpow2.f32 %v3160_v26 }
0x141b   :  { %v3420_v35 = vpop.eup %3419 }
0x141c   :  { %v2448_v16 = vadd.f32 1.0, %v3420_v35 }
0x141e   :  { %3421 = vrcp.f32 %v2448_v16  ;;  %v2491_v4 = vand.u32 2147483648, %v2448_v16  ;;  %v2489_v7 = vand.u32 2147483647, %v2448_v16  ;;  %vm2485_vm12 = vweird.f32 %v2448_v16 }
0x1420   :  { %v2492_v58 = vor.u32 1.1754944e-38, %v2491_v4  ;;  %vm2490_vm14 = vcmp.eq.f32.partialorder %v2489_v7, 8.507059e+37 }
0x1424   :  { %v3422_v55 = vpop.eup %3421 }
0x1425   :  { %v2481_v49 = vmul.f32 %v3422_v55, %v2448_v16  ;;  %vm2486_vm11 = vweird.f32 %v3422_v55 }
0x1426   :  { %vm2487_vm13 = vmor %vm2485_vm12, %vm2486_vm11 }
0x1427   :  { %v2482_v48 = vsub.f32 1.0, %v2481_v49  ;;  %v3497_v49 = vld [vmem:[%s4634_s2] ss:$0 sm:$0xff] }
0x1429   :  { %v2483_v34 = vmul.f32 %v3422_v55, %v2482_v48 }
0x142b   :  { %v2484_v25 = vadd.f32 %v3422_v55, %v2483_v34 }
0x142d   :  { %v2488_v19 = vsel %vm2487_vm13, %v3422_v55, %v2484_v25 }
0x142e   :  { %v4498_v36 = vsel %vm2490_vm14, %v2492_v58, %v2488_v19 }
0x142f   :  { %v2512_v15 = vmul.f32 2.0, %v4498_v36  ;;  %v2520_v44 = vmul.f32 %v4498_v36, %v4459_v43  ;;  %v3210_v43 = vld [vmem:[%s4631_s0 + $0x98] sm:$0xff] }
0x1430   :  { %v2427_v60 = vpop.f32.mrf.mxu0  ;;  %3153 = vmatmul.msk.bf16.gmra.mxu1 %vm58_vm0, %v3210_v43 }
0x1431   :  { %v2433_v57 = vadd.f32 %v2427_v60, %v2110_v59  ;;  %v3164_v27 = vadd.f32 -1.0, %v2512_v15 }
0x1433   :  { %v3161_v23 = vmul.f32 -1.442695, %v2433_v57  ;;  %2530 = vrot.lane.b32.xlu1 %v3164_v27, %s3500_s17 }
0x1435   :  { %3423 = vpow2.f32 %v3161_v23 }
0x143b   :  { %v3424_v46 = vpop.eup %3423 }
0x143c   :  { %v2449_v11 = vadd.f32 1.0, %v3424_v46 }
0x143e   :  { %3425 = vrcp.f32 %v2449_v11  ;;  %v2506_v56 = vand.u32 2147483648, %v2449_v11  ;;  %v2504_v1 = vand.u32 2147483647, %v2449_v11  ;;  %vm2500_vm1 = vweird.f32 %v2449_v11 }
0x1440   :  { %v2507_v5 = vor.u32 1.1754944e-38, %v2506_v56  ;;  %vm2505_vm4 = vcmp.eq.f32.partialorder %v2504_v1, 8.507059e+37 }
0x1444   :  { %v3426_v8 = vpop.eup %3425 }
0x1445   :  { %v2496_v30 = vmul.f32 %v3426_v8, %v2449_v11  ;;  %vm2501_vm15 = vweird.f32 %v3426_v8 }
0x1446   :  { %vm2502_vm3 = vmor %vm2500_vm1, %vm2501_vm15 }
0x1447   :  { %v2497_v28 = vsub.f32 1.0, %v2496_v30 }
0x1449   :  { %v2498_v31 = vmul.f32 %v3426_v8, %v2497_v28  ;;  %v3498_v28 = vld [vmem:[%s4635_s5] ss:$0 sm:$0xff] }
0x144b   :  { %v2499_v18 = vadd.f32 %v3426_v8, %v2498_v31 }
0x144d   :  { %v2503_v9 = vsel %vm2502_vm3, %v3426_v8, %v2499_v18 }
0x144e   :  { %v4504_v45 = vsel %vm2505_vm4, %v2507_v5, %v2503_v9 }
0x144f   :  { %v2513_v3 = vmul.f32 2.0, %v4504_v45  ;;  %v2521_v17 = vmul.f32 %v4504_v45, %v4464_v12 }
0x1451   :  { %v3165_v63 = vadd.f32 -1.0, %v2513_v3 }
0x1453   :  { %2532 = vrot.lane.b32.xlu2 %v3165_v63, %s3500_s17 }
0x1465   :  { %v2527_v24 = vpop.permute.xlu2 %2526 }
0x1466   :  { %v2538_v20 = vmul.f32 %v2527_v24, %v4489_v38 }
0x1468   :  { %2546 = vrot.lane.b32.xlu0 %v2538_v20, %s3501_s18 }
0x1485   :  { %v2529_v39 = vpop.permute.xlu0 %2528 }
0x1486   :  { %v2539_v10 = vmul.f32 %v2529_v39, %v4493_v51 }
0x1488   :  { %2548 = vrot.lane.b32.xlu1 %v2539_v10, %s3501_s18 }
0x148d   :  { %v2346_v55 = vpop.f32.mrf.mxu1 }
0x148e   :  { %v2347_v48 = vadd.f32 %v3497_v49, %v2346_v55 }
0x1495   :  { %v2348_v4 = vpop.f32.mrf.mxu1 }
0x1496   :  { %v2349_v34 = vadd.f32 %v3497_v49, %v2348_v4 }
0x1498   :  { %v2357_v7 = vmax.f32 %v2349_v34, 0.0 }
0x14a5   :  { %v2531_v14 = vpop.permute.xlu1 %2530 }
0x14a6   :  { %v2540_v13 = vmul.f32 %v2531_v14, %v4498_v36 }
0x14a8   :  { %2550 = vrot.lane.b32.xlu2 %v2540_v13, %s3501_s18 }
0x14ad   :  { %v2533_v42 = vpop.permute.xlu2 %2532  ;;  %v2351_v19 = vpop.f32.mrf.mxu1 }
0x14ae   :  { %v2541_v21 = vmul.f32 %v2533_v42, %v4504_v45 }
0x14b0   :  { %2552 = vrot.lane.b32.xlu0 %v2541_v21, %s3501_s18 }
0x14b5   :  { %v2353_v15 = vpop.f32.mrf.mxu1 }
0x14b6   :  { %v2354_v57 = vadd.f32 %v3497_v49, %v2353_v15 }
0x14b8   :  { %v2359_v27 = vmax.f32 %v2354_v57, 0.0 }
0x14da   :  { %v2547_v33 = vpop.permute.xlu0 %2546 }
0x14db   :  { %v4518_v54 = vadd.f32 %v2547_v33, %v2518_v52 }
0x14dd   :  { %3427 = vtanh.f32 %v4518_v54 }
0x14e3   :  { %v3428_v29 = vpop.eup %3427 }
0x14e4   :  { %2570 = vrot.lane.b32.xlu1 %v3428_v29, %s3500_s17 }
0x14fa   :  { %v2549_v61 = vpop.permute.xlu1 %2548 }
0x14fb   :  { %v4524_v40 = vadd.f32 %v2549_v61, %v2519_v62 }
0x14fd   :  { %3429 = vtanh.f32 %v4524_v40 }
0x1502   :  { %v2551_v41 = vpop.permute.xlu2 %2550 }
0x1503   :  { %v3430_v6 = vpop.eup %3429  ;;  %v4529_v0 = vadd.f32 %v2551_v41, %v2520_v44 }
0x1504   :  { %2572 = vrot.lane.b32.xlu2 %v3430_v6, %s3500_s17 }
0x1505   :  { %3431 = vtanh.f32 %v4529_v0 }
0x150b   :  { %v3432_v22 = vpop.eup %3431 }
0x150c   :  { %2574 = vrot.lane.b32.xlu0 %v3432_v22, %s3500_s17 }
0x1522   :  { %v2553_v47 = vpop.permute.xlu0 %2552 }
0x1523   :  { %v4544_v2 = vadd.f32 %v2553_v47, %v2521_v17 }
0x1525   :  { %3433 = vtanh.f32 %v4544_v2 }
0x152b   :  { %v3434_v50 = vpop.eup %3433 }
0x152c   :  { %2576 = vrot.lane.b32.xlu1 %v3434_v50, %s3500_s17 }
0x1556   :  { %v2571_v32 = vpop.permute.xlu1 %2570 }
0x1557   :  { %v2582_v37 = vmul.f32 %v2571_v32, %v4489_v38  ;;  %v2356_v38 = vmax.f32 %v2347_v48, 0.0 }
0x1559   :  { %2590 = vrot.lane.b32.xlu2 %v2582_v37, %s3501_s18  ;;  %v2360_v25 = vpack.c.bf16 %v2357_v7, %v2356_v38 }
0x155b   :  { %2370 = vmatmul.bf16.vlgmr.msra.gmra.mxu3 %v2360_v25 }
0x155e   :  { %v2573_v26 = vpop.permute.xlu2 %2572 }
0x155f   :  { %v2583_v35 = vmul.f32 %v2573_v26, %v4493_v51 }
0x1561   :  { %2592 = vrot.lane.b32.xlu0 %v2583_v35, %s3501_s18 }
0x157e   :  { %v2575_v16 = vpop.permute.xlu0 %2574 }
0x157f   :  { %v2584_v12 = vmul.f32 %v2575_v16, %v4498_v36  ;;  %v2352_v36 = vadd.f32 %v3497_v49, %v2351_v19 }
0x1581   :  { %2594 = vrot.lane.b32.xlu1 %v2584_v12, %s3501_s18  ;;  %v2358_v60 = vmax.f32 %v2352_v36, 0.0 }
0x1583   :  { %v2361_v23 = vpack.c.bf16 %v2359_v27, %v2358_v60 }
0x1585   :  { %2375 = vmatmul.bf16.gmra.mxu3 %v2361_v23 }
0x159e   :  { %v2577_v51 = vpop.permute.xlu1 %2576 }
0x159f   :  { %v2585_v58 = vmul.f32 %v2577_v51, %v4504_v45 }
0x15a1   :  { %2596 = vrot.lane.b32.xlu2 %v2585_v58, %s3501_s18 }
0x15b3   :  { %v2591_v59 = vpop.permute.xlu2 %2590 }
0x15b4   :  { %3166 = vmatmul.msk.f32.vlgmr.msrb.gmra.mxu2 %vm245_vm2, %v2591_v59 }
0x15d3   :  { %v2593_v46 = vpop.permute.xlu0 %2592 }
0x15d4   :  { %3167 = vmatmul.msk.f32.gmra.mxu2 %vm245_vm2, %v2593_v46 }
0x15de   :  { %v2371_v30 = vpop.f32.mrf.mxu3 }
0x15df   :  { %v2372_v56 = vadd.f32 %v3498_v28, %v2371_v30 }
0x15e6   :  { %v2373_v10 = vpop.f32.mrf.mxu3 }
0x15e7   :  { %v2374_v42 = vadd.f32 %v3498_v28, %v2373_v10 }
0x15f3   :  { %v2595_v11 = vpop.permute.xlu1 %2594 }
0x15f4   :  { %3168 = vmatmul.msk.f32.gmra.mxu2 %vm245_vm2, %v2595_v11 }
0x15fb   :  { %v2597_v8 = vpop.permute.xlu2 %2596 }
0x15fc   :  { %3169 = vmatmul.msk.f32.gmra.mxu2 %vm245_vm2, %v2597_v8 }
0x1608   :  { %v2376_v32 = vpop.f32.mrf.mxu3 }
0x1609   :  { %v2377_v12 = vadd.f32 %v3498_v28, %v2376_v32 }
0x1610   :  { %v2378_v34 = vpop.f32.mrf.mxu3 }
0x1611   :  { %v2379_v7 = vadd.f32 %v3498_v28, %v2378_v34 }
0x1637   :  { %v2623_v31 = vpop.f32.mrf.mxu2 }
0x1638   :  { %v2635_v1 = vadd.f32 %v2623_v31, %v2372_v56 }
0x163a   :  { %v3170_v18 = vmul.f32 -1.442695, %v2635_v1 }
0x163c   :  { %3435 = vpow2.f32 %v3170_v18 }
0x1642   :  { %v3436_v5 = vpop.eup %3435 }
0x1643   :  { %v2651_v9 = vadd.f32 1.0, %v3436_v5 }
0x1645   :  { %3437 = vrcp.f32 %v2651_v9  ;;  %v2666_v24 = vand.u32 2147483648, %v2651_v9  ;;  %v2664_v39 = vand.u32 2147483647, %v2651_v9  ;;  %vm2660_vm5 = vweird.f32 %v2651_v9 }
0x1647   :  { %v2667_v13 = vor.u32 1.1754944e-38, %v2666_v24  ;;  %vm2665_vm7 = vcmp.eq.f32.partialorder %v2664_v39, 8.507059e+37 }
0x164b   :  { %v3438_v45 = vpop.eup %3437 }
0x164c   :  { %v2656_v3 = vmul.f32 %v3438_v45, %v2651_v9  ;;  %vm2661_vm0 = vweird.f32 %v3438_v45 }
0x164d   :  { %vm2662_vm6 = vmor %vm2660_vm5, %vm2661_vm0 }
0x164e   :  { %v2657_v63 = vsub.f32 1.0, %v2656_v3 }
0x1650   :  { %v2658_v20 = vmul.f32 %v3438_v45, %v2657_v63 }
0x1652   :  { %v2659_v14 = vadd.f32 %v3438_v45, %v2658_v20 }
0x1654   :  { %v2663_v21 = vsel %vm2662_vm6, %v3438_v45, %v2659_v14  ;;  %vm2917_vm6 = vcmask 7168  }
0x1655   :  { %v4566_v52 = vsel %vm2665_vm7, %v2667_v13, %v2663_v21 }
0x1656   :  { %v2715_v33 = vmul.f32 2.0, %v4566_v52 }
0x1657   :  { %v2626_v29 = vpop.f32.mrf.mxu2 }
0x1658   :  { %v2636_v62 = vadd.f32 %v2626_v29, %v2374_v42  ;;  %v3174_v61 = vadd.f32 -1.0, %v2715_v33 }
0x165a   :  { %v3171_v44 = vmul.f32 -1.442695, %v2636_v62  ;;  %2731 = vrot.lane.b32.xlu0 %v3174_v61, %s3500_s17 }
0x165c   :  { %3439 = vpow2.f32 %v3171_v44 }
0x1662   :  { %v3440_v41 = vpop.eup %3439 }
0x1663   :  { %v2652_v6 = vadd.f32 1.0, %v3440_v41 }
0x1665   :  { %3441 = vrcp.f32 %v2652_v6  ;;  %v2681_v17 = vand.u32 2147483648, %v2652_v6  ;;  %v2679_v50 = vand.u32 2147483647, %v2652_v6  ;;  %vm2675_vm9 = vweird.f32 %v2652_v6 }
0x1667   :  { %v2682_v26 = vor.u32 1.1754944e-38, %v2681_v17  ;;  %vm2680_vm11 = vcmp.eq.f32.partialorder %v2679_v50, 8.507059e+37 }
0x166b   :  { %v3442_v53 = vpop.eup %3441 }
0x166c   :  { %v2671_v22 = vmul.f32 %v3442_v53, %v2652_v6  ;;  %vm2676_vm8 = vweird.f32 %v3442_v53  ;;  %v2723_v6 = vmul.f32 %v4566_v52, %v4518_v54 }
0x166d   :  { %vm2677_vm10 = vmor %vm2675_vm9, %vm2676_vm8 }
0x166e   :  { %v2672_v43 = vsub.f32 1.0, %v2671_v22 }
0x1670   :  { %v2673_v47 = vmul.f32 %v3442_v53, %v2672_v43 }
0x1672   :  { %v2674_v37 = vadd.f32 %v3442_v53, %v2673_v47 }
0x1674   :  { %v2678_v35 = vsel %vm2677_vm10, %v3442_v53, %v2674_v37  ;;  %v3217_v37 = vld [vmem:[%s4636_s6] ss:$0 sm:$0xff] }
0x1675   :  { %v4570_v16 = vsel %vm2680_vm11, %v2682_v26, %v2678_v35 }
0x1676   :  { %v2716_v55 = vmul.f32 2.0, %v4570_v16  ;;  %v2724_v43 = vmul.f32 %v4570_v16, %v4524_v40 }
0x1677   :  { %v2629_v49 = vpop.f32.mrf.mxu2 }
0x1678   :  { %v2637_v48 = vadd.f32 %v2629_v49, %v2377_v12  ;;  %v3175_v4 = vadd.f32 -1.0, %v2716_v55 }
0x167a   :  { %v3172_v38 = vmul.f32 -1.442695, %v2637_v48  ;;  %2733 = vrot.lane.b32.xlu1 %v3175_v4, %s3500_s17 }
0x167c   :  { %3443 = vpow2.f32 %v3172_v38 }
0x167f   :  { %v2632_v25 = vpop.f32.mrf.mxu2 }
0x1680   :  { %v2638_v51 = vadd.f32 %v2632_v25, %v2379_v7 }
0x1682   :  { %v3444_v58 = vpop.eup %3443  ;;  %v3173_v19 = vmul.f32 -1.442695, %v2638_v51 }
0x1683   :  { %v2653_v36 = vadd.f32 1.0, %v3444_v58 }
0x1684   :  { %3445 = vpow2.f32 %v3173_v19 }
0x1685   :  { %3447 = vrcp.f32 %v2653_v36  ;;  %v2696_v23 = vand.u32 2147483648, %v2653_v36  ;;  %v2694_v11 = vand.u32 2147483647, %v2653_v36  ;;  %vm2690_vm13 = vweird.f32 %v2653_v36 }
0x1687   :  { %v2697_v28 = vor.u32 1.1754944e-38, %v2696_v23  ;;  %vm2695_vm15 = vcmp.eq.f32.partialorder %v2694_v11, 8.507059e+37 }
0x168a   :  { %v3446_v59 = vpop.eup %3445 }
0x168b   :  { %v3448_v15 = vpop.eup %3447  ;;  %v2654_v60 = vadd.f32 1.0, %v3446_v59 }
0x168c   :  { %v2686_v57 = vmul.f32 %v3448_v15, %v2653_v36  ;;  %vm2691_vm12 = vweird.f32 %v3448_v15 }
0x168d   :  { %3449 = vrcp.f32 %v2654_v60  ;;  %vm2692_vm14 = vmor %vm2690_vm13, %vm2691_vm12  ;;  %v2711_v9 = vand.u32 2147483648, %v2654_v60  ;;  %v2709_v63 = vand.u32 2147483647, %v2654_v60  ;;  %vm2705_vm3 = vweird.f32 %v2654_v60 }
0x168e   :  { %v2687_v27 = vsub.f32 1.0, %v2686_v57 }
0x168f   :  { %v2712_v20 = vor.u32 1.1754944e-38, %v2711_v9  ;;  %vm2710_vm0 = vcmp.eq.f32.partialorder %v2709_v63, 8.507059e+37 }
0x1690   :  { %v2688_v46 = vmul.f32 %v3448_v15, %v2687_v27 }
0x1692   :  { %v2689_v8 = vadd.f32 %v3448_v15, %v2688_v46 }
0x1693   :  { %v3450_v30 = vpop.eup %3449 }
0x1694   :  { %v2701_v56 = vmul.f32 %v3450_v30, %v2654_v60  ;;  %v2693_v31 = vsel %vm2692_vm14, %v3448_v15, %v2689_v8  ;;  %vm2706_vm1 = vweird.f32 %v3450_v30  ;;  %v13_v8 = vstv %s4637_s7 }
0x1695   :  { %v4574_v1 = vsel %vm2695_vm15, %v2697_v28, %v2693_v31  ;;  %vm2707_vm4 = vmor %vm2705_vm3, %vm2706_vm1  ;;  %14 = vst [vmem:[#allocation2] sm:$0x1] %v13_v8 }
0x1696   :  { %v2702_v18 = vsub.f32 1.0, %v2701_v56  ;;  %v2717_v5 = vmul.f32 2.0, %v4574_v1  ;;  %v2725_v54 = vmul.f32 %v4574_v1, %v4529_v0 }
0x1698   :  { %v2703_v45 = vmul.f32 %v3450_v30, %v2702_v18  ;;  %v3176_v3 = vadd.f32 -1.0, %v2717_v5 }
0x169a   :  { %2735 = vrot.lane.b32.xlu2 %v3176_v3, %s3500_s17  ;;  %v2704_v24 = vadd.f32 %v3450_v30, %v2703_v45 }
0x169c   :  { %v2708_v39 = vsel %vm2707_vm4, %v3450_v30, %v2704_v24 }
0x169d   :  { %v2713_v10 = vsel %vm2710_vm0, %v2712_v20, %v2708_v39 }
0x169e   :  { %v2718_v14 = vmul.f32 2.0, %v2713_v10  ;;  %v2726_v12 = vmul.f32 %v2713_v10, %v4544_v2 }
0x16a0   :  { %v3177_v13 = vadd.f32 -1.0, %v2718_v14 }
0x16a2   :  { %2737 = vrot.lane.b32.xlu0 %v3177_v13, %s3500_s17 }
0x16cc   :  { %v2732_v42 = vpop.permute.xlu0 %2731 }
0x16cd   :  { %v2743_v21 = vmul.f32 %v2732_v42, %v4566_v52 }
0x16cf   :  { %2751 = vrot.lane.b32.xlu1 %v2743_v21, %s3501_s18 }
0x16ec   :  { %v2734_v33 = vpop.permute.xlu1 %2733 }
0x16ed   :  { %v2744_v29 = vmul.f32 %v2734_v33, %v4570_v16 }
0x16ef   :  { %2753 = vrot.lane.b32.xlu2 %v2744_v29, %s3501_s18 }
0x16f4   :  { %v2736_v62 = vpop.permute.xlu2 %2735 }
0x16f5   :  { %v2745_v61 = vmul.f32 %v2736_v62, %v4574_v1 }
0x16f7   :  { %2755 = vrot.lane.b32.xlu0 %v2745_v61, %s3501_s18 }
0x1714   :  { %v2738_v44 = vpop.permute.xlu0 %2737 }
0x1715   :  { %v2746_v41 = vmul.f32 %v2738_v44, %v2713_v10 }
0x1717   :  { %2757 = vrot.lane.b32.xlu1 %v2746_v41, %s3501_s18 }
0x1741   :  { %v2752_v53 = vpop.permute.xlu1 %2751 }
0x1742   :  { %v2763_v22 = vadd.f32 %v2752_v53, %v2723_v6 }
0x1744   :  { %3451 = vtanh.f32 %v2763_v22 }
0x1749   :  { %v2754_v17 = vpop.permute.xlu2 %2753 }
0x174a   :  { %v3452_v47 = vpop.eup %3451  ;;  %v2764_v50 = vadd.f32 %v2754_v17, %v2724_v43 }
0x174b   :  { %2775 = vrot.lane.b32.xlu2 %v3452_v47, %s3500_s17 }
0x174c   :  { %3453 = vtanh.f32 %v2764_v50 }
0x1752   :  { %v3454_v32 = vpop.eup %3453 }
0x1753   :  { %2777 = vrot.lane.b32.xlu0 %v3454_v32, %s3500_s17 }
0x175b   :  { %2798 = vrot.lane.b32.xlu0 %v3217_v37, %s3502_s16 }
0x1769   :  { %v2756_v26 = vpop.permute.xlu0 %2755 }
0x176a   :  { %v2765_v40 = vadd.f32 %v2756_v26, %v2725_v54 }
0x176c   :  { %3455 = vtanh.f32 %v2765_v40 }
0x1772   :  { %v3456_v35 = vpop.eup %3455 }
0x1773   :  { %2779 = vrot.lane.b32.xlu1 %v3456_v35, %s3500_s17 }
0x1789   :  { %v2758_v55 = vpop.permute.xlu1 %2757 }
0x178a   :  { %v2766_v49 = vadd.f32 %v2758_v55, %v2726_v12 }
0x178c   :  { %3457 = vtanh.f32 %v2766_v49 }
0x1792   :  { %v3458_v48 = vpop.eup %3457 }
0x1793   :  { %2781 = vrot.lane.b32.xlu2 %v3458_v48, %s3500_s17 }
0x17a5   :  { %v2776_v4 = vpop.permute.xlu2 %2775 }
0x17a6   :  { %v2787_v34 = vmul.f32 %v2776_v4, %v4566_v52 }
0x17a8   :  { %v2791_v7 = vmax.f32 %v2787_v34, 0.0 }
0x17c5   :  { %v2778_v38 = vpop.permute.xlu0 %2777 }
0x17c6   :  { %v2788_v0 = vmul.f32 %v2778_v38, %v4570_v16 }
0x17c8   :  { %v2792_v25 = vmax.f32 %v2788_v0, 0.0 }
0x17cd   :  { %v2799_v51 = vpop.permute.xlu0 %2798 }
0x17ce   :  { %v2801_v58 = vmul.f32 %v2799_v51, %v2791_v7  ;;  %v2802_v19 = vmul.f32 %v2799_v51, %v2792_v25 }
0x17d0   :  { %2811 = vrot.lane.b32.xlu2 %v2802_v19, %s3501_s18  ;;  %2809 = vrot.lane.b32.xlu1 %v2801_v58, %s3501_s18 }
0x17e5   :  { %v2780_v2 = vpop.permute.xlu1 %2779 }
0x17e6   :  { %v2789_v36 = vmul.f32 %v2780_v2, %v4574_v1  ;;  %v3218_v1 = vld [vmem:[#allocation2] ss:$0 sm:$0xff] }
0x17e8   :  { %v2793_v59 = vmax.f32 %v2789_v36, 0.0 }
0x17ea   :  { %v2803_v15 = vmul.f32 %v2799_v51, %v2793_v59 }
0x17ec   :  { %2813 = vrot.lane.b32.xlu0 %v2803_v15, %s3501_s18 }
0x17ed   :  { %v2782_v60 = vpop.permute.xlu2 %2781 }
0x17ee   :  { %v2790_v52 = vmul.f32 %v2782_v60, %v2713_v10 }
0x17f0   :  { %v2794_v57 = vmax.f32 %v2790_v52, 0.0 }
0x17f2   :  { %v2804_v16 = vmul.f32 %v2799_v51, %v2794_v57 }
0x17f4   :  { %2815 = vrot.lane.b32.xlu1 %v2804_v16, %s3501_s18 }
0x182a   :  { %v2812_v27 = vpop.permute.xlu2 %2811 }
0x182b   :  { %v2824_v23 = vsel %vm245_vm2, %v2812_v27, 0.0 }
0x182c   :  { %2825 = vadd.xlane.f32.xlu0 %v2824_v23 }
0x1842   :  { %v2810_v46 = vpop.permute.xlu1 %2809 }
0x1843   :  { %v2821_v11 = vsel %vm245_vm2, %v2810_v46, 0.0 }
0x1844   :  { %2822 = vadd.xlane.f32.xlu2 %v2821_v11 }
0x185e   :  { %v2814_v30 = vpop.permute.xlu0 %2813 }
0x185f   :  { %v2827_v28 = vsel %vm245_vm2, %v2814_v30, 0.0 }
0x1860   :  { %2828 = vadd.xlane.f32.xlu1 %v2827_v28 }
0x1866   :  { %v2816_v56 = vpop.permute.xlu1 %2815 }
0x1867   :  { %v2830_v31 = vsel %vm245_vm2, %v2816_v56, 0.0 }
0x1868   :  { %2831 = vadd.xlane.f32.xlu2 %v2830_v31 }
0x189f   :  { %v2826_v18 = vpop.xlane.xlu0 %2825 }
0x18a0   :  { %v2838_v5 = vadd.f32 %v3218_v1, %v2826_v18 }
0x18a2   :  { %v3179_v9 = vmul.f32 -1.442695, %v2838_v5 }
0x18a4   :  { %3459 = vpow2.f32 %v3179_v9 }
0x18aa   :  { %v3460_v45 = vpop.eup %3459 }
0x18ab   :  { %v2854_v3 = vadd.f32 1.0, %v3460_v45 }
0x18ad   :  { %3461 = vrcp.f32 %v2854_v3  ;;  %v2883_v39 = vand.u32 2147483648, %v2854_v3  ;;  %v2881_v13 = vand.u32 2147483647, %v2854_v3  ;;  %vm2877_vm2 = vweird.f32 %v2854_v3 }
0x18af   :  { %v2884_v29 = vor.u32 1.1754944e-38, %v2883_v39  ;;  %vm2882_vm8 = vcmp.eq.f32.partialorder %v2881_v13, 8.507059e+37 }
0x18b3   :  { %v3462_v63 = vpop.eup %3461 }
0x18b4   :  { %v2873_v24 = vmul.f32 %v3462_v63, %v2854_v3  ;;  %vm2878_vm5 = vweird.f32 %v3462_v63 }
0x18b5   :  { %vm2879_vm7 = vmor %vm2877_vm2, %vm2878_vm5 }
0x18b6   :  { %v2874_v20 = vsub.f32 1.0, %v2873_v24 }
0x18b7   :  { %v2823_v10 = vpop.xlane.xlu2 %2822 }
0x18b8   :  { %v2875_v14 = vmul.f32 %v3462_v63, %v2874_v20  ;;  %v2837_v42 = vadd.f32 %v3218_v1, %v2823_v10 }
0x18ba   :  { %v2876_v21 = vadd.f32 %v3462_v63, %v2875_v14  ;;  %v3178_v33 = vmul.f32 -1.442695, %v2837_v42 }
0x18bc   :  { %v2880_v62 = vsel %vm2879_vm7, %v3462_v63, %v2876_v21  ;;  %3463 = vpow2.f32 %v3178_v33 }
0x18bd   :  { %v2885_v61 = vsel %vm2882_vm8, %v2884_v29, %v2880_v62 }
0x18be   :  { %2919 = vst.msk [vmem:[%s4638_s8 + $0x8] sm:$0xff] %vm2917_vm6, %v2885_v61 }
0x18c2   :  { %v3464_v44 = vpop.eup %3463 }
0x18c3   :  { %v2853_v41 = vadd.f32 1.0, %v3464_v44 }
0x18c5   :  { %3465 = vrcp.f32 %v2853_v41  ;;  %v2868_v43 = vand.u32 2147483648, %v2853_v41  ;;  %v2866_v47 = vand.u32 2147483647, %v2853_v41  ;;  %vm2862_vm10 = vweird.f32 %v2853_v41 }
0x18c7   :  { %v2869_v32 = vor.u32 1.1754944e-38, %v2868_v43  ;;  %vm2867_vm12 = vcmp.eq.f32.partialorder %v2866_v47, 8.507059e+37 }
0x18cb   :  { %v3466_v6 = vpop.eup %3465 }
0x18cc   :  { %v2858_v53 = vmul.f32 %v3466_v6, %v2853_v41  ;;  %vm2863_vm9 = vweird.f32 %v3466_v6 }
0x18cd   :  { %vm2864_vm11 = vmor %vm2862_vm10, %vm2863_vm9 }
0x18ce   :  { %v2859_v22 = vsub.f32 1.0, %v2858_v53 }
0x18d0   :  { %v2860_v17 = vmul.f32 %v3466_v6, %v2859_v22 }
0x18d2   :  { %v2861_v50 = vadd.f32 %v3466_v6, %v2860_v17 }
0x18d3   :  { %v2829_v37 = vpop.xlane.xlu1 %2828 }
0x18d4   :  { %v2865_v54 = vsel %vm2864_vm11, %v3466_v6, %v2861_v50  ;;  %v2839_v26 = vadd.f32 %v3218_v1, %v2829_v37 }
0x18d5   :  { %v2870_v40 = vsel %vm2867_vm12, %v2869_v32, %v2865_v54 }
0x18d6   :  { %2918 = vst.msk [vmem:[%s4638_s8] sm:$0xff] %vm2917_vm6, %v2870_v40  ;;  %v3180_v35 = vmul.f32 -1.442695, %v2839_v26 }
0x18d8   :  { %3467 = vpow2.f32 %v3180_v35 }
0x18db   :  { %v2832_v12 = vpop.xlane.xlu2 %2831 }
0x18dc   :  { %v2840_v55 = vadd.f32 %v3218_v1, %v2832_v12 }
0x18de   :  { %v3468_v49 = vpop.eup %3467  ;;  %v3181_v48 = vmul.f32 -1.442695, %v2840_v55 }
0x18df   :  { %v2855_v4 = vadd.f32 1.0, %v3468_v49 }
0x18e0   :  { %3469 = vpow2.f32 %v3181_v48 }
0x18e1   :  { %3471 = vrcp.f32 %v2855_v4  ;;  %v2898_v51 = vand.u32 2147483648, %v2855_v4  ;;  %v2896_v19 = vand.u32 2147483647, %v2855_v4  ;;  %vm2892_vm14 = vweird.f32 %v2855_v4 }
0x18e3   :  { %v2899_v59 = vor.u32 1.1754944e-38, %v2898_v51  ;;  %vm2897_vm1 = vcmp.eq.f32.partialorder %v2896_v19, 8.507059e+37 }
0x18e6   :  { %v3470_v38 = vpop.eup %3469 }
0x18e7   :  { %v3472_v34 = vpop.eup %3471  ;;  %v2856_v0 = vadd.f32 1.0, %v3470_v38 }
0x18e8   :  { %v2888_v7 = vmul.f32 %v3472_v34, %v2855_v4  ;;  %vm2893_vm13 = vweird.f32 %v3472_v34 }
0x18e9   :  { %3473 = vrcp.f32 %v2856_v0  ;;  %vm2894_vm15 = vmor %vm2892_vm14, %vm2893_vm13  ;;  %v2913_v16 = vand.u32 2147483648, %v2856_v0  ;;  %v2911_v23 = vand.u32 2147483647, %v2856_v0  ;;  %vm2907_vm4 = vweird.f32 %v2856_v0 }
0x18ea   :  { %v2889_v25 = vsub.f32 1.0, %v2888_v7 }
0x18eb   :  { %v2914_v11 = vor.u32 1.1754944e-38, %v2913_v16  ;;  %vm2912_vm5 = vcmp.eq.f32.partialorder %v2911_v23, 8.507059e+37 }
0x18ec   :  { %v2890_v58 = vmul.f32 %v3472_v34, %v2889_v25 }
0x18ee   :  { %v2891_v2 = vadd.f32 %v3472_v34, %v2890_v58 }
0x18ef   :  { %v3474_v36 = vpop.eup %3473 }
0x18f0   :  { %v2895_v15 = vsel %vm2894_vm15, %v3472_v34, %v2891_v2  ;;  %v2903_v60 = vmul.f32 %v3474_v36, %v2856_v0  ;;  %vm2908_vm3 = vweird.f32 %v3474_v36 }
0x18f1   :  { %v2900_v52 = vsel %vm2897_vm1, %v2899_v59, %v2895_v15  ;;  %vm2909_vm0 = vmor %vm2907_vm4, %vm2908_vm3 }
0x18f2   :  { %2920 = vst.msk [vmem:[%s4638_s8 + $0x10] sm:$0xff] %vm2917_vm6, %v2900_v52  ;;  %v2904_v57 = vsub.f32 1.0, %v2903_v60 }
0x18f4   :  { %v2905_v27 = vmul.f32 %v3474_v36, %v2904_v57 }
0x18f6   :  { %v2906_v46 = vadd.f32 %v3474_v36, %v2905_v27 }
0x18f8   :  { %v2910_v8 = vsel %vm2909_vm0, %v3474_v36, %v2906_v46 }
0x18f9   :  { %v2915_v30 = vsel %vm2912_vm5, %v2914_v11, %v2910_v8 }
0x18fa   :  { %2921 = vst.msk [vmem:[%s4638_s8 + $0x18] sm:$0xff] %vm2917_vm6, %v2915_v30 }

</bundles_post_ra>
